<compile_context>
chip_gen: v7x
topology: tpu7x:2x2x1
jax: 0.10.0
libtpu: 0.0.40
codegen_flags: <defaults>
</compile_context>

<pallas_src>
import functools

import jax
import jax.numpy as jnp
import numpy as np
from jax.experimental import pallas as pl
from jax.experimental.pallas import tpu as pltpu

LANE = 128


def _round_up(x, m):
    return (x + m - 1) // m * m


# ----------------------------------------------------------------------------
# Fused Pallas kernel: one grid step == one image
# ----------------------------------------------------------------------------
def _identity_block_kernel(
    x_ref,      # (1, HW, Cp)      f32  activations == residual
    w1_ref,     # (Cp, F1p)        bf16 conv1 weight, BN1 scale folded
    b1_ref,     # (1, F1p)         f32  folded BN1 bias
    w2_ref,     # (f*f*F1p, F2p)   bf16 conv2 im2col weight, BN2 folded
    b2_ref,     # (1, F2p)         f32
    w3_ref,     # (F2p, F3p)       bf16 conv3 weight, BN3 folded
    b3_ref,     # (1, F3p)         f32
    o_ref,      # (1, HW, F3p)     f32
    y1_ref,     # scratch (pad+HW+pad, F1p) bf16 : y1 flat + zero row-pads
    cols_ref,   # scratch (HW, f*f*F1p)     bf16 : im2col buffer
    *, H, W, f, pad,
):
    HW = H * W
    F1p = y1_ref.shape[-1]

    x2d = x_ref[0]                                    # (HW, Cp) f32
    xb = x2d.astype(jnp.bfloat16)

    # ---- stage 1: 1x1 conv (+ folded BN1 scale) + bias + ReLU ---------------
    y1 = jnp.dot(xb, w1_ref[...], preferred_element_type=jnp.float32)
    y1 = jnp.maximum(y1 + b1_ref[...], 0.0)           # (HW, F1p) f32

    # Flat y1 buffer: zero ONLY the two row-pad blocks (vertical conv padding);
    # the interior is fully overwritten and starts at the 8-aligned offset
    # `pad`, so all three stores are plain unmasked vst.
    zeros_pad = jnp.zeros((pad, F1p), jnp.bfloat16)
    y1_ref[pl.ds(0, pad), :] = zeros_pad
    y1_ref[pl.ds(pad + HW, pad), :] = zeros_pad
    y1_ref[pl.ds(pad, HW), :] = y1.astype(jnp.bfloat16)

    # ---- stage 2: im2col bands -> ONE deep matmul (K = f*f*F1p) -------------
    # Column mask handles the horizontal zero padding (row pads handle the
    # vertical one); w_idx = output-pixel column, computed once.
    w_idx = jax.lax.broadcasted_iota(jnp.int32, (HW, 1), 0) % W
    for k in range(f * f):
        di, dj = k // f, k % f
        start = pad + (di - 1) * W + (dj - 1)
        tap = y1_ref[pl.ds(start, HW), :]              # (HW, F1p) bf16
        if dj == 0:
            tap = jnp.where(w_idx >= 1, tap, 0)
        elif dj == f - 1:
            tap = jnp.where(w_idx <= W - 2, tap, 0)
        cols_ref[:, pl.ds(k * F1p, F1p)] = tap.astype(jnp.bfloat16)

    y2 = jnp.dot(cols_ref[...], w2_ref[...], preferred_element_type=jnp.float32)
    y2 = jnp.maximum(y2 + b2_ref[...], 0.0)            # (HW, F2p) f32

    # ---- stage 3: 1x1 conv + bias + shortcut + ReLU (all fused) -------------
    y3 = jnp.dot(y2.astype(jnp.bfloat16), w3_ref[...],
                 preferred_element_type=jnp.float32)
    o_ref[0] = jnp.maximum(y3 + b3_ref[...] + x2d, 0.0).astype(o_ref.dtype)


# ----------------------------------------------------------------------------
# Wrapper: BN folding, lane padding, im2col weight layout, BlockSpecs
# ----------------------------------------------------------------------------
def _bn_fold(gamma, beta, mean, var, eps=1e-5):
    scale = gamma / jnp.sqrt(var + eps)
    return scale, beta - mean * scale


def identity_block(x_nchw, params, f=3):
    N, C, H, W = x_nchw.shape
    F1 = params["w1"].shape[0]
    F2 = params["w2"].shape[0]
    F3 = params["w3"].shape[0]
    assert F3 == C, "residual add requires F3 == in_channels"
    assert params["w2"].shape[2] == f
    # nn.Conv2d(..., padding=True) means padding=1; spatial dims (and thus the
    # residual add) are only shape-valid for f == 3.
    assert f == 3

    Cp = _round_up(C, LANE)
    F1p = _round_up(F1, LANE)
    F2p = _round_up(F2, LANE)
    F3p = Cp                      # must match residual width
    HW = H * W
    pad = _round_up(W + 1, 8)     # zero row-pad depth; 8-aligned interior offset
    adt = jnp.float32             # activation / epilogue dtype
    wdt = jnp.bfloat16            # MXU input dtype (f32 accumulation)

    # ---- fold inference-mode BN into weights/biases; pad channels to 128 ----
    s1, bias1 = _bn_fold(params["g1"], params["b1"], params["m1"], params["v1"])
    s2, bias2 = _bn_fold(params["g2"], params["b2"], params["m2"], params["v2"])
    s3, bias3 = _bn_fold(params["g3"], params["b3"], params["m3"], params["v3"])

    w1 = params["w1"].reshape(F1, C).T * s1[None, :]                      # (C, F1)
    w1p = jnp.zeros((Cp, F1p), adt).at[:C, :F1].set(w1).astype(wdt)
    b1p = jnp.zeros((1, F1p), adt).at[0, :F1].set(bias1.astype(adt))

    # (F2, F1, kh, kw) -> (kh*kw, F1, F2) -> padded -> 2D (kh*kw*F1p, F2p)
    w2 = jnp.transpose(params["w2"], (2, 3, 1, 0)).reshape(f * f, F1, F2)
    w2 = w2 * s2[None, None, :]
    w2p = (jnp.zeros((f * f, F1p, F2p), adt).at[:, :F1, :F2].set(w2)
           .reshape(f * f * F1p, F2p).astype(wdt))
    b2p = jnp.zeros((1, F2p), adt).at[0, :F2].set(bias2.astype(adt))

    w3 = params["w3"].reshape(F3, F2).T * s3[None, :]                     # (F2, F3)
    w3p = jnp.zeros((F2p, F3p), adt).at[:F2, :F3].set(w3).astype(wdt)
    b3p = jnp.zeros((1, F3p), adt).at[0, :F3].set(bias3.astype(adt))

    # ---- activations: NCHW -> (N, H*W, Cp), lane-dense ----------------------
    x_nhwc = jnp.transpose(x_nchw, (0, 2, 3, 1)).astype(adt)              # (N,H,W,C)
    x_flat = jnp.zeros((N, HW, Cp), adt).at[:, :, :C].set(x_nhwc.reshape(N, HW, C))

    kernel = functools.partial(_identity_block_kernel, H=H, W=W, f=f, pad=pad)

    # cost estimate on true (unpadded) channel counts
    flops = 2 * N * HW * (C * F1 + f * f * F1 * F2 + F2 * F3)
    bytes_accessed = (x_flat.size * 4 + N * HW * F3p * 4
                      + (w1p.size + w2p.size + w3p.size) * 2
                      + (b1p.size + b2p.size + b3p.size) * 4)

    # explicit VMEM budget (double-buffered x/out blocks + resident weights +
    # scratch), with headroom; capped well under v7x's 64 MiB ceiling.
    vmem_need = (
        2 * HW * Cp * 4 + 2 * HW * F3p * 4                        # x / out blocks
        + 2 * (Cp * F1p + f * f * F1p * F2p + F2p * F3p) * 2      # bf16 weights
        + 2 * (F1p + F2p + F3p) * 4 * 2                           # biases
        + (2 * pad + HW) * F1p * 2                                # y1 flat scratch
        + HW * (f * f * F1p) * 2                                  # im2col scratch
    )
    vmem_limit = int(min(32 << 20, max(2 * vmem_need, 16 << 20)))

    out = pl.pallas_call(
        kernel,
        out_shape=jax.ShapeDtypeStruct((N, HW, F3p), adt),
        grid_spec=pltpu.PrefetchScalarGridSpec(
            num_scalar_prefetch=0,
            grid=(N,),
            in_specs=[
                pl.BlockSpec((1, HW, Cp), lambda n: (n, 0, 0)),          # x / residual
                pl.BlockSpec((Cp, F1p), lambda n: (0, 0)),               # w1 (resident)
                pl.BlockSpec((1, F1p), lambda n: (0, 0)),                # b1
                pl.BlockSpec((f * f * F1p, F2p), lambda n: (0, 0)),      # w2 (im2col 2D)
                pl.BlockSpec((1, F2p), lambda n: (0, 0)),                # b2
                pl.BlockSpec((F2p, F3p), lambda n: (0, 0)),              # w3
                pl.BlockSpec((1, F3p), lambda n: (0, 0)),                # b3
            ],
            out_specs=pl.BlockSpec((1, HW, F3p), lambda n: (n, 0, 0)),
            scratch_shapes=[
                pltpu.VMEM((2 * pad + HW, F1p), jnp.bfloat16),   # y1 flat + row pads
                pltpu.VMEM((HW, f * f * F1p), jnp.bfloat16),     # im2col buffer
            ],
        ),
        compiler_params=pltpu.CompilerParams(
            dimension_semantics=("parallel",),
            vmem_limit_bytes=vmem_limit,
        ),
        cost_estimate=pl.CostEstimate(
            flops=int(flops), transcendentals=0,
            bytes_accessed=int(bytes_accessed)),
    )(x_flat, w1p, b1p, w2p, b2p, w3p, b3p)

    out = out[:, :, :F3].reshape(N, H, W, F3)
    return jnp.transpose(out, (0, 3, 1, 2))


# ----------------------------------------------------------------------------
# Pure-JAX reference (NCHW, lax.conv) for correctness checking
# ----------------------------------------------------------------------------
def _reference(x, params, f=3, eps=1e-5):
    dn = ("NCHW", "OIHW", "NCHW")

    def bn(y, g, b, m, v):
        g, b, m, v = (t[None, :, None, None] for t in (g, b, m, v))
        return g * (y - m) / jnp.sqrt(v + eps) + b

    y = jax.lax.conv_general_dilated(x, params["w1"], (1, 1), "VALID",
                                     dimension_numbers=dn)
    y = jnp.maximum(bn(y, params["g1"], params["b1"], params["m1"], params["v1"]), 0.0)
    y = jax.lax.conv_general_dilated(y, params["w2"], (1, 1), ((1, 1), (1, 1)),
                                     dimension_numbers=dn)
    y = jnp.maximum(bn(y, params["g2"], params["b2"], params["m2"], params["v2"]), 0.0)
    y = jax.lax.conv_general_dilated(y, params["w3"], (1, 1), "VALID",
                                     dimension_numbers=dn)
    y = bn(y, params["g3"], params["b3"], params["m3"], params["v3"])
    return jnp.maximum(y + x, 0.0)


# ----------------------------------------------------------------------------
if __name__ == "__main__":
    key = jax.random.PRNGKey(0)
    N, C, H, W = 2, 4, 16, 16
    f = 3
    F1, F2, F3 = 8, 8, 4  # F3 == C so the residual add is shape-valid

    ks = jax.random.split(key, 16)
    x = jax.random.normal(ks[0], (N, C, H, W), jnp.float32)

    params = {
        "w1": 0.2 * jax.random.normal(ks[1], (F1, C, 1, 1), jnp.float32),
        "w2": 0.1 * jax.random.normal(ks[2], (F2, F1, f, f), jnp.float32),
        "w3": 0.2 * jax.random.normal(ks[3], (F3, F2, 1, 1), jnp.float32),
        # BatchNorm params / running stats (deterministic, non-trivial)
        "g1": 1.0 + 0.1 * jax.random.normal(ks[4], (F1,), jnp.float32),
        "b1": 0.1 * jax.random.normal(ks[5], (F1,), jnp.float32),
        "m1": 0.1 * jax.random.normal(ks[6], (F1,), jnp.float32),
        "v1": 1.0 + 0.1 * jnp.abs(jax.random.normal(ks[7], (F1,), jnp.float32)),
        "g2": 1.0 + 0.1 * jax.random.normal(ks[8], (F2,), jnp.float32),
        "b2": 0.1 * jax.random.normal(ks[9], (F2,), jnp.float32),
        "m2": 0.1 * jax.random.normal(ks[10], (F2,), jnp.float32),
        "v2": 1.0 + 0.1 * jnp.abs(jax.random.normal(ks[11], (F2,), jnp.float32)),
        "g3": 1.0 + 0.1 * jax.random.normal(ks[12], (F3,), jnp.float32),
        "b3": 0.1 * jax.random.normal(ks[13], (F3,), jnp.float32),
        "m3": 0.1 * jax.random.normal(ks[14], (F3,), jnp.float32),
        "v3": 1.0 + 0.1 * jnp.abs(jax.random.normal(ks[15], (F3,), jnp.float32)),
    }

    run = jax.jit(functools.partial(identity_block, f=f))
    out = jax.block_until_ready(run(x, params))

    ref = jax.block_until_ready(_reference(x, params, f=f))
    # bf16 MXU inputs with f32 accumulation: relax tolerance vs pure-f32 ref.
    np.testing.assert_allclose(np.asarray(out), np.asarray(ref),
                               rtol=2e-2, atol=2e-2)

    print("KERNEL_OK")
</pallas_src>

<mosaic_0001>
module attributes {stable_mosaic.version = 11 : i64} {
  func.func @_identity_block_kernel(%arg0: i32, %arg1: memref<1x256x128xf32, #tpu.memory_space<vmem>>, %arg2: memref<128x128xbf16, #tpu.memory_space<vmem>>, %arg3: memref<1x128xf32, #tpu.memory_space<vmem>>, %arg4: memref<1152x128xbf16, #tpu.memory_space<vmem>>, %arg5: memref<1x128xf32, #tpu.memory_space<vmem>>, %arg6: memref<128x128xbf16, #tpu.memory_space<vmem>>, %arg7: memref<1x128xf32, #tpu.memory_space<vmem>>, %arg8: memref<1x256x128xf32, #tpu.memory_space<vmem>>, %arg9: memref<304x128xbf16, #tpu.memory_space<vmem>>, %arg10: memref<256x1152xbf16, #tpu.memory_space<vmem>>) attributes {dimension_semantics = [#tpu.dimension_semantics<parallel>], iteration_bounds = array<i64: 2>, scalar_prefetch = 0 : i64, scratch_operands = 2 : i64, tpu.core_type = #tpu.core_type<tc>, window_params = [{transform_indices = @transform_0, window_bounds = array<i64: 1, 256, 128>}, {pipeline_mode = #tpu.pipeline_mode<synchronous>, transform_indices = @transform_1, window_bounds = array<i64: 128, 128>}, {pipeline_mode = #tpu.pipeline_mode<synchronous>, transform_indices = @transform_2, window_bounds = array<i64: 1, 128>}, {pipeline_mode = #tpu.pipeline_mode<synchronous>, transform_indices = @transform_3, window_bounds = array<i64: 1152, 128>}, {pipeline_mode = #tpu.pipeline_mode<synchronous>, transform_indices = @transform_4, window_bounds = array<i64: 1, 128>}, {pipeline_mode = #tpu.pipeline_mode<synchronous>, transform_indices = @transform_5, window_bounds = array<i64: 128, 128>}, {pipeline_mode = #tpu.pipeline_mode<synchronous>, transform_indices = @transform_6, window_bounds = array<i64: 1, 128>}, {transform_indices = @transform_7, window_bounds = array<i64: 1, 256, 128>}]} {
    %c0 = arith.constant 0 : index
    %c0_0 = arith.constant 0 : index
    %c0_1 = arith.constant 0 : index
    %0 = vector.load %arg1[%c0, %c0_0, %c0_1] : memref<1x256x128xf32, #tpu.memory_space<vmem>>, vector<1x256x128xf32>
    %1 = vector.shape_cast %0 : vector<1x256x128xf32> to vector<256x128xf32>
    %2 = arith.truncf %1 : vector<256x128xf32> to vector<256x128xbf16>
    %c0_2 = arith.constant 0 : index
    %c0_3 = arith.constant 0 : index
    %3 = vector.load %arg2[%c0_2, %c0_3] : memref<128x128xbf16, #tpu.memory_space<vmem>>, vector<128x128xbf16>
    %cst = arith.constant dense<0.000000e+00> : vector<256x128xf32>
    %4 = tpu.matmul %2, %3, %cst {dimension_numbers = #tpu.dot_dimension_numbers<[1], [0], [0], [1], [0, 0, 1, 1], [], []>} : vector<256x128xbf16>, vector<128x128xbf16>, vector<256x128xf32> -> vector<256x128xf32>
    %c0_4 = arith.constant 0 : index
    %c0_5 = arith.constant 0 : index
    %5 = vector.load %arg3[%c0_4, %c0_5] : memref<1x128xf32, #tpu.memory_space<vmem>>, vector<1x128xf32>
    %6 = vector.broadcast %5 : vector<1x128xf32> to vector<256x128xf32>
    %7 = arith.addf %4, %6 : vector<256x128xf32>
    %cst_6 = arith.constant 0.000000e+00 : f32
    %8 = vector.broadcast %cst_6 : f32 to vector<256x128xf32>
    %9 = arith.maximumf %7, %8 : vector<256x128xf32>
    %cst_7 = arith.constant 0.000000e+00 : bf16
    %10 = vector.broadcast %cst_7 : bf16 to vector<24x128xbf16>
    %c0_8 = arith.constant 0 : index
    %c0_9 = arith.constant 0 : index
    %11 = vector.load %arg9[%c0_8, %c0_9] : memref<304x128xbf16, #tpu.memory_space<vmem>>, vector<24x128xbf16>
    tpu.vector_store %arg9[%c0_8, %c0_9], %10 {strides = array<i32>} : memref<304x128xbf16, #tpu.memory_space<vmem>>, vector<24x128xbf16>,
    %c280 = arith.constant 280 : index
    %c0_10 = arith.constant 0 : index
    %12 = vector.load %arg9[%c280, %c0_10] : memref<304x128xbf16, #tpu.memory_space<vmem>>, vector<24x128xbf16>
    tpu.vector_store %arg9[%c280, %c0_10], %10 {strides = array<i32>} : memref<304x128xbf16, #tpu.memory_space<vmem>>, vector<24x128xbf16>,
    %13 = arith.truncf %9 : vector<256x128xf32> to vector<256x128xbf16>
    %c24 = arith.constant 24 : index
    %c0_11 = arith.constant 0 : index
    %14 = vector.load %arg9[%c24, %c0_11] : memref<304x128xbf16, #tpu.memory_space<vmem>>, vector<256x128xbf16>
    tpu.vector_store %arg9[%c24, %c0_11], %13 {strides = array<i32>} : memref<304x128xbf16, #tpu.memory_space<vmem>>, vector<256x128xbf16>,
    %15 = tpu.iota {dimensions = array<i32: 0>} : vector<256x1xi32>
    %c16_i32 = arith.constant 16 : i32
    %c0_i32 = arith.constant 0 : i32
    %16 = arith.cmpi eq, %c16_i32, %c0_i32 : i32
    %c1_i32 = arith.constant 1 : i32
    %17 = arith.select %16, %c1_i32, %c16_i32 : i32
    %18 = vector.broadcast %17 : i32 to vector<256x1xi32>
    %19 = arith.remsi %15, %18 : vector<256x1xi32>
    %c0_i32_12 = arith.constant 0 : i32
    %20 = vector.broadcast %c0_i32_12 : i32 to vector<256x1xi32>
    %21 = arith.cmpi ne, %19, %20 : vector<256x1xi32>
    %c0_i32_13 = arith.constant 0 : i32
    %22 = vector.broadcast %c0_i32_13 : i32 to vector<256x1xi32>
    %23 = arith.cmpi slt, %19, %22 : vector<256x1xi32>
    %c0_i32_14 = arith.constant 0 : i32
    %24 = arith.cmpi slt, %17, %c0_i32_14 : i32
    %25 = vector.broadcast %24 : i1 to vector<256x1xi1>
    %26 = vector.broadcast %25 : vector<256x1xi1> to vector<256x1xi1>
    %27 = arith.xori %23, %26 : vector<256x1xi1>
    %28 = arith.andi %27, %21 : vector<256x1xi1>
    %29 = vector.broadcast %17 : i32 to vector<256x1xi32>
    %30 = arith.addi %19, %29 : vector<256x1xi32>
    %31 = arith.select %28, %30, %19 : vector<256x1xi1>, vector<256x1xi32>
    %c7 = arith.constant 7 : index
    %c0_15 = arith.constant 0 : index
    %32 = vector.load %arg9[%c7, %c0_15] : memref<304x128xbf16, #tpu.memory_space<vmem>>, vector<256x128xbf16>
    %c1_i32_16 = arith.constant 1 : i32
    %33 = vector.broadcast %c1_i32_16 : i32 to vector<256x1xi32>
    %34 = arith.cmpi sge, %31, %33 : vector<256x1xi32>
    %c0_i32_17 = arith.constant 0 : i32
    %35 = arith.sitofp %c0_i32_17 : i32 to bf16
    %36 = vector.shape_cast %34 : vector<256x1xi1> to vector<256x1xi1>
    %37 = vector.broadcast %36 : vector<256x1xi1> to vector<256x128xi1>
    %38 = vector.broadcast %35 : bf16 to vector<256x128xbf16>
    %39 = arith.select %37, %32, %38 : vector<256x128xi1>, vector<256x128xbf16>
    %c0_18 = arith.constant 0 : index
    %c0_19 = arith.constant 0 : index
    %40 = vector.load %arg10[%c0_18, %c0_19] : memref<256x1152xbf16, #tpu.memory_space<vmem>>, vector<256x128xbf16>
    tpu.vector_store %arg10[%c0_18, %c0_19], %39 {strides = array<i32>} : memref<256x1152xbf16, #tpu.memory_space<vmem>>, vector<256x128xbf16>,
    %c8 = arith.constant 8 : index
    %c0_20 = arith.constant 0 : index
    %41 = vector.load %arg9[%c8, %c0_20] : memref<304x128xbf16, #tpu.memory_space<vmem>>, vector<256x128xbf16>
    %c0_21 = arith.constant 0 : index
    %c128 = arith.constant 128 : index
    %42 = vector.load %arg10[%c0_21, %c128] : memref<256x1152xbf16, #tpu.memory_space<vmem>>, vector<256x128xbf16>
    tpu.vector_store %arg10[%c0_21, %c128], %41 {strides = array<i32>} : memref<256x1152xbf16, #tpu.memory_space<vmem>>, vector<256x128xbf16>,
    %c9 = arith.constant 9 : index
    %c0_22 = arith.constant 0 : index
    %43 = vector.load %arg9[%c9, %c0_22] : memref<304x128xbf16, #tpu.memory_space<vmem>>, vector<256x128xbf16>
    %c14_i32 = arith.constant 14 : i32
    %44 = vector.broadcast %c14_i32 : i32 to vector<256x1xi32>
    %45 = arith.cmpi sle, %31, %44 : vector<256x1xi32>
    %c0_i32_23 = arith.constant 0 : i32
    %46 = arith.sitofp %c0_i32_23 : i32 to bf16
    %47 = vector.shape_cast %45 : vector<256x1xi1> to vector<256x1xi1>
    %48 = vector.broadcast %47 : vector<256x1xi1> to vector<256x128xi1>
    %49 = vector.broadcast %46 : bf16 to vector<256x128xbf16>
    %50 = arith.select %48, %43, %49 : vector<256x128xi1>, vector<256x128xbf16>
    %c0_24 = arith.constant 0 : index
    %c256 = arith.constant 256 : index
    %51 = vector.load %arg10[%c0_24, %c256] : memref<256x1152xbf16, #tpu.memory_space<vmem>>, vector<256x128xbf16>
    tpu.vector_store %arg10[%c0_24, %c256], %50 {strides = array<i32>} : memref<256x1152xbf16, #tpu.memory_space<vmem>>, vector<256x128xbf16>,
    %c23 = arith.constant 23 : index
    %c0_25 = arith.constant 0 : index
    %52 = vector.load %arg9[%c23, %c0_25] : memref<304x128xbf16, #tpu.memory_space<vmem>>, vector<256x128xbf16>
    %c1_i32_26 = arith.constant 1 : i32
    %53 = vector.broadcast %c1_i32_26 : i32 to vector<256x1xi32>
    %54 = arith.cmpi sge, %31, %53 : vector<256x1xi32>
    %c0_i32_27 = arith.constant 0 : i32
    %55 = arith.sitofp %c0_i32_27 : i32 to bf16
    %56 = vector.shape_cast %54 : vector<256x1xi1> to vector<256x1xi1>
    %57 = vector.broadcast %56 : vector<256x1xi1> to vector<256x128xi1>
    %58 = vector.broadcast %55 : bf16 to vector<256x128xbf16>
    %59 = arith.select %57, %52, %58 : vector<256x128xi1>, vector<256x128xbf16>
    %c0_28 = arith.constant 0 : index
    %c384 = arith.constant 384 : index
    %60 = vector.load %arg10[%c0_28, %c384] : memref<256x1152xbf16, #tpu.memory_space<vmem>>, vector<256x128xbf16>
    tpu.vector_store %arg10[%c0_28, %c384], %59 {strides = array<i32>} : memref<256x1152xbf16, #tpu.memory_space<vmem>>, vector<256x128xbf16>,
    %c24_29 = arith.constant 24 : index
    %c0_30 = arith.constant 0 : index
    %61 = vector.load %arg9[%c24_29, %c0_30] : memref<304x128xbf16, #tpu.memory_space<vmem>>, vector<256x128xbf16>
    %c0_31 = arith.constant 0 : index
    %c512 = arith.constant 512 : index
    %62 = vector.load %arg10[%c0_31, %c512] : memref<256x1152xbf16, #tpu.memory_space<vmem>>, vector<256x128xbf16>
    tpu.vector_store %arg10[%c0_31, %c512], %61 {strides = array<i32>} : memref<256x1152xbf16, #tpu.memory_space<vmem>>, vector<256x128xbf16>,
    %c25 = arith.constant 25 : index
    %c0_32 = arith.constant 0 : index
    %63 = vector.load %arg9[%c25, %c0_32] : memref<304x128xbf16, #tpu.memory_space<vmem>>, vector<256x128xbf16>
    %c14_i32_33 = arith.constant 14 : i32
    %64 = vector.broadcast %c14_i32_33 : i32 to vector<256x1xi32>
    %65 = arith.cmpi sle, %31, %64 : vector<256x1xi32>
    %c0_i32_34 = arith.constant 0 : i32
    %66 = arith.sitofp %c0_i32_34 : i32 to bf16
    %67 = vector.shape_cast %65 : vector<256x1xi1> to vector<256x1xi1>
    %68 = vector.broadcast %67 : vector<256x1xi1> to vector<256x128xi1>
    %69 = vector.broadcast %66 : bf16 to vector<256x128xbf16>
    %70 = arith.select %68, %63, %69 : vector<256x128xi1>, vector<256x128xbf16>
    %c0_35 = arith.constant 0 : index
    %c640 = arith.constant 640 : index
    %71 = vector.load %arg10[%c0_35, %c640] : memref<256x1152xbf16, #tpu.memory_space<vmem>>, vector<256x128xbf16>
    tpu.vector_store %arg10[%c0_35, %c640], %70 {strides = array<i32>} : memref<256x1152xbf16, #tpu.memory_space<vmem>>, vector<256x128xbf16>,
    %c39 = arith.constant 39 : index
    %c0_36 = arith.constant 0 : index
    %72 = vector.load %arg9[%c39, %c0_36] : memref<304x128xbf16, #tpu.memory_space<vmem>>, vector<256x128xbf16>
    %c1_i32_37 = arith.constant 1 : i32
    %73 = vector.broadcast %c1_i32_37 : i32 to vector<256x1xi32>
    %74 = arith.cmpi sge, %31, %73 : vector<256x1xi32>
    %c0_i32_38 = arith.constant 0 : i32
    %75 = arith.sitofp %c0_i32_38 : i32 to bf16
    %76 = vector.shape_cast %74 : vector<256x1xi1> to vector<256x1xi1>
    %77 = vector.broadcast %76 : vector<256x1xi1> to vector<256x128xi1>
    %78 = vector.broadcast %75 : bf16 to vector<256x128xbf16>
    %79 = arith.select %77, %72, %78 : vector<256x128xi1>, vector<256x128xbf16>
    %c0_39 = arith.constant 0 : index
    %c768 = arith.constant 768 : index
    %80 = vector.load %arg10[%c0_39, %c768] : memref<256x1152xbf16, #tpu.memory_space<vmem>>, vector<256x128xbf16>
    tpu.vector_store %arg10[%c0_39, %c768], %79 {strides = array<i32>} : memref<256x1152xbf16, #tpu.memory_space<vmem>>, vector<256x128xbf16>,
    %c40 = arith.constant 40 : index
    %c0_40 = arith.constant 0 : index
    %81 = vector.load %arg9[%c40, %c0_40] : memref<304x128xbf16, #tpu.memory_space<vmem>>, vector<256x128xbf16>
    %c0_41 = arith.constant 0 : index
    %c896 = arith.constant 896 : index
    %82 = vector.load %arg10[%c0_41, %c896] : memref<256x1152xbf16, #tpu.memory_space<vmem>>, vector<256x128xbf16>
    tpu.vector_store %arg10[%c0_41, %c896], %81 {strides = array<i32>} : memref<256x1152xbf16, #tpu.memory_space<vmem>>, vector<256x128xbf16>,
    %c41 = arith.constant 41 : index
    %c0_42 = arith.constant 0 : index
    %83 = vector.load %arg9[%c41, %c0_42] : memref<304x128xbf16, #tpu.memory_space<vmem>>, vector<256x128xbf16>
    %c14_i32_43 = arith.constant 14 : i32
    %84 = vector.broadcast %c14_i32_43 : i32 to vector<256x1xi32>
    %85 = arith.cmpi sle, %31, %84 : vector<256x1xi32>
    %c0_i32_44 = arith.constant 0 : i32
    %86 = arith.sitofp %c0_i32_44 : i32 to bf16
    %87 = vector.shape_cast %85 : vector<256x1xi1> to vector<256x1xi1>
    %88 = vector.broadcast %87 : vector<256x1xi1> to vector<256x128xi1>
    %89 = vector.broadcast %86 : bf16 to vector<256x128xbf16>
    %90 = arith.select %88, %83, %89 : vector<256x128xi1>, vector<256x128xbf16>
    %c0_45 = arith.constant 0 : index
    %c1024 = arith.constant 1024 : index
    %91 = vector.load %arg10[%c0_45, %c1024] : memref<256x1152xbf16, #tpu.memory_space<vmem>>, vector<256x128xbf16>
    tpu.vector_store %arg10[%c0_45, %c1024], %90 {strides = array<i32>} : memref<256x1152xbf16, #tpu.memory_space<vmem>>, vector<256x128xbf16>,
    %c0_46 = arith.constant 0 : index
    %c0_47 = arith.constant 0 : index
    %92 = vector.load %arg10[%c0_46, %c0_47] : memref<256x1152xbf16, #tpu.memory_space<vmem>>, vector<256x1152xbf16>
    %c0_48 = arith.constant 0 : index
    %c0_49 = arith.constant 0 : index
    %93 = vector.load %arg4[%c0_48, %c0_49] : memref<1152x128xbf16, #tpu.memory_space<vmem>>, vector<1152x128xbf16>
    %cst_50 = arith.constant dense<0.000000e+00> : vector<256x128xf32>
    %94 = tpu.matmul %92, %93, %cst_50 {dimension_numbers = #tpu.dot_dimension_numbers<[1], [0], [0], [1], [0, 0, 1, 1], [], []>} : vector<256x1152xbf16>, vector<1152x128xbf16>, vector<256x128xf32> -> vector<256x128xf32>
    %c0_51 = arith.constant 0 : index
    %c0_52 = arith.constant 0 : index
    %95 = vector.load %arg5[%c0_51, %c0_52] : memref<1x128xf32, #tpu.memory_space<vmem>>, vector<1x128xf32>
    %96 = vector.broadcast %95 : vector<1x128xf32> to vector<256x128xf32>
    %97 = arith.addf %94, %96 : vector<256x128xf32>
    %cst_53 = arith.constant 0.000000e+00 : f32
    %98 = vector.broadcast %cst_53 : f32 to vector<256x128xf32>
    %99 = arith.maximumf %97, %98 : vector<256x128xf32>
    %100 = arith.truncf %99 : vector<256x128xf32> to vector<256x128xbf16>
    %c0_54 = arith.constant 0 : index
    %c0_55 = arith.constant 0 : index
    %101 = vector.load %arg6[%c0_54, %c0_55] : memref<128x128xbf16, #tpu.memory_space<vmem>>, vector<128x128xbf16>
    %cst_56 = arith.constant dense<0.000000e+00> : vector<256x128xf32>
    %102 = tpu.matmul %100, %101, %cst_56 {dimension_numbers = #tpu.dot_dimension_numbers<[1], [0], [0], [1], [0, 0, 1, 1], [], []>} : vector<256x128xbf16>, vector<128x128xbf16>, vector<256x128xf32> -> vector<256x128xf32>
    %c0_57 = arith.constant 0 : index
    %c0_58 = arith.constant 0 : index
    %103 = vector.load %arg7[%c0_57, %c0_58] : memref<1x128xf32, #tpu.memory_space<vmem>>, vector<1x128xf32>
    %104 = vector.broadcast %103 : vector<1x128xf32> to vector<256x128xf32>
    %105 = arith.addf %102, %104 : vector<256x128xf32>
    %106 = arith.addf %105, %1 : vector<256x128xf32>
    %cst_59 = arith.constant 0.000000e+00 : f32
    %107 = vector.broadcast %cst_59 : f32 to vector<256x128xf32>
    %108 = arith.maximumf %106, %107 : vector<256x128xf32>
    %c0_60 = arith.constant 0 : index
    %c0_61 = arith.constant 0 : index
    %c0_62 = arith.constant 0 : index
    %109 = vector.load %arg8[%c0_60, %c0_61, %c0_62] : memref<1x256x128xf32, #tpu.memory_space<vmem>>, vector<1x256x128xf32>
    %110 = vector.shape_cast %109 : vector<1x256x128xf32> to vector<256x128xf32>
    %111 = vector.shape_cast %108 : vector<256x128xf32> to vector<1x256x128xf32>
    tpu.vector_store %arg8[%c0_60, %c0_61, %c0_62], %111 {strides = array<i32>} : memref<1x256x128xf32, #tpu.memory_space<vmem>>, vector<1x256x128xf32>,
    return
  }
  func.func @transform_0(%arg0: i32) -> (i32, i32, i32) {
    %c0_i32 = arith.constant 0 : i32
    %c0_i32_0 = arith.constant 0 : i32
    %c0_i32_1 = arith.constant 0 : i32
    return %arg0, %c0_i32, %c0_i32_0 : i32, i32, i32
  }
  func.func @transform_1(%arg0: i32) -> (i32, i32) {
    %c0_i32 = arith.constant 0 : i32
    %c0_i32_0 = arith.constant 0 : i32
    %c0_i32_1 = arith.constant 0 : i32
    return %c0_i32, %c0_i32_0 : i32, i32
  }
  func.func @transform_2(%arg0: i32) -> (i32, i32) {
    %c0_i32 = arith.constant 0 : i32
    %c0_i32_0 = arith.constant 0 : i32
    %c0_i32_1 = arith.constant 0 : i32
    return %c0_i32, %c0_i32_0 : i32, i32
  }
  func.func @transform_3(%arg0: i32) -> (i32, i32) {
    %c0_i32 = arith.constant 0 : i32
    %c0_i32_0 = arith.constant 0 : i32
    %c0_i32_1 = arith.constant 0 : i32
    return %c0_i32, %c0_i32_0 : i32, i32
  }
  func.func @transform_4(%arg0: i32) -> (i32, i32) {
    %c0_i32 = arith.constant 0 : i32
    %c0_i32_0 = arith.constant 0 : i32
    %c0_i32_1 = arith.constant 0 : i32
    return %c0_i32, %c0_i32_0 : i32, i32
  }
  func.func @transform_5(%arg0: i32) -> (i32, i32) {
    %c0_i32 = arith.constant 0 : i32
    %c0_i32_0 = arith.constant 0 : i32
    %c0_i32_1 = arith.constant 0 : i32
    return %c0_i32, %c0_i32_0 : i32, i32
  }
  func.func @transform_6(%arg0: i32) -> (i32, i32) {
    %c0_i32 = arith.constant 0 : i32
    %c0_i32_0 = arith.constant 0 : i32
    %c0_i32_1 = arith.constant 0 : i32
    return %c0_i32, %c0_i32_0 : i32, i32
  }
  func.func @transform_7(%arg0: i32) -> (i32, i32, i32) {
    %c0_i32 = arith.constant 0 : i32
    %c0_i32_0 = arith.constant 0 : i32
    %c0_i32_1 = arith.constant 0 : i32
    return %arg0, %c0_i32, %c0_i32_0 : i32, i32, i32
  }
}

</mosaic_0001>

<bundles_post_ra>
// kernel: identity_block.1
= control target key start
LH: loop header
LB: loop body
LE: loop exit
PB: predicated region body
PF: predicated region fallthrough
CT: control target
= control target key end

     0   :  { %s6415_s24 = smov 0   ;;  %s8422_s0 = inlined_call_operand.vmem [shape: f32[2,256,128], index: 0, kind: input, shape index: {}]   ;;  %s8423_s1 = inlined_call_operand.vmem [shape: bf16[128,128], index: 1, kind: input, shape index: {}]   ;;  %s8424_s2 = inlined_call_operand.vmem [shape: f32[1,128], index: 2, kind: input, shape index: {}]   ;;  %s8425_s3 = inlined_call_operand.vmem [shape: bf16[1152,128], index: 3, kind: input, shape index: {}]   ;;  %s8426_s4 = inlined_call_operand.vmem [shape: f32[1,128], index: 4, kind: input, shape index: {}]   ;;  %s8427_s5 = inlined_call_operand.vmem [shape: bf16[128,128], index: 5, kind: input, shape index: {}]   ;;  %s8428_s6 = inlined_call_operand.vmem [shape: f32[1,128], index: 6, kind: input, shape index: {}]   ;;  %s8429_s7 = inlined_call_operand.vmem [shape: f32[2,256,128], index: 7, kind: output, shape index: {}]  }
   0x1 LB: > { %s5419_s25 = sadd.s32 4294967295, %s6371_s24   ;;  %p5423_p0 = scmp.ge.s32.totalorder %s6371_s24, 1  ;;  %s6371_s24 = sphi %s6415_s24, %s17_s24  }
   0x2   : > { %p237_p1 = scmp.lt.s32.totalorder %s6371_s24, 3 }
   0x4   : > { %p238_p2 = pnand %p5423_p0, %p237_p1 }
   0x6   : > { %241 = sbr.rel (%p238_p2) target bundleno = 1044 (0x414), region = 48 }
   0xd   : > { %v6245_v0 = vld [vmem:[%s8423_s1] sm:$0xff]   ;;  %p269_p3 = scmp.lt.s32.totalorder %s5419_s25, 1  ;;  %v6246_v1 = vld [vmem:[%s8423_s1 + $0x8] sm:$0xff]   ;;  %v6247_v2 = vld [vmem:[%s8423_s1 + $0x10] sm:$0xff]   ;;  %vm6374_vm3 = vmmov 1  }
   0xe   : > { %6075 = vmatprep.subr.bf16.mxu0 %v6245_v0  ;;  %6219 = vmatprep.subr.bf16.mxu1 %v6245_v0  ;;  %v6248_v3 = vld [vmem:[%s8423_s1 + $0x18] sm:$0xff]   ;;  %v6249_v7 = vld [vmem:[%s8423_s1 + $0x20] sm:$0xff]   ;;  %v6250_v11 = vld [vmem:[%s8423_s1 + $0x28] sm:$0xff]  }
   0xf   : > { %s8614_s25 = smov (!%p269_p3, %s5419_s25), 1  ;;  %6076 = vmatpush3.bf16.msra.mxu0 %v6245_v0  ;;  %6227 = vmatpush3.bf16.msra.mxu1 %v6245_v0  ;;  %v6251_v12 = vld [vmem:[%s8423_s1 + $0x30] sm:$0xff]   ;;  %v6252_v13 = vld [vmem:[%s8423_s1 + $0x38] sm:$0xff]   ;;  %v6255_v20 = vld [vmem:[%s8425_s3 + $0xc0] sm:$0xff]  }
  0x10   : > { %6077 = vmatprep.subr.bf16.mxu0 %v6246_v1  ;;  %s5553_s9 = sshll.u32 %s8614_s25, 8  ;;  %6220 = vmatprep.subr.bf16.mxu1 %v6246_v1  ;;  %v6253_v23 = vld [vmem:[%s8425_s3 + $0x40] sm:$0xff]   ;;  %v6256_v28 = vld [vmem:[%s8425_s3 + $0x48] sm:$0xff]   ;;  %v6260_v0 = vld [vmem:[%s8425_s3 + $0x50] sm:$0xff]  }
  0x11   : > { %s6440_s12 = scalar_lea.vmem %s8422_s0, %s5553_s9  ;;  %v6254_v25 = vld [vmem:[%s8425_s3] sm:$0xff]   ;;  %v6258_v61 = vld [vmem:[%s8425_s3 + $0x8] sm:$0xff]   ;;  %vm1227_vm4 = vmpackc.low %vm6374_vm3, %vm6374_vm3  ;;  %s8325_s20 = scalar_lea.vmem %s8429_s7, %s5553_s9 }
  0x12   : > { %v282_v4 = vld [vmem:[%s6440_s12] sm:$0xff]  ;;  %v283_v5 = vld [vmem:[%s6440_s12 + $0x8] sm:$0xff]  ;;  %v284_v14 = vld [vmem:[%s6440_s12 + $0x10] sm:$0xff] }
  0x13   : > { %6078 = vmatpush3.bf16.msra.mxu0 %v6246_v1  ;;  %6228 = vmatpush3.bf16.msra.mxu1 %v6246_v1  ;;  %v314_v6 = vpack.c.bf16 %v283_v5, %v282_v4  ;;  %v298_v8 = vld [vmem:[%s6440_s12 + $0x80] sm:$0xff]  ;;  %v299_v9 = vld [vmem:[%s6440_s12 + $0x88] sm:$0xff]  ;;  %v285_v15 = vld [vmem:[%s6440_s12 + $0x18] sm:$0xff]  ;;  %v8430_v1 = vmov 0  }
  0x14   : > { %6079 = vmatprep.subr.bf16.mxu0 %v6247_v2  ;;  %6221 = vmatprep.subr.bf16.mxu1 %v6247_v2  ;;  %v322_v10 = vpack.c.bf16 %v299_v9, %v298_v8  ;;  %v286_v16 = vld [vmem:[%s6440_s12 + $0x20] sm:$0xff]  ;;  %v287_v17 = vld [vmem:[%s6440_s12 + $0x28] sm:$0xff]  ;;  %v300_v18 = vld [vmem:[%s6440_s12 + $0x90] sm:$0xff]  ;;  %v315_v24 = vpack.c.bf16 %v285_v15, %v284_v14  ;;  %594 = vst [vmem:[#allocation2] sm:$0xff] %v8430_v1 }
  0x15   : > { %6091 = vmatprep.mubr.bf16.mxu0 %v314_v6  ;;  %v301_v19 = vld [vmem:[%s6440_s12 + $0x98] sm:$0xff]  ;;  %v302_v21 = vld [vmem:[%s6440_s12 + $0xa0] sm:$0xff]  ;;  %v303_v22 = vld [vmem:[%s6440_s12 + $0xa8] sm:$0xff]  ;;  %v316_v26 = vpack.c.bf16 %v287_v17, %v286_v16  ;;  %595 = vst [vmem:[#allocation2 + $0x8] sm:$0xf] %v8430_v1  ;;  %v696_v17 = vlaneseq }
  0x16   : > { %6107 = vmatprep.mubr.bf16.mxu1 %v322_v10  ;;  %v323_v27 = vpack.c.bf16 %v301_v19, %v300_v18  ;;  %v6257_v29 = vld [vmem:[%s8425_s3 + $0x80] sm:$0xff]   ;;  %v324_v30 = vpack.c.bf16 %v303_v22, %v302_v21  ;;  %v288_v31 = vld [vmem:[%s6440_s12 + $0x30] sm:$0xff]  ;;  %v289_v32 = vld [vmem:[%s6440_s12 + $0x38] sm:$0xff]  ;;  %596 = vst [vmem:[#allocation2 + $0x88] sm:$0xf0] %v8430_v1 }
  0x17   : > { %6080 = vmatpush3.bf16.msra.mxu0 %v6247_v2  ;;  %6229 = vmatpush3.bf16.msra.mxu1 %v6247_v2  ;;  %v290_v33 = vld [vmem:[%s6440_s12 + $0x40] sm:$0xff]  ;;  %v291_v34 = vld [vmem:[%s6440_s12 + $0x48] sm:$0xff]  ;;  %v304_v35 = vld [vmem:[%s6440_s12 + $0xb0] sm:$0xff]  ;;  %v317_v39 = vpack.c.bf16 %v289_v32, %v288_v31  ;;  %597 = vst [vmem:[#allocation2 + $0x90] sm:$0xff] %v8430_v1  ;;  %v6577_v22 = vshrl.u32 %v696_v17, 7 }
  0x18   : > { %6081 = vmatprep.subr.bf16.mxu0 %v6248_v3  ;;  %6222 = vmatprep.subr.bf16.mxu1 %v6248_v3  ;;  %v305_v36 = vld [vmem:[%s6440_s12 + $0xb8] sm:$0xff]  ;;  %v306_v37 = vld [vmem:[%s6440_s12 + $0xc0] sm:$0xff]  ;;  %v307_v38 = vld [vmem:[%s6440_s12 + $0xc8] sm:$0xff]  ;;  %v318_v40 = vpack.c.bf16 %v291_v34, %v290_v33 }
  0x19   : > { %v325_v41 = vpack.c.bf16 %v305_v36, %v304_v35  ;;  %v326_v42 = vpack.c.bf16 %v307_v38, %v306_v37  ;;  %v292_v43 = vld [vmem:[%s6440_s12 + $0x50] sm:$0xff]  ;;  %v293_v44 = vld [vmem:[%s6440_s12 + $0x58] sm:$0xff]  ;;  %v294_v45 = vld [vmem:[%s6440_s12 + $0x60] sm:$0xff]  ;;  %v700_v32 = vadd.s32 24, %v6577_v22  ;;  %v701_v33 = vadd.s32 32, %v6577_v22 }
  0x1a   : > { %v295_v46 = vld [vmem:[%s6440_s12 + $0x68] sm:$0xff]  ;;  %v308_v47 = vld [vmem:[%s6440_s12 + $0xd0] sm:$0xff]  ;;  %v309_v48 = vld [vmem:[%s6440_s12 + $0xd8] sm:$0xff]  ;;  %v319_v51 = vpack.c.bf16 %v293_v44, %v292_v43  ;;  %v702_v37 = vadd.s32 40, %v6577_v22 }
  0x1b   : > { %6082 = vmatpush3.bf16.msra.mxu0 %v6248_v3  ;;  %6230 = vmatpush3.bf16.msra.mxu1 %v6248_v3  ;;  %v310_v49 = vld [vmem:[%s6440_s12 + $0xe0] sm:$0xff]  ;;  %v311_v50 = vld [vmem:[%s6440_s12 + $0xe8] sm:$0xff]  ;;  %v320_v52 = vpack.c.bf16 %v295_v46, %v294_v45  ;;  %v327_v53 = vpack.c.bf16 %v309_v48, %v308_v47  ;;  %v296_v55 = vld [vmem:[%s6440_s12 + $0x70] sm:$0xff]  ;;  %v754_v35 = vand.u32 15, %v700_v32  ;;  %v761_v36 = vand.u32 15, %v701_v33 }
  0x1c   : > { %6083 = vmatprep.subr.bf16.mxu0 %v6249_v7  ;;  %6223 = vmatprep.subr.bf16.mxu1 %v6249_v7  ;;  %v328_v54 = vpack.c.bf16 %v311_v50, %v310_v49  ;;  %v297_v56 = vld [vmem:[%s6440_s12 + $0x78] sm:$0xff]  ;;  %v312_v57 = vld [vmem:[%s6440_s12 + $0xf0] sm:$0xff]  ;;  %v6259_v62 = vld [vmem:[%s8425_s3 + $0xc8] sm:$0xff]   ;;  %v703_v47 = vadd.s32 48, %v6577_v22  ;;  %v708_v33 = vadd.s32 88, %v6577_v22  ;;  %v710_v50 = vadd.s32 104, %v6577_v22 }
  0x1d   : > { %v313_v58 = vld [vmem:[%s6440_s12 + $0xf8] sm:$0xff]  ;;  %v321_v59 = vpack.c.bf16 %v297_v56, %v296_v55  ;;  %v6261_v63 = vld [vmem:[%s8425_s3 + $0x88] sm:$0xff]   ;;  %v6262_v2 = vld [vmem:[%s8425_s3 + $0x10] sm:$0xff]   ;;  %vm1820_vm7 = vcmp.le.s32.totalorder %v754_v35, 14  ;;  %vm1134_vm8 = vcmp.ge.s32.totalorder %v761_v36, 1 }
  0x1e   : > { %v329_v60 = vpack.c.bf16 %v313_v58, %v312_v57  ;;  %v6263_v3 = vld [vmem:[%s8425_s3 + $0xd0] sm:$0xff]   ;;  %v6264_v5 = vld [vmem:[%s8425_s3 + $0x58] sm:$0xff]   ;;  %v6268_v9 = vld [vmem:[%s8425_s3 + $0x60] sm:$0xff]   ;;  %v775_v56 = vand.u32 15, %v703_v47  ;;  %v704_v57 = vadd.s32 56, %v6577_v22 }
  0x1f   : > { %6084 = vmatpush3.bf16.msra.mxu0 %v6249_v7  ;;  %6231 = vmatpush3.bf16.msra.mxu1 %v6249_v7  ;;  %v6265_v4 = vld [vmem:[%s8425_s3 + $0x90] sm:$0xff]   ;;  %v6266_v6 = vld [vmem:[%s8425_s3 + $0x18] sm:$0xff]   ;;  %v6270_v10 = vld [vmem:[%s8425_s3 + $0x20] sm:$0xff]  }
  0x20   : > { %6085 = vmatprep.subr.bf16.mxu0 %v6250_v11  ;;  %6224 = vmatprep.subr.bf16.mxu1 %v6250_v11  ;;  %v6267_v7 = vld [vmem:[%s8425_s3 + $0xd8] sm:$0xff]   ;;  %v6274_v14 = vld [vmem:[%s8425_s3 + $0x28] sm:$0xff]   ;;  %v6276_v18 = vld [vmem:[%s8425_s3 + $0x70] sm:$0xff]   ;;  %vm6625_vm14 = vcmp.ge.s32.totalorder %v775_v56, 1 }
  0x21   : > { %v6269_v8 = vld [vmem:[%s8425_s3 + $0x98] sm:$0xff]   ;;  %v6275_v15 = vld [vmem:[%s8425_s3 + $0xe8] sm:$0xff]   ;;  %v6278_v19 = vld [vmem:[%s8425_s3 + $0x30] sm:$0xff]  }
  0x22   : > { %v6277_v16 = vld [vmem:[%s8425_s3 + $0xa8] sm:$0xff]   ;;  %v6281_v21 = vld [vmem:[%s8425_s3 + $0xb0] sm:$0xff]   ;;  %vm1916_vm10 = vmpackc.low %vm1820_vm7, %vm1820_vm7 }
  0x23   : > { %6086 = vmatpush3.bf16.msra.mxu0 %v6250_v11  ;;  %6232 = vmatpush3.bf16.msra.mxu1 %v6250_v11  ;;  %v6271_v11 = vld [vmem:[%s8425_s3 + $0xe0] sm:$0xff]   ;;  %vm1230_vm11 = vmpackc.low %vm1134_vm8, %vm1134_vm8  ;;  %v1948_v45 = vsel %vm1916_vm10, 65537, %v8430_v1 }
  0x24   : > { %6087 = vmatprep.subr.bf16.mxu0 %v6251_v12  ;;  %6225 = vmatprep.subr.bf16.mxu1 %v6251_v12  ;;  %v1262_v46 = vsel %vm1230_vm11, 65537, %v8430_v1  ;;  %vm1232_vm15 = vmpackc.low %vm6625_vm14, %vm6625_vm14 }
  0x27   : > { %6088 = vmatpush3.bf16.msra.mxu0 %v6251_v12  ;;  %6233 = vmatpush3.bf16.msra.mxu1 %v6251_v12  ;;  %v6273_v12 = vld [vmem:[%s8425_s3 + $0xa0] sm:$0xff]  }
  0x28   : > { %6089 = vmatprep.subr.bf16.mxu0 %v6252_v13  ;;  %6226 = vmatprep.subr.bf16.mxu1 %v6252_v13 }
  0x2b   : > { %6090 = vmatpush3.bf16.msra.mxu0 %v6252_v13  ;;  %6234 = vmatpush3.bf16.msra.mxu1 %v6252_v13  ;;  %v6272_v13 = vld [vmem:[%s8425_s3 + $0x68] sm:$0xff]  }
  0x2c   : > { %5691 = vmatprep.subr.bf16.mxu0 %v6255_v20  ;;  %5579 = vmatprep.subr.bf16.mxu1 %v6253_v23  ;;  %v6279_v20 = vld [vmem:[%s8425_s3 + $0xf0] sm:$0xff]   ;;  %v6280_v23 = vld [vmem:[%s8425_s3 + $0x78] sm:$0xff]  }
  0x2e   : > { %6092 = vmatmul.mubr.bf16.vlgmr.msra.gmra.mrb[0].mxu0 %v315_v24  ;;  %6108 = vmatmul.mubr.bf16.vlgmr.msra.gmra.mrb[0].mxu1 %v323_v27  ;;  %v6282_v24 = vld [vmem:[%s8425_s3 + $0x38] sm:$0xff]   ;;  %v699_v27 = vadd.s32 16, %v6577_v22 }
  0x2f   : > { %6095 = vmatprep.mubr.bf16.mxu0 %v316_v26  ;;  %6111 = vmatprep.mubr.bf16.mxu1 %v324_v30  ;;  %v6284_v26 = vld [vmem:[%s8425_s3 + $0xb8] sm:$0xff]   ;;  %v6285_v30 = vld [vmem:[%s8425_s3 + $0x140] sm:$0xff]  }
  0x30   : > { %5580 = vmatpush3.bf16.msra.mxu1 %v6254_v25  ;;  %5692 = vmatpush3.bf16.msra.mxu0 %v6257_v29  ;;  %v6283_v25 = vld [vmem:[%s8425_s3 + $0xf8] sm:$0xff]   ;;  %v698_v29 = vadd.s32 8, %v6577_v22  ;;  %v747_v31 = vand.u32 15, %v699_v27  ;;  %v6647_v27 = vld [vmem:[#allocation2] sm:$0xf0] }
  0x31   : > { %5581 = vmatprep.subr.bf16.mxu1 %v6256_v28  ;;  %5693 = vmatprep.subr.bf16.mxu0 %v6259_v62  ;;  %v733_v28 = vand.u32 15, %v6577_v22 }
  0x32   : > { %v740_v34 = vand.u32 15, %v698_v29  ;;  %vm1132_vm1 = vcmp.ge.s32.totalorder %v747_v31, 1 }
  0x33   : > { %vm1130_vm0 = vcmp.ge.s32.totalorder %v733_v28, 1  ;;  %vm1228_vm5 = vmpackc.low %vm1132_vm1, %vm1132_vm1 }
  0x34   : > { %5582 = vmatpush3.bf16.msra.mxu1 %v6258_v61  ;;  %5694 = vmatpush3.bf16.msra.mxu0 %v6261_v63  ;;  %vm1226_vm2 = vmpackc.low %vm1130_vm0, %vm1130_vm0  ;;  %vm1818_vm6 = vcmp.le.s32.totalorder %v740_v34, 14  ;;  %v705_v61 = vadd.s32 64, %v6577_v22 }
  0x35   : > { %5583 = vmatprep.subr.bf16.mxu1 %v6260_v0  ;;  %5695 = vmatprep.subr.bf16.mxu0 %v6263_v3  ;;  %v1258_v38 = vsel %vm1226_vm2, 65537, %v8430_v1  ;;  %vm1914_vm9 = vmpackc.low %vm1818_vm6, %vm1818_vm6  ;;  %vm1338_vm2 = vsmask.f32 3328 }
  0x36   : > { %6096 = vmatmul.mubr.bf16.gmra.mrb[4].mxu0 %v317_v39  ;;  %6112 = vmatmul.mubr.bf16.gmra.mrb[4].mxu1 %v325_v41  ;;  %v6602_v39 = vsel %vm1227_vm4, 65537, %v8430_v1  ;;  %v1946_v44 = vsel %vm1914_vm9, 65537, %v8430_v1  ;;  %vm1516_vm4 = vsmask.f32 4352 }
  0x37   : > { %6099 = vmatprep.mubr.bf16.mxu0 %v318_v40  ;;  %6115 = vmatprep.mubr.bf16.mxu1 %v326_v42  ;;  %v1260_v40 = vsel %vm1228_vm5, 65537, %v8430_v1  ;;  %v5437_v41 = vcombine.low %v1258_v38, %v6602_v39  ;;  %v768_v42 = vand.u32 15, %v702_v37  ;;  %v5453_v49 = vcombine.low %v6602_v39, %v1946_v44 }
  0x38   : > { %5584 = vmatpush3.bf16.msra.mxu1 %v6262_v2  ;;  %5696 = vmatpush3.bf16.msra.mxu0 %v6265_v4  ;;  %v5438_v43 = vcombine.low %v1260_v40, %v6602_v39  ;;  %v5439_v55 = vcombine.low %v1262_v46, %v6602_v39  ;;  %v1800_v40 = vld [vmem:[#allocation2] sm:$0xf0] }
  0x39   : > { %5585 = vmatprep.subr.bf16.mxu1 %v6264_v5  ;;  %5697 = vmatprep.subr.bf16.mxu0 %v6267_v7  ;;  %v1340_v48 = vshrl.u32 %v5437_v41, 16  ;;  %vm6612_vm12 = vcmp.le.s32.totalorder %v768_v42, 14  ;;  %v709_v42 = vadd.s32 96, %v6577_v22 }
  0x3a   : > { %vm1918_vm13 = vmpackc.low %vm6612_vm12, %vm6612_vm12  ;;  %v1357_v4 = vshrl.u32 %v5439_v55, 16  ;;  %v1360_v7 = vshll.u32 %v5439_v55, 16 }
  0x3b   : > { %v1342_v58 = vrot.slane %v1340_v48, 4  ;;  %v1950_v5 = vsel %vm1918_vm13, 65537, %v8430_v1 }
  0x3c   : > { %5586 = vmatpush3.bf16.msra.mxu1 %v6266_v6  ;;  %5698 = vmatpush3.bf16.msra.mxu0 %v6269_v8  ;;  %v706_v6 = vadd.s32 72, %v6577_v22 }
  0x3d   : > { %5587 = vmatprep.subr.bf16.mxu1 %v6268_v9  ;;  %5699 = vmatprep.subr.bf16.mxu0 %v6271_v11  ;;  %v782_v9 = vand.u32 15, %v704_v57 }
  0x3e   : > { %6100 = vmatmul.mubr.bf16.gmra.mrb[8].mxu0 %v319_v51  ;;  %6116 = vmatmul.mubr.bf16.gmra.mrb[8].mxu1 %v327_v53  ;;  %v1343_v51 = vshll.u32 %v5437_v41, 16  ;;  %v1351_v53 = vshll.u32 %v5438_v43, 16 }
  0x3f   : > { %6103 = vmatprep.mubr.bf16.mxu0 %v320_v52  ;;  %6119 = vmatprep.mubr.bf16.mxu1 %v328_v54  ;;  %v1348_v52 = vshrl.u32 %v5438_v43, 16  ;;  %v5454_v54 = vcombine.low %v6602_v39, %v1948_v45  ;;  %vm6636_vm1 = vcmp.le.s32.totalorder %v782_v9, 14 }
  0x40   : > { %5588 = vmatpush3.bf16.msra.mxu1 %v6270_v10  ;;  %5700 = vmatpush3.bf16.msra.mxu0 %v6273_v12  ;;  %v1345_v62 = vrot.slane %v1343_v51, 5  ;;  %v1353_v0 = vrot.slane %v1351_v53, 5  ;;  %v789_v12 = vand.u32 15, %v705_v61  ;;  %vm1920_vm5 = vmpackc.low %vm6636_vm1, %vm6636_vm1 }
  0x41   : > { %5589 = vmatprep.subr.bf16.mxu1 %v6272_v13  ;;  %5701 = vmatprep.subr.bf16.mxu0 %v6275_v15  ;;  %v1350_v63 = vrot.slane %v1348_v52, 4  ;;  %v2034_v2 = vshrl.u32 %v5454_v54, 16  ;;  %v2037_v3 = vshll.u32 %v5454_v54, 16  ;;  %v5455_v15 = vcombine.low %v6602_v39, %v1950_v5 }
  0x42   : > { %v6629_v13 = vor.u32 %v1345_v62, %v1342_v58  ;;  %vm6643_vm3 = vcmp.ge.s32.totalorder %v789_v12, 1  ;;  %v1952_v47 = vsel %vm1920_vm5, 65537, %v8430_v1  ;;  %v817_v58 = vand.u32 15, %v709_v42 }
  0x43   : > { %v2039_v17 = vrot.slane %v2037_v3, 4  ;;  %v2043_v28 = vshrl.u32 %v5455_v15, 16  ;;  %v2046_v29 = vshll.u32 %v5455_v15, 16  ;;  %vm1234_vm7 = vmpackc.low %vm6643_vm3, %vm6643_vm3  ;;  %v5456_v61 = vcombine.low %v6602_v39, %v1952_v47 }
  0x44   : > { %5590 = vmatpush3.bf16.msra.mxu1 %v6274_v14  ;;  %5702 = vmatpush3.bf16.msra.mxu0 %v6277_v16  ;;  %8485 = vst [vmem:[#allocation4_spill] sm:$0xff] %v6629_v13  ;;  %v1354_v14 = vor.u32 %v1353_v0, %v1350_v63  ;;  %v2036_v16 = vrot.slane %v2034_v2, 3  ;;  %vm1482_vm0 = vcmp.ne.s16.totalorder %v6629_v13, 0  ;;  %v1266_v48 = vsel %vm1234_vm7, 65537, %v8430_v1 }
  0x45   : > { %5591 = vmatprep.subr.bf16.mxu1 %v6276_v18  ;;  %5703 = vmatprep.subr.bf16.mxu0 %v6279_v20  ;;  %v1359_v18 = vrot.slane %v1357_v4, 4  ;;  %v1113_v20 = vld [vmem:[#allocation2] sm:$0xf8]  ;;  %v2045_v45 = vrot.slane %v2043_v28, 3  ;;  %v2048_v46 = vrot.slane %v2046_v29, 4  ;;  %v5441_v62 = vcombine.low %v1266_v48, %v6602_v39 }
  0x46   : > { %6104 = vmatmul.mubr.bf16.gmra.mrb[12].mxu0 %v321_v59  ;;  %6120 = vmatmul.mubr.bf16.gmra.mrb[12].mxu1 %v329_v60  ;;  %v2026_v59 = vshrl.u32 %v5453_v49, 16  ;;  %v2029_v60 = vshll.u32 %v5453_v49, 16  ;;  %v1499_v31 = vsel %vm1482_vm0, %v1113_v20, 0  ;;  %v6662_v34 = vsel %vm1338_vm2, %v6629_v13, %v1354_v14 }
  0x47   : > { %8493 = vst [vmem:[#allocation6_spill] sm:$0xff] %v6662_v34  ;;  %v6664_v35 = vor.u32 %v2039_v17, %v2036_v16  ;;  %v1518_v43 = vshrl.u32 %v1499_v31, 16  ;;  %v1521_v44 = vshll.u32 %v1499_v31, 16  ;;  %v810_v49 = vand.u32 15, %v708_v33 }
  0x48   : > { %5592 = vmatpush3.bf16.msra.mxu1 %v6278_v19  ;;  %5704 = vmatpush3.bf16.msra.mxu0 %v6281_v21  ;;  %v2028_v10 = vrot.slane %v2026_v59, 3  ;;  %v2031_v11 = vrot.slane %v2029_v60, 4  ;;  %v796_v19 = vand.u32 15, %v706_v6  ;;  %v1362_v21 = vrot.slane %v1360_v7, 5 }
  0x49   : > { %5593 = vmatprep.subr.bf16.mxu1 %v6280_v23  ;;  %5705 = vmatprep.subr.bf16.mxu0 %v6283_v25  ;;  %v6702_v59 = vrot.slane %v1518_v43, 3  ;;  %v6704_v60 = vrot.slane %v1521_v44, 4  ;;  %v6708_v63 = vor.u32 %v2048_v46, %v2045_v45  ;;  %vm6713_vm12 = vcmp.le.s32.totalorder %v810_v49, 14 }
  0x4a   : > { %v6641_v25 = vor.u32 %v2031_v11, %v2028_v10  ;;  %vm6655_vm6 = vcmp.le.s32.totalorder %v796_v19, 14  ;;  %v6666_v36 = vor.u32 %v1362_v21, %v1359_v18  ;;  %v824_v2 = vand.u32 15, %v710_v50  ;;  %vm1924_vm14 = vmpackc.low %vm6713_vm12, %vm6713_vm12 }
  0x4b   : > { %vm1922_vm9 = vmpackc.low %vm6655_vm6, %vm6655_vm6  ;;  %v711_v3 = vadd.s32 112, %v6577_v22  ;;  %v712_v7 = vadd.s32 120, %v6577_v22  ;;  %vm6720_vm13 = vcmp.ge.s32.totalorder %v817_v58, 1  ;;  %v713_v11 = vadd.s32 128, %v6577_v22 }
  0x4c   : > { %5594 = vmatpush3.bf16.msra.mxu1 %v6282_v24  ;;  %5706 = vmatpush3.bf16.msra.mxu0 %v6284_v26  ;;  %v707_v24 = vadd.s32 80, %v6577_v22  ;;  %8488 = vst [vmem:[#allocation5_spill] sm:$0xff] %v6641_v25  ;;  %vm2168_vm8 = vcmp.ne.s16.totalorder %v6641_v25, 0  ;;  %v6689_v51 = vsel %vm1516_vm4, %v6641_v25, %v6664_v35  ;;  %v6695_v53 = vsel %vm1338_vm2, %v1354_v14, %v6666_v36  ;;  %vm1238_vm1 = vmpackc.low %vm6720_vm13, %vm6720_vm13 }
  0x4d   : > { %5803 = vmatprep.subr.bf16.mxu1 %v6285_v30  ;;  %v1264_v30 = vsel %vm1232_vm15, 65537, %v8430_v1  ;;  %8494 = vst [vmem:[#allocation7_spill] sm:$0xff] %v6689_v51  ;;  %v2185_v52 = vsel %vm2168_vm8, %v1800_v40, 0  ;;  %8495 = vst [vmem:[#allocation8_spill] sm:$0xff] %v6695_v53  ;;  %v1954_v57 = vsel %vm1922_vm9, 65537, %v8430_v1  ;;  %v2052_v12 = vshrl.u32 %v5456_v61, 16 }
  0x4e   : > { %v803_v37 = vand.u32 15, %v707_v24  ;;  %v5440_v41 = vcombine.low %v1264_v30, %v6602_v39  ;;  %v2203_v4 = vshrl.u32 %v2185_v52, 16  ;;  %v2206_v5 = vshll.u32 %v2185_v52, 16 }
  0x4f   : > { %v5457_v6 = vcombine.low %v6602_v39, %v1954_v57  ;;  %v2055_v14 = vshll.u32 %v5456_v61, 16  ;;  %v1375_v15 = vshrl.u32 %v5441_v62, 16  ;;  %v1378_v17 = vshll.u32 %v5441_v62, 16 }
  0x50   : > { %vm6697_vm10 = vcmp.ge.s32.totalorder %v803_v37, 1  ;;  %v1366_v55 = vshrl.u32 %v5440_v41, 16  ;;  %v1369_v56 = vshll.u32 %v5440_v41, 16  ;;  %vm6729_vm15 = vcmp.le.s32.totalorder %v824_v2, 14 }
  0x51   : > { %vm1236_vm11 = vmpackc.low %vm6697_vm10, %vm6697_vm10  ;;  %v831_v19 = vand.u32 15, %v711_v3  ;;  %v714_v20 = vadd.s32 136, %v6577_v22  ;;  %v6734_v21 = vrot.slane %v2203_v4, 4  ;;  %v2061_v23 = vshrl.u32 %v5457_v6, 16 }
  0x52   : > { %v1368_v8 = vrot.slane %v1366_v55, 4  ;;  %v1371_v9 = vrot.slane %v1369_v56, 5  ;;  %v1268_v16 = vsel %vm1236_vm11, 65537, %v8430_v1  ;;  %v2064_v24 = vshll.u32 %v5457_v6, 16  ;;  %vm1926_vm3 = vmpackc.low %vm6729_vm15, %vm6729_vm15 }
  0x53   : > { %v838_v26 = vand.u32 15, %v712_v7  ;;  %v6739_v28 = vrot.slane %v2206_v5, 5  ;;  %v5442_v29 = vcombine.low %v1268_v16, %v6602_v39  ;;  %v1956_v30 = vsel %vm1924_vm14, 65537, %v8430_v1 }
  0x54   : > { %v845_v31 = vand.u32 15, %v713_v11  ;;  %v1372_v32 = vor.u32 %v1371_v9, %v1368_v8  ;;  %v2054_v33 = vrot.slane %v2052_v12, 3  ;;  %v2057_v37 = vrot.slane %v2055_v14, 4 }
  0x55   : > { %v1377_v40 = vrot.slane %v1375_v15, 4  ;;  %v1380_v41 = vrot.slane %v1378_v17, 5  ;;  %v1270_v42 = vsel %vm1238_vm1, 65537, %v8430_v1  ;;  %vm6747_vm5 = vcmp.ge.s32.totalorder %v831_v19, 1 }
  0x56   : > { %v852_v44 = vand.u32 15, %v714_v20  ;;  %v2063_v45 = vrot.slane %v2061_v23, 3  ;;  %v2066_v46 = vrot.slane %v2064_v24, 4  ;;  %v5458_v47 = vcombine.low %v6602_v39, %v1956_v30  ;;  %vm1240_vm9 = vmpackc.low %vm6747_vm5, %vm6747_vm5 }
  0x57   : > { %vm6752_vm6 = vcmp.le.s32.totalorder %v838_v26, 14  ;;  %v1384_v49 = vshrl.u32 %v5442_v29, 16  ;;  %v1958_v50 = vsel %vm1926_vm3, 65537, %v8430_v1  ;;  %vm6757_vm7 = vcmp.ge.s32.totalorder %v845_v31, 1 }
  0x58   : > { %v715_v54 = vadd.s32 144, %v6577_v22  ;;  %v6767_v56 = vsel %vm1516_vm4, %v6664_v35, %v6708_v63  ;;  %v1387_v57 = vshll.u32 %v5442_v29, 16  ;;  %v5443_v58 = vcombine.low %v1270_v42, %v6602_v39  ;;  %vm1928_vm10 = vmpackc.low %vm6752_vm6, %vm6752_vm6 }
  0x59   : > { %8510 = vst [vmem:[#allocation9_spill] sm:$0xff] %v6767_v56  ;;  %v6777_v62 = vsel %vm1338_vm2, %v6666_v36, %v1372_v32  ;;  %vm6782_vm11 = vcmp.le.s32.totalorder %v852_v44, 14  ;;  %v716_v0 = vadd.s32 152, %v6577_v22  ;;  %v2058_v2 = vor.u32 %v2057_v37, %v2054_v33  ;;  %vm1242_vm12 = vmpackc.low %vm6757_vm7, %vm6757_vm7 }
  0x5a   : > { %v2070_v3 = vshrl.u32 %v5458_v47, 16  ;;  %v2073_v4 = vshll.u32 %v5458_v47, 16  ;;  %v5459_v5 = vcombine.low %v6602_v39, %v1958_v50  ;;  %v1381_v36 = vor.u32 %v1380_v41, %v1377_v40  ;;  %vm1930_vm13 = vmpackc.low %vm6782_vm11, %vm6782_vm11 }
  0x5b   : > { %v6791_v6 = vor.u32 %v2066_v46, %v2063_v45  ;;  %v1386_v7 = vrot.slane %v1384_v49, 4  ;;  %v859_v8 = vand.u32 15, %v715_v54  ;;  %v1389_v9 = vrot.slane %v1387_v57, 5 }
  0x5c   : > { %v1393_v10 = vshrl.u32 %v5443_v58, 16  ;;  %v1396_v11 = vshll.u32 %v5443_v58, 16  ;;  %v1272_v12 = vsel %vm1240_vm9, 65537, %v8430_v1  ;;  %v1960_v14 = vsel %vm1928_vm10, 65537, %v8430_v1 }
  0x5d   : > { %v1274_v15 = vsel %vm1242_vm12, 65537, %v8430_v1  ;;  %v866_v16 = vand.u32 15, %v716_v0  ;;  %v717_v17 = vadd.s32 160, %v6577_v22  ;;  %v2072_v18 = vrot.slane %v2070_v3, 3 }
  0x5e   : > { %v2075_v19 = vrot.slane %v2073_v4, 4  ;;  %v2079_v20 = vshrl.u32 %v5459_v5, 16  ;;  %v718_v23 = vadd.s32 168, %v6577_v22  ;;  %v2082_v24 = vshll.u32 %v5459_v5, 16 }
  0x5f   : > { %v5444_v26 = vcombine.low %v1272_v12, %v6602_v39  ;;  %v1962_v29 = vsel %vm1930_vm13, 65537, %v8430_v1  ;;  %vm6813_vm14 = vcmp.ge.s32.totalorder %v859_v8, 1  ;;  %v6819_v31 = vsel %vm1516_vm4, %v6708_v63, %v2058_v2 }
  0x60   : > { %v6822_v33 = vsel %vm1338_vm2, %v1372_v32, %v1381_v36  ;;  %v5460_v37 = vcombine.low %v6602_v39, %v1960_v14  ;;  %v5445_v40 = vcombine.low %v1274_v15, %v6602_v39  ;;  %v6828_v41 = vsel %vm1516_vm4, %v2058_v2, %v6791_v6  ;;  %vm1244_vm1 = vmpackc.low %vm6813_vm14, %vm6813_vm14  ;;  %v6293_v2 = vld [vmem:[%s8425_s3 + $0x1c0] sm:$0xff]  }
  0x61   : > { %v6830_v42 = vor.u32 %v1389_v9, %v1386_v7  ;;  %vm6832_vm15 = vcmp.le.s32.totalorder %v866_v16, 14  ;;  %v873_v44 = vand.u32 15, %v717_v17  ;;  %v1395_v63 = vrot.slane %v1393_v10, 4  ;;  %5915 = vmatprep.subr.bf16.mxu0 %v6293_v2 }
  0x62   : > { %v1398_v45 = vrot.slane %v1396_v11, 5  ;;  %v5461_v32 = vcombine.low %v6602_v39, %v1962_v29  ;;  %v880_v46 = vand.u32 15, %v718_v23  ;;  %v6840_v47 = vor.u32 %v2075_v19, %v2072_v18  ;;  %vm1932_vm3 = vmpackc.low %vm6832_vm15, %vm6832_vm15 }
  0x63   : > { %v2081_v48 = vrot.slane %v2079_v20, 3  ;;  %v2084_v49 = vrot.slane %v2082_v24, 4  ;;  %v1402_v50 = vshrl.u32 %v5444_v26, 16  ;;  %v1405_v52 = vshll.u32 %v5444_v26, 16 }
  0x64   : > { %v2088_v54 = vshrl.u32 %v5460_v37, 16  ;;  %v2091_v57 = vshll.u32 %v5460_v37, 16  ;;  %v1411_v58 = vshrl.u32 %v5445_v40, 16  ;;  %v1414_v35 = vshll.u32 %v5445_v40, 16 }
  0x65   : > { %v1276_v0 = vsel %vm1244_vm1, 65537, %v8430_v1  ;;  %vm6849_vm5 = vcmp.ge.s32.totalorder %v873_v44, 1  ;;  %v719_v4 = vadd.s32 176, %v6577_v22  ;;  %v2097_v5 = vshrl.u32 %v5461_v32, 16 }
  0x66   : > { %v2100_v7 = vshll.u32 %v5461_v32, 16  ;;  %vm6854_vm6 = vcmp.le.s32.totalorder %v880_v46, 14  ;;  %v720_v9 = vadd.s32 184, %v6577_v22  ;;  %v6861_v10 = vsel %vm1338_vm2, %v1381_v36, %v6830_v42  ;;  %vm1246_vm7 = vmpackc.low %vm6849_vm5, %vm6849_vm5 }
  0x67   : > { %v1404_v11 = vrot.slane %v1402_v50, 4  ;;  %v1964_v12 = vsel %vm1932_vm3, 65537, %v8430_v1  ;;  %v721_v14 = vadd.s32 192, %v6577_v22  ;;  %v1407_v15 = vrot.slane %v1405_v52, 5  ;;  %vm1934_vm9 = vmpackc.low %vm6854_vm6, %vm6854_vm6 }
  0x68   : > { %v2090_v16 = vrot.slane %v2088_v54, 3  ;;  %v5446_v17 = vcombine.low %v1276_v0, %v6602_v39  ;;  %v722_v18 = vadd.s32 200, %v6577_v22  ;;  %v2093_v19 = vrot.slane %v2091_v57, 4 }
  0x69   : > { %v1413_v20 = vrot.slane %v1411_v58, 4  ;;  %v1416_v36 = vrot.slane %v1414_v35, 5  ;;  %v887_v23 = vand.u32 15, %v719_v4  ;;  %v2099_v24 = vrot.slane %v2097_v5, 3 }
  0x6a   : > { %v2102_v26 = vrot.slane %v2100_v7, 4  ;;  %v5462_v29 = vcombine.low %v6602_v39, %v1964_v12  ;;  %v894_v30 = vand.u32 15, %v720_v9  ;;  %v1399_v37 = vor.u32 %v1398_v45, %v1395_v63 }
  0x6b   : > { %v2085_v40 = vor.u32 %v2084_v49, %v2081_v48  ;;  %v1278_v43 = vsel %vm1246_vm7, 65537, %v8430_v1  ;;  %v901_v44 = vand.u32 15, %v721_v14  ;;  %v1420_v32 = vshrl.u32 %v5446_v17, 16 }
  0x6c   : > { %v1423_v46 = vshll.u32 %v5446_v17, 16  ;;  %v1966_v50 = vsel %vm1934_vm9, 65537, %v8430_v1  ;;  %v908_v52 = vand.u32 15, %v722_v18  ;;  %v1408_v54 = vor.u32 %v1407_v15, %v1404_v11 }
  0x6d   : > { %v2094_v57 = vor.u32 %v2093_v19, %v2090_v16  ;;  %v6876_v58 = vor.u32 %v1416_v36, %v1413_v20  ;;  %vm6878_vm10 = vcmp.ge.s32.totalorder %v887_v23, 1  ;;  %v6882_v0 = vor.u32 %v2102_v26, %v2099_v24 }
  0x6e   : > { %v2106_v63 = vshrl.u32 %v5462_v29, 16  ;;  %v5447_v45 = vcombine.low %v1278_v43, %v6602_v39  ;;  %vm6885_vm11 = vcmp.le.s32.totalorder %v894_v30, 14  ;;  %v6892_v49 = vsel %vm1516_vm4, %v6791_v6, %v6840_v47  ;;  %vm1248_vm13 = vmpackc.low %vm6878_vm10, %vm6878_vm10 }
  0x6f   : > { %v2109_v2 = vshll.u32 %v5462_v29, 16  ;;  %v5463_v3 = vcombine.low %v6602_v39, %v1966_v50  ;;  %vm6895_vm12 = vcmp.ge.s32.totalorder %v901_v44, 1  ;;  %v6901_v5 = vsel %vm1338_vm2, %v6830_v42, %v1399_v37  ;;  %vm1936_vm15 = vmpackc.low %vm6885_vm11, %vm6885_vm11 }
  0x70   : > { %v1422_v7 = vrot.slane %v1420_v32, 4  ;;  %v1425_v8 = vrot.slane %v1423_v46, 5  ;;  %vm6906_vm14 = vcmp.le.s32.totalorder %v908_v52, 14  ;;  %v6912_v9 = vsel %vm1516_vm4, %v6840_v47, %v2085_v40  ;;  %vm1250_vm1 = vmpackc.low %vm6895_vm12, %vm6895_vm12 }
  0x71   : > { %v6915_v11 = vsel %vm1338_vm2, %v1399_v37, %v1408_v54  ;;  %v6918_v42 = vsel %vm1516_vm4, %v2085_v40, %v2094_v57  ;;  %v6922_v12 = vsel %vm1338_vm2, %v1408_v54, %v6876_v58  ;;  %v6929_v14 = vsel %vm1516_vm4, %v2094_v57, %v6882_v0  ;;  %vm1938_vm3 = vmpackc.low %vm6906_vm14, %vm6906_vm14 }
  0x72   : > { %v2108_v47 = vrot.slane %v2106_v63, 3  ;;  %v1429_v15 = vshrl.u32 %v5447_v45, 16  ;;  %v1432_v16 = vshll.u32 %v5447_v45, 16  ;;  %v2111_v17 = vrot.slane %v2109_v2, 4 }
  0x73   : > { %v2115_v18 = vshrl.u32 %v5463_v3, 16  ;;  %v2118_v19 = vshll.u32 %v5463_v3, 16  ;;  %v723_v20 = vadd.s32 208, %v6577_v22  ;;  %v6938_v36 = vor.u32 %v1425_v8, %v1422_v7 }
  0x74   : > { %v1280_v23 = vsel %vm1248_vm13, 65537, %v8430_v1  ;;  %v724_v24 = vadd.s32 216, %v6577_v22  ;;  %v725_v26 = vadd.s32 224, %v6577_v22  ;;  %v1968_v29 = vsel %vm1936_vm15, 65537, %v8430_v1 }
  0x75   : > { %v1282_v30 = vsel %vm1250_vm1, 65537, %v8430_v1  ;;  %v915_v37 = vand.u32 15, %v723_v20  ;;  %v726_v40 = vadd.s32 232, %v6577_v22  ;;  %v1431_v43 = vrot.slane %v1429_v15, 4 }
  0x76   : > { %v1970_v44 = vsel %vm1938_vm3, 65537, %v8430_v1  ;;  %v922_v32 = vand.u32 15, %v724_v24  ;;  %v929_v46 = vand.u32 15, %v725_v26  ;;  %v1434_v50 = vrot.slane %v1432_v16, 5 }
  0x77   : > { %v5448_v52 = vcombine.low %v1280_v23, %v6602_v39  ;;  %vm1156_vm5 = vcmp.ge.s32.totalorder %v915_v37, 1  ;;  %v936_v54 = vand.u32 15, %v726_v40  ;;  %v5464_v57 = vcombine.low %v6602_v39, %v1968_v29 }
  0x78   : > { %v5449_v35 = vcombine.low %v1282_v30, %v6602_v39  ;;  %vm1252_vm6 = vmpackc.low %vm1156_vm5, %vm1156_vm5  ;;  %vm1844_vm7 = vcmp.le.s32.totalorder %v922_v32, 14  ;;  %vm1158_vm9 = vcmp.ge.s32.totalorder %v929_v46, 1  ;;  %v6955_v63 = vor.u32 %v2111_v17, %v2108_v47 }
  0x79   : > { %v5465_v45 = vcombine.low %v6602_v39, %v1970_v44  ;;  %v1284_v48 = vsel %vm1252_vm6, 65537, %v8430_v1  ;;  %vm1940_vm10 = vmpackc.low %vm1844_vm7, %vm1844_vm7  ;;  %vm1846_vm11 = vcmp.le.s32.totalorder %v936_v54, 14  ;;  %v2117_v2 = vrot.slane %v2115_v18, 3 }
  0x7a   : > { %v2120_v3 = vrot.slane %v2118_v19, 4  ;;  %v5450_v4 = vcombine.low %v1284_v48, %v6602_v39  ;;  %v1972_v7 = vsel %vm1940_vm10, 65537, %v8430_v1  ;;  %vm1254_vm12 = vmpackc.low %vm1158_vm9, %vm1158_vm9  ;;  %v1438_v8 = vshrl.u32 %v5448_v52, 16 }
  0x7b   : > { %v1441_v6 = vshll.u32 %v5448_v52, 16  ;;  %v5466_v15 = vcombine.low %v6602_v39, %v1972_v7  ;;  %v1286_v47 = vsel %vm1254_vm12, 65537, %v8430_v1  ;;  %vm1942_vm13 = vmpackc.low %vm1846_vm11, %vm1846_vm11  ;;  %v2124_v16 = vshrl.u32 %v5464_v57, 16 }
  0x7c   : > { %v2127_v17 = vshll.u32 %v5464_v57, 16  ;;  %v1447_v20 = vshrl.u32 %v5449_v35, 16  ;;  %v1974_v23 = vsel %vm1942_vm13, 65537, %v8430_v1  ;;  %v6967_v18 = vsel %vm1338_vm2, %v6876_v58, %v6938_v36 }
  0x7d   : > { %8529 = vst [vmem:[#allocation10_spill] sm:$0xff] %v6967_v18  ;;  %v1450_v19 = vshll.u32 %v5449_v35, 16  ;;  %v2133_v24 = vshrl.u32 %v5465_v45, 16  ;;  %v5451_v26 = vcombine.low %v1286_v47, %v6602_v39  ;;  %v2136_v29 = vshll.u32 %v5465_v45, 16 }
  0x7e   : > { %v1456_v30 = vshrl.u32 %v5450_v4, 16  ;;  %v1459_v37 = vshll.u32 %v5450_v4, 16  ;;  %v2142_v40 = vshrl.u32 %v5466_v15, 16  ;;  %v1435_v44 = vor.u32 %v1434_v50, %v1431_v43 }
  0x7f   : > { %v1440_v32 = vrot.slane %v1438_v8, 4  ;;  %v2145_v46 = vshll.u32 %v5466_v15, 16  ;;  %v5467_v52 = vcombine.low %v6602_v39, %v1974_v23  ;;  %v1443_v54 = vrot.slane %v1441_v6, 5 }
  0x80   : > { %v2126_v57 = vrot.slane %v2124_v16, 3  ;;  %v2129_v48 = vrot.slane %v2127_v17, 4  ;;  %v1449_v7 = vrot.slane %v1447_v20, 4  ;;  %v1452_v61 = vrot.slane %v1450_v19, 5 }
  0x81   : > { %v2135_v58 = vrot.slane %v2133_v24, 3  ;;  %v1465_v55 = vshrl.u32 %v5451_v26, 16  ;;  %v1468_v35 = vshll.u32 %v5451_v26, 16  ;;  %v2138_v38 = vrot.slane %v2136_v29, 4 }
  0x82   : > { %v1458_v1 = vrot.slane %v1456_v30, 4  ;;  %v1461_v47 = vrot.slane %v1459_v37, 5  ;;  %v2144_v45 = vrot.slane %v2142_v40, 3  ;;  %v2147_v25 = vrot.slane %v2145_v46, 4 }
  0x83   : > { %v2151_v4 = vshrl.u32 %v5467_v52, 16  ;;  %v2154_v18 = vshll.u32 %v5467_v52, 16  ;;  %v727_v43 = vadd.s32 240, %v6577_v22  ;;  %v2121_v50 = vor.u32 %v2120_v3, %v2117_v2 }
  0x84   : > { %v1444_v8 = vor.u32 %v1443_v54, %v1440_v32  ;;  %v2130_v15 = vor.u32 %v2129_v48, %v2126_v57  ;;  %v728_v6 = vadd.s32 248, %v6577_v22  ;;  %v1453_v16 = vor.u32 %v1452_v61, %v1449_v7  ;;  %v6981_v22 = vld [vmem:[%s8424_s2] ss:$0 sm:$0xff] }
  0x85   : > { %v1467_v17 = vrot.slane %v1465_v55, 4  ;;  %v1470_v20 = vrot.slane %v1468_v35, 5  ;;  %v943_v23 = vand.u32 15, %v727_v43  ;;  %v6976_v19 = vsel %vm1516_vm4, %v6882_v0, %v6955_v63 }
  0x86   : > { %v2139_v24 = vor.u32 %v2138_v38, %v2135_v58  ;;  %v1462_v26 = vor.u32 %v1461_v47, %v1458_v1  ;;  %v950_v29 = vand.u32 15, %v728_v6  ;;  %v2148_v30 = vor.u32 %v2147_v25, %v2144_v45 }
  0x87   : > { %v2153_v37 = vrot.slane %v2151_v4, 3  ;;  %v2156_v40 = vrot.slane %v2154_v18, 4  ;;  %vm1160_vm14 = vcmp.ge.s32.totalorder %v943_v23, 1  ;;  %v6985_v55 = vsel %vm1338_vm2, %v6938_v36, %v1435_v44 }
  0x88   : > { %v6989_v61 = vsel %vm1516_vm4, %v6955_v63, %v2121_v50  ;;  %v6992_v1 = vsel %vm1338_vm2, %v1435_v44, %v1444_v8  ;;  %vm1256_vm15 = vmpackc.low %vm1160_vm14, %vm1160_vm14  ;;  %vm1848_vm1 = vcmp.le.s32.totalorder %v950_v29, 14  ;;  %v6995_v25 = vsel %vm1516_vm4, %v2121_v50, %v2130_v15 }
  0x89   : > { %8530 = vst [vmem:[#allocation11_spill] sm:$0xff] %v6989_v61  ;;  %8531 = vst [vmem:[#allocation12_spill] sm:$0xff] %v6992_v1  ;;  %v6998_v38 = vsel %vm1338_vm2, %v1444_v8, %v1453_v16  ;;  %v7000_v0 = vor.u32 %v1470_v20, %v1467_v17  ;;  %v8535_v2 = vmov 0   ;;  %v7004_v63 = vsel %vm1516_vm4, %v2130_v15, %v2139_v24 }
  0x8a   : > { %8532 = vst [vmem:[#allocation13_spill] sm:$0xff] %v6995_v25  ;;  %8533 = vst [vmem:[#allocation14_spill] sm:$0xff] %v6998_v38  ;;  %v1288_v36 = vsel %vm1256_vm15, 65537, %v8535_v2  ;;  %v7007_v18 = vsel %vm1338_vm2, %v1453_v16, %v1462_v26  ;;  %vm630_vm5 = vcmask 1043456   ;;  %v7013_v57 = vsel %vm1516_vm4, %v2139_v24, %v2148_v30 }
  0x8b   : > { %8534 = vst [vmem:[#allocation15_spill] sm:$0xff] %v7000_v0  ;;  %vm1944_vm3 = vmpackc.low %vm1848_vm1, %vm1848_vm1  ;;  %v5452_v44 = vcombine.low %v1288_v36, %v6602_v39  ;;  %v7015_v48 = vor.u32 %v2156_v40, %v2153_v37  ;;  %vm1483_vm6 = vcmp.ne.s16.totalorder %v6662_v34, 0  ;;  %vm1484_vm7 = vcmp.ne.s16.totalorder %v6695_v53, 0 }
  0x8c   : > { %8536 = vst [vmem:[#allocation16_spill] sm:$0xff] %v7004_v63  ;;  %8537 = vst [vmem:[#allocation17_spill] sm:$0xff] %v7007_v18  ;;  %v1976_v32 = vsel %vm1944_vm3, 65537, %v8535_v2  ;;  %vm8480_vm9 = vcmp.ne.s16.totalorder %v6767_v56, 0  ;;  %vm2169_vm10 = vcmp.ne.s16.totalorder %v6689_v51, 0  ;;  %vm8463_vm11 = vcmp.ne.s16.totalorder %v6777_v62, 0 }
  0x8d   : > { %8538 = vst [vmem:[#allocation18_spill] sm:$0xff] %v7013_v57  ;;  %8539 = vst [vmem:[#allocation19_spill] sm:$0xff] %v7015_v48  ;;  %v5468_v7 = vcombine.low %v6602_v39, %v1976_v32  ;;  %v1474_v4 = vshrl.u32 %v5452_v44, 16  ;;  %v1477_v43 = vshll.u32 %v5452_v44, 16  ;;  %v7026_v39 = vsel %vm1338_vm2, %v1462_v26, %v7000_v0 }
  0x8e   : > { %8540 = vst [vmem:[#allocation20_spill] sm:$0xff] %v7026_v39  ;;  %v8547_v18 = vrot.slane %v6647_v27, 4  ;;  %vm2171_vm12 = vcmp.ne.s16.totalorder %v6819_v31, 0  ;;  %vm8458_vm13 = vcmp.ne.s16.totalorder %v6822_v33, 0  ;;  %vm2172_vm14 = vcmp.ne.s16.totalorder %v6828_v41, 0 }
  0x8f   : > { %v2160_v29 = vshrl.u32 %v5468_v7, 16  ;;  %v1476_v36 = vrot.slane %v1474_v4, 4  ;;  %vm8459_vm15 = vcmp.ne.s16.totalorder %v6861_v10, 0  ;;  %vm8460_vm1 = vcmp.ne.s16.totalorder %v6892_v49, 0 }
  0x90   : > { %vm8461_vm3 = vcmp.ne.s16.totalorder %v6901_v5, 0 }
 0x101   : > { %v6093_v3 = vpop.f32.mrb[0].mxu0  ;;  %v6109_v54 = vpop.f32.mrb[0].mxu1 }
 0x102   : > { %v444_v46 = vadd.f32 %v6093_v3, %v6981_v22  ;;  %v435_v52 = vpop.f32.mrb[1].mxu0  ;;  %v508_v47 = vadd.f32 %v6109_v54, %v6981_v22  ;;  %v499_v45 = vpop.f32.mrb[1].mxu1  ;;  %v7036_v54 = vsel %vm1516_vm4, %v2148_v30, %v7015_v48 }
 0x103   : > { %v436_v58 = vadd.f32 %v6981_v22, %v435_v52  ;;  %v6094_v35 = vpop.f32.mrb[2].mxu0  ;;  %v500_v6 = vadd.f32 %v6981_v22, %v499_v45  ;;  %v6110_v16 = vpop.f32.mrb[2].mxu1  ;;  %8541 = vst [vmem:[#allocation21_spill] sm:$0xff] %v7036_v54 }
 0x104   : > { %v564_v50 = vmax.f32 %v444_v46, 0.0  ;;  %v447_v8 = vadd.f32 %v6094_v35, %v6981_v22  ;;  %v438_v15 = vpop.f32.mrb[3].mxu0  ;;  %v580_v20 = vmax.f32 %v508_v47, 0.0  ;;  %v511_v23 = vadd.f32 %v6110_v16, %v6981_v22  ;;  %v502_v24 = vpop.f32.mrb[3].mxu1 }
 0x105   : > { %v439_v17 = vadd.f32 %v6981_v22, %v438_v15  ;;  %v578_v40 = vmax.f32 %v500_v6, 0.0  ;;  %v503_v2 = vadd.f32 %v6981_v22, %v502_v24  ;;  %v562_v3 = vmax.f32 %v436_v58, 0.0 }
 0x106   : > { %v565_v37 = vmax.f32 %v447_v8, 0.0  ;;  %v581_v32 = vmax.f32 %v511_v23, 0.0  ;;  %v1479_v46 = vrot.slane %v1477_v43, 5  ;;  %v2163_v35 = vshll.u32 %v5468_v7, 16 }
 0x107   : > { %v563_v44 = vmax.f32 %v439_v17, 0.0  ;;  %v579_v52 = vmax.f32 %v503_v2, 0.0  ;;  %v7042_v6 = vrot.slane %v2160_v29, 3 }
 0x108   : > { %v7032_v26 = vpack.c.bf16 %v565_v37, %v564_v50  ;;  %v7038_v15 = vpack.c.bf16 %v581_v32, %v580_v20  ;;  %v7040_v8 = vor.u32 %v1479_v46, %v1476_v36  ;;  %v7048_v17 = vrot.slane %v2163_v35, 4 }
 0x109   : > { %v598_v47 = vpack.c.bf16 %v563_v44, %v562_v3  ;;  %v6097_v45 = vpop.f32.mrb[4].mxu0  ;;  %8543 = vst [vmem:[#allocation23_spill] sm:$0xff] %v7042_v6  ;;  %v7046_v50 = vpack.c.bf16 %v579_v52, %v578_v40  ;;  %v6113_v16 = vpop.f32.mrb[4].mxu1 }
 0x10a   : > { %8542 = vst [vmem:[#allocation22_spill] sm:$0xff] %v7040_v8  ;;  %v8435_v58 = vrot.slane %v7032_v26, 4  ;;  %v460_v4 = vadd.f32 %v6097_v45, %v6981_v22  ;;  %v451_v43 = vpop.f32.mrb[5].mxu0  ;;  %8544 = vst [vmem:[#allocation24_spill] sm:$0xff] %v7048_v17  ;;  %v8441_v20 = vrot.slane %v7038_v15, 4  ;;  %v7053_v24 = vadd.f32 %v6113_v16, %v6981_v22  ;;  %v515_v29 = vpop.f32.mrb[5].mxu1 }
 0x10b   : > { %v631_v30 = vrot.slane %v598_v47, 4  ;;  %v452_v7 = vadd.f32 %v6981_v22, %v451_v43  ;;  %v6098_v23 = vpop.f32.mrb[6].mxu0  ;;  %v8442_v40 = vrot.slane %v7046_v50, 4  ;;  %v7058_v3 = vadd.f32 %v6981_v22, %v515_v29  ;;  %v7060_v44 = vpop.f32.mrb[6].mxu1 }
 0x10c   : > { %v568_v37 = vmax.f32 %v460_v4, 0.0  ;;  %v463_v2 = vadd.f32 %v6098_v23, %v6981_v22  ;;  %v454_v36 = vpop.f32.mrb[7].mxu0  ;;  %v7069_v47 = vpop.f32.mrb[7].mxu1 }
 0x10d   : > { %v7065_v32 = vsel %vm630_vm5, %v631_v30, %v8435_v58  ;;  %679 = vst [vmem:[#allocation2 + $0x8] sm:$0xf0] %v631_v30  ;;  %v566_v46 = vmax.f32 %v452_v7, 0.0  ;;  %v455_v52 = vadd.f32 %v6981_v22, %v454_v36  ;;  %v7092_v4 = vsel %vm630_vm5, %v8442_v40, %v8441_v20 }
 0x10e   : > { %680 = vst [vmem:[#allocation2 + $0x10] sm:$0xff] %v7065_v32  ;;  %v569_v45 = vmax.f32 %v463_v2, 0.0  ;;  %v2404_v43 = vsel %vm1483_vm6, %v7065_v32, 0  ;;  %v1501_v16 = vsel %vm1484_vm7, %v7065_v32, 0  ;;  %v7085_v2 = vsel %vm8480_vm9, %v7065_v32, 0  ;;  %688 = vst [vmem:[#allocation2 + $0x50] sm:$0xff] %v7092_v4 }
 0x10f   : > { %v567_v30 = vmax.f32 %v455_v52, 0.0  ;;  %v2429_v7 = vshrl.u32 %v2404_v43, 16  ;;  %v2432_v23 = vshll.u32 %v2404_v43, 16  ;;  %v1535_v29 = vshrl.u32 %v1501_v16, 16 }
 0x110   : > { %v7080_v36 = vpack.c.bf16 %v569_v45, %v568_v37  ;;  %v1538_v35 = vshll.u32 %v1501_v16, 16  ;;  %v2220_v6 = vshrl.u32 %v7085_v2, 16  ;;  %v8548_v34 = vrot.slane %v7065_v32, 4 }
 0x111   : > { %v600_v52 = vpack.c.bf16 %v567_v30, %v566_v46  ;;  %v6101_v43 = vpop.f32.mrb[8].mxu0  ;;  %v2431_v58 = vrot.slane %v2429_v7, 3  ;;  %v2434_v48 = vrot.slane %v2432_v23, 4  ;;  %v1537_v17 = vrot.slane %v1535_v29, 3  ;;  %v7098_v0 = vpop.f32.mrb[8].mxu1 }
 0x112   : > { %v476_v45 = vadd.f32 %v6101_v43, %v6981_v22  ;;  %v467_v16 = vpop.f32.mrb[9].mxu0  ;;  %v1540_v56 = vrot.slane %v1538_v35, 4  ;;  %v7104_v23 = vpop.f32.mrb[9].mxu1  ;;  %v7109_v39 = vrot.slane %v2220_v6, 4 }
 0x113   : > { %v634_v8 = vrot.slane %v600_v52, 4  ;;  %v468_v20 = vadd.f32 %v6981_v22, %v467_v16  ;;  %v6102_v46 = vpop.f32.mrb[10].mxu0  ;;  %v7101_v30 = vor.u32 %v2434_v48, %v2431_v58  ;;  %v8545_v52 = vrot.slane %v7032_v26, 4  ;;  %v7122_v7 = vpop.f32.mrb[10].mxu1 }
 0x114   : > { %v572_v29 = vmax.f32 %v476_v45, 0.0  ;;  %v479_v40 = vadd.f32 %v6102_v46, %v6981_v22  ;;  %v470_v43 = vpop.f32.mrb[11].mxu0  ;;  %v1702_v37 = vld [vmem:[#allocation2 + $0x8] sm:$0xff]  ;;  %v7107_v54 = vor.u32 %v1540_v56, %v1537_v17  ;;  %v8546_v48 = vrot.slane %v7080_v36, 4 }
 0x115   : > { %v2386_v35 = vld [vmem:[#allocation2 + $0x8] sm:$0xf8]  ;;  %v7114_v16 = vsel %vm630_vm5, %v8545_v52, %v634_v8  ;;  %v570_v45 = vmax.f32 %v468_v20, 0.0  ;;  %v471_v46 = vadd.f32 %v6981_v22, %v470_v43  ;;  %v1736_v6 = vrot.slane %v1702_v37, 4 }
 0x116   : > { %v7119_v58 = vsel %vm630_vm5, %v634_v8, %v8546_v48  ;;  %681 = vst [vmem:[#allocation2 + $0x18] sm:$0xff] %v7114_v16  ;;  %v573_v56 = vmax.f32 %v479_v40, 0.0  ;;  %v1500_v26 = vsel %vm1483_vm6, %v1702_v37, 0  ;;  %v2403_v17 = vsel %vm1482_vm0, %v2386_v35, 0  ;;  %v7131_v8 = vpop.f32.mrb[11].mxu1 }
 0x117   : > { %682 = vst [vmem:[#allocation2 + $0x20] sm:$0xff] %v7119_v58  ;;  %v571_v20 = vmax.f32 %v471_v46, 0.0  ;;  %v1526_v43 = vshrl.u32 %v1500_v26, 16  ;;  %v1529_v52 = vshll.u32 %v1500_v26, 16  ;;  %v2421_v48 = vshrl.u32 %v2403_v17, 16 }
 0x118   : > { %v7133_v57 = vpack.c.bf16 %v573_v56, %v572_v29  ;;  %v1737_v40 = vsel %vm630_vm5, %v8547_v18, %v1736_v6  ;;  %v1739_v63 = vsel %vm630_vm5, %v1736_v6, %v8548_v34  ;;  %v2424_v13 = vshll.u32 %v2403_v17, 16  ;;  %v6286_v6 = vld [vmem:[%s8425_s3 + $0x100] sm:$0xff]  }
 0x119   : > { %v602_v35 = vpack.c.bf16 %v571_v20, %v570_v45  ;;  %4215 = vmatprep.mubr.bf16.mxu1 %v1737_v40  ;;  %v6105_v38 = vpop.f32.mrb[12].mxu0  ;;  %v1528_v25 = vrot.slane %v1526_v43, 3  ;;  %v1531_v1 = vrot.slane %v1529_v52, 4  ;;  %v2423_v46 = vrot.slane %v2421_v48, 3  ;;  %v7146_v61 = vpop.f32.mrb[12].mxu1 }
 0x11a   : > { %v8456_v29 = vrot.slane %v7133_v57, 4  ;;  %v492_v56 = vadd.f32 %v6105_v38, %v6981_v22  ;;  %v483_v27 = vpop.f32.mrb[13].mxu0  ;;  %v2426_v26 = vrot.slane %v2424_v13, 4  ;;  %v2186_v18 = vsel %vm2169_vm10, %v1702_v37, 0  ;;  %v7152_v52 = vpop.f32.mrb[13].mxu1 }
 0x11b   : > { %v638_v34 = vrot.slane %v602_v35, 4  ;;  %v1532_v45 = vor.u32 %v1531_v1, %v1528_v25  ;;  %v484_v17 = vadd.f32 %v6981_v22, %v483_v27  ;;  %v6106_v20 = vpop.f32.mrb[14].mxu0  ;;  %v2211_v43 = vshrl.u32 %v2186_v18, 16  ;;  %v6287_v1 = vld [vmem:[%s8425_s3 + $0x148] sm:$0xff]   ;;  %v7158_v25 = vpop.f32.mrb[14].mxu1 }
 0x11c   : > { %v576_v38 = vmax.f32 %v492_v56, 0.0  ;;  %v2427_v48 = vor.u32 %v2426_v26, %v2423_v46  ;;  %v495_v13 = vadd.f32 %v6106_v20, %v6981_v22  ;;  %v2214_v40 = vshll.u32 %v2186_v18, 16  ;;  %v486_v37 = vpop.f32.mrb[15].mxu0  ;;  %v7174_v20 = vpop.f32.mrb[15].mxu1 }
 0x11d   : > { %v8549_v35 = vrot.slane %v7080_v36, 4  ;;  %v7168_v56 = vsel %vm630_vm5, %v638_v34, %v8456_v29  ;;  %v8550_v46 = vor.u32 %v6704_v60, %v6702_v59  ;;  %v574_v18 = vmax.f32 %v484_v17, 0.0  ;;  %8551 = vst [vmem:[#allocation25_spill] sm:$0xff] %v7174_v20 }
 0x11e   : > { %684 = vst [vmem:[#allocation2 + $0x30] sm:$0xff] %v7168_v56  ;;  %v2436_v36 = vsel %vm1516_vm4, %v2427_v48, %v7101_v30  ;;  %v2213_v51 = vrot.slane %v2211_v43, 4  ;;  %v487_v59 = vadd.f32 %v6981_v22, %v486_v37  ;;  %v1542_v60 = vsel %vm1516_vm4, %v1532_v45, %v7107_v54  ;;  %v6288_v43 = vld [vmem:[%s8425_s3 + $0x108] sm:$0xff]  }
 0x11f   : > { %v7163_v27 = vsel %vm630_vm5, %v8549_v35, %v638_v34  ;;  %v1533_v26 = vsel %vm1516_vm4, %v8550_v46, %v1532_v45  ;;  %v577_v35 = vmax.f32 %v495_v13, 0.0  ;;  %v2216_v34 = vrot.slane %v2214_v40, 5  ;;  %4376 = vmatprep.mubr.bf16.mxu0 %v2436_v36  ;;  %v6289_v45 = vld [vmem:[%s8425_s3 + $0x150] sm:$0xff]   ;;  %v6294_v40 = vld [vmem:[%s8425_s3 + $0x180] sm:$0xff]  }
 0x120   : > { %683 = vst [vmem:[#allocation2 + $0x28] sm:$0xff] %v7163_v27  ;;  %4216 = vmatmul.mubr.bf16.vlgmr.msra.gmra.mrb[16].mxu1 %v1533_v26  ;;  %v1740_v17 = vrot.slane %v7114_v16, 4  ;;  %v2405_v46 = vsel %vm1484_vm7, %v7114_v16, 0  ;;  %v575_v37 = vmax.f32 %v487_v59, 0.0  ;;  %v8552_v26 = vrot.slane %v7065_v32, 4 }
 0x121   : > { %5804 = vmatpush3.bf16.msra.mxu1 %v6286_v6  ;;  %4223 = vmatprep.mubr.bf16.mxu1 %v1739_v63  ;;  %v605_v48 = vpack.c.bf16 %v577_v35, %v576_v38  ;;  %v2217_v13 = vor.u32 %v2216_v34, %v2213_v51  ;;  %v2438_v6 = vshrl.u32 %v2405_v46, 16  ;;  %v2441_v63 = vshll.u32 %v2405_v46, 16  ;;  %v6297_v35 = vld [vmem:[%s8425_s3 + $0x1c8] sm:$0xff]  }
 0x122   : > { %5805 = vmatprep.subr.bf16.mxu1 %v6287_v1  ;;  %v1741_v36 = vsel %vm630_vm5, %v8552_v26, %v1740_v17  ;;  %v8553_v51 = vshll.u32 %v7085_v2, 16  ;;  %v2406_v1 = vsel %vm8463_vm11, %v7119_v58, 0  ;;  %v8554_v46 = vor.u32 %v6739_v28, %v6734_v21 }
 0x123   : > { %v644_v34 = vrot.slane %v605_v48, 4  ;;  %v2440_v32 = vrot.slane %v2438_v6, 3  ;;  %v2443_v29 = vrot.slane %v2441_v63, 4  ;;  %v604_v26 = vpack.c.bf16 %v575_v37, %v574_v18 }
 0x124   : > { %v2225_v38 = vrot.slane %v8553_v51, 5  ;;  %v2218_v59 = vsel %vm1338_vm2, %v8554_v46, %v2217_v13  ;;  %v2447_v51 = vshrl.u32 %v2406_v1, 16  ;;  %v2450_v53 = vshll.u32 %v2406_v1, 16 }
 0x125   : > { %4377 = vmatmul.mubr.bf16.vlgmr.msra.gmra.mrb[16].mxu0 %v2218_v59  ;;  %5806 = vmatpush3.bf16.msra.mxu1 %v6288_v43  ;;  %v2444_v20 = vor.u32 %v2443_v29, %v2440_v32  ;;  %v1502_v48 = vsel %vm8463_vm11, %v7114_v16, 0  ;;  %v1742_v21 = vrot.slane %v7119_v58, 4  ;;  %v2188_v28 = vsel %vm2171_vm12, %v7114_v16, 0  ;;  %v6298_v29 = vld [vmem:[%s8425_s3 + $0x188] sm:$0xff]   ;;  %v6291_v16 = vld [vmem:[%s8425_s3 + $0x158] sm:$0xff]  }
 0x126   : > { %v7214_v2 = vor.u32 %v2225_v38, %v7109_v39  ;;  %5807 = vmatprep.subr.bf16.mxu1 %v6289_v45  ;;  %v6290_v39 = vld [vmem:[%s8425_s3 + $0x110] sm:$0xff]   ;;  %5916 = vmatpush3.bf16.msra.mxu0 %v6294_v40  ;;  %v642_v18 = vrot.slane %v604_v26, 4  ;;  %v2449_v6 = vrot.slane %v2447_v51, 3  ;;  %v2452_v63 = vrot.slane %v2450_v53, 4 }
 0x127   : > { %5917 = vmatprep.subr.bf16.mxu0 %v6297_v35  ;;  %v6301_v45 = vld [vmem:[%s8425_s3 + $0x1d0] sm:$0xff]   ;;  %v2445_v40 = vsel %vm1516_vm4, %v7101_v30, %v2444_v20  ;;  %v1544_v37 = vshrl.u32 %v1502_v48, 16  ;;  %v1547_v38 = vshll.u32 %v1502_v48, 16  ;;  %v8555_v53 = vrot.slane %v7133_v57, 4  ;;  %v6295_v48 = vld [vmem:[%s8425_s3 + $0x160] sm:$0xff]  }
 0x128   : > { %v2227_v43 = vsel %vm1338_vm2, %v2217_v13, %v7214_v2  ;;  %4224 = vmatmul.mubr.bf16.gmra.mrb[20].mxu1 %v1542_v60  ;;  %v1743_v13 = vsel %vm630_vm5, %v1740_v17, %v1742_v21  ;;  %v7249_v35 = vsel %vm630_vm5, %v642_v18, %v644_v34  ;;  %4384 = vmatprep.mubr.bf16.mxu0 %v2445_v40  ;;  %v2229_v46 = vshrl.u32 %v2188_v28, 16 }
 0x129   : > { %v7246_v1 = vsel %vm630_vm5, %v8555_v53, %v642_v18  ;;  %4231 = vmatprep.mubr.bf16.mxu1 %v1741_v36  ;;  %v2453_v60 = vor.u32 %v2452_v63, %v2449_v6  ;;  %686 = vst [vmem:[#allocation2 + $0x40] sm:$0xff] %v7249_v35  ;;  %v1546_v30 = vrot.slane %v1544_v37, 3  ;;  %v1549_v59 = vrot.slane %v1547_v38, 4  ;;  %5808 = vmatpush3.bf16.msra.mxu1 %v6290_v39  ;;  %v6292_v36 = vld [vmem:[%s8425_s3 + $0x118] sm:$0xff]  }
 0x12a   : > { %685 = vst [vmem:[#allocation2 + $0x38] sm:$0xff] %v7246_v1  ;;  %v2232_v32 = vshll.u32 %v2188_v28, 16  ;;  %v8556_v17 = vrot.slane %v7046_v50, 4  ;;  %5918 = vmatpush3.bf16.msra.mxu0 %v6298_v29  ;;  %v2231_v51 = vrot.slane %v2229_v46, 4  ;;  %v2407_v50 = vsel %vm8458_vm13, %v7163_v27, 0  ;;  %5809 = vmatprep.subr.bf16.mxu1 %v6291_v16  ;;  %v6305_v6 = vld [vmem:[%s8425_s3 + $0x1d8] sm:$0xff]  }
 0x12b   : > { %v2454_v26 = vsel %vm1516_vm4, %v2444_v20, %v2453_v60  ;;  %5919 = vmatprep.subr.bf16.mxu0 %v6301_v45  ;;  %v6302_v20 = vld [vmem:[%s8425_s3 + $0x190] sm:$0xff]   ;;  %v1550_v28 = vor.u32 %v1549_v59, %v1546_v30  ;;  %v2456_v29 = vshrl.u32 %v2407_v50, 16  ;;  %v2459_v18 = vshll.u32 %v2407_v50, 16  ;;  %v6309_v50 = vld [vmem:[%s8425_s3 + $0x1e0] sm:$0xff]  }
 0x12c   : > { %v7256_v57 = vsel %vm630_vm5, %v644_v34, %v8556_v17  ;;  %v1503_v34 = vsel %vm8458_vm13, %v7119_v58, 0  ;;  %v2234_v39 = vrot.slane %v2232_v32, 5  ;;  %v1744_v40 = vrot.slane %v7163_v27, 4 }
 0x12d   : > { %687 = vst [vmem:[#allocation2 + $0x48] sm:$0xff] %v7256_v57  ;;  %4385 = vmatmul.mubr.bf16.gmra.mrb[20].mxu0 %v2227_v43  ;;  %v1553_v63 = vshrl.u32 %v1503_v34, 16  ;;  %v1556_v16 = vshll.u32 %v1503_v34, 16  ;;  %v2189_v45 = vsel %vm2172_vm14, %v7119_v58, 0  ;;  %v1551_v37 = vsel %vm1516_vm4, %v7107_v54, %v1550_v28  ;;  %5810 = vmatpush3.bf16.msra.mxu1 %v6292_v36  ;;  %v6296_v43 = vld [vmem:[%s8425_s3 + $0x120] sm:$0xff]   ;;  %v6299_v54 = vld [vmem:[%s8425_s3 + $0x168] sm:$0xff]  }
 0x12e   : > { %4392 = vmatprep.mubr.bf16.mxu0 %v2454_v26  ;;  %v2235_v38 = vor.u32 %v2234_v39, %v2231_v51  ;;  %v2458_v53 = vrot.slane %v2456_v29, 3  ;;  %v2461_v46 = vrot.slane %v2459_v18, 4  ;;  %v7292_v32 = vsel %vm630_vm5, %v1742_v21, %v1744_v40  ;;  %5811 = vmatprep.subr.bf16.mxu1 %v6295_v48  ;;  %v6306_v36 = vld [vmem:[%s8425_s3 + $0x198] sm:$0xff]  }
 0x12f   : > { %v1555_v30 = vrot.slane %v1553_v63, 3  ;;  %v1558_v59 = vrot.slane %v1556_v16, 4  ;;  %v2238_v17 = vshrl.u32 %v2189_v45, 16  ;;  %5920 = vmatpush3.bf16.msra.mxu0 %v6302_v20  ;;  %v2241_v58 = vshll.u32 %v2189_v45, 16 }
 0x130   : > { %4232 = vmatmul.mubr.bf16.gmra.mrb[24].mxu1 %v1551_v37  ;;  %v2236_v26 = vsel %vm1338_vm2, %v7214_v2, %v2235_v38  ;;  %v2462_v51 = vor.u32 %v2461_v46, %v2458_v53  ;;  %v2408_v21 = vsel %vm8459_vm15, %v7168_v56, 0  ;;  %5921 = vmatprep.subr.bf16.mxu0 %v6305_v6  ;;  %vm8462_vm13 = vcmp.ne.s16.totalorder %v6912_v9, 0 }
 0x131   : > { %4239 = vmatprep.mubr.bf16.mxu1 %v1743_v13  ;;  %v1559_v34 = vor.u32 %v1558_v59, %v1555_v30  ;;  %v2240_v48 = vrot.slane %v2238_v17, 4  ;;  %v2465_v20 = vshrl.u32 %v2408_v21, 16  ;;  %v2468_v39 = vshll.u32 %v2408_v21, 16  ;;  %5812 = vmatpush3.bf16.msra.mxu1 %v6296_v43  ;;  %v6300_v13 = vld [vmem:[%s8425_s3 + $0x128] sm:$0xff]  }
 0x132   : > { %v2463_v2 = vsel %vm1516_vm4, %v2453_v60, %v2462_v51  ;;  %v2243_v29 = vrot.slane %v2241_v58, 5  ;;  %v1504_v18 = vsel %vm8459_vm15, %v7163_v27, 0  ;;  %v582_v6 = vmax.f32 %v7058_v3, 0.0  ;;  %5813 = vmatprep.subr.bf16.mxu1 %v6299_v54  ;;  %v6303_v60 = vld [vmem:[%s8425_s3 + $0x170] sm:$0xff]   ;;  %v6310_v3 = vld [vmem:[%s8425_s3 + $0x1a0] sm:$0xff]   ;;  %v6311_v30 = vld [vmem:[%s8425_s3 + $0x1e8] sm:$0xff]  }
 0x133   : > { %v1560_v63 = vsel %vm1516_vm4, %v1550_v28, %v1559_v34  ;;  %v2467_v16 = vrot.slane %v2465_v20, 3  ;;  %v2470_v45 = vrot.slane %v2468_v39, 4  ;;  %v1562_v37 = vshrl.u32 %v1504_v18, 16  ;;  %5922 = vmatpush3.bf16.msra.mxu0 %v6306_v36 }
 0x134   : > { %v2244_v53 = vor.u32 %v2243_v29, %v2240_v48  ;;  %v1565_v46 = vshll.u32 %v1504_v18, 16  ;;  %v1746_v43 = vrot.slane %v7168_v56, 4  ;;  %v527_v28 = vadd.f32 %v7060_v44, %v6981_v22  ;;  %5923 = vmatprep.subr.bf16.mxu0 %v6309_v50  ;;  %v6304_v50 = vld [vmem:[%s8425_s3 + $0x130] sm:$0xff]  }
 0x135   : > { %vm8464_vm15 = vcmp.ne.s16.totalorder %v6915_v11, 0  ;;  %4393 = vmatmul.mubr.bf16.gmra.mrb[24].mxu0 %v2236_v26  ;;  %v7331_v59 = vor.u32 %v2470_v45, %v2467_v16  ;;  %v1564_v17 = vrot.slane %v1562_v37, 3  ;;  %v2190_v54 = vsel %vm8460_vm1, %v7163_v27, 0  ;;  %5814 = vmatpush3.bf16.msra.mxu1 %v6300_v13  ;;  %v6313_v13 = vld [vmem:[%s8425_s3 + $0x1f0] sm:$0xff]  }
 0x136   : > { %v519_v36 = vadd.f32 %v6981_v22, %v7069_v47  ;;  %4400 = vmatprep.mubr.bf16.mxu0 %v2463_v2  ;;  %v2245_v44 = vsel %vm1338_vm2, %v2235_v38, %v2244_v53  ;;  %v1567_v58 = vrot.slane %v1565_v46, 4  ;;  %v7342_v21 = vsel %vm630_vm5, %v1744_v40, %v1746_v43  ;;  %5815 = vmatprep.subr.bf16.mxu1 %v6303_v60  ;;  %v6307_v38 = vld [vmem:[%s8425_s3 + $0x178] sm:$0xff]   ;;  %v6312_v40 = vld [vmem:[%s8425_s3 + $0x1a8] sm:$0xff]  }
 0x137   : > { %v585_v26 = vmax.f32 %v527_v28, 0.0  ;;  %v2472_v27 = vsel %vm1516_vm4, %v2462_v51, %v7331_v59  ;;  %v2247_v48 = vshrl.u32 %v2190_v54, 16  ;;  %v2250_v47 = vshll.u32 %v2190_v54, 16  ;;  %5924 = vmatpush3.bf16.msra.mxu0 %v6310_v3  ;;  %v6308_v28 = vld [vmem:[%s8425_s3 + $0x138] sm:$0xff]  }
 0x138   : > { %v583_v20 = vmax.f32 %v519_v36, 0.0  ;;  %4240 = vmatmul.mubr.bf16.gmra.mrb[28].mxu1 %v1560_v63  ;;  %v7355_v39 = vor.u32 %v1567_v58, %v1564_v17  ;;  %v8557_v2 = vmax.f32 %v7053_v24, 0.0  ;;  %v2409_v51 = vsel %vm8461_vm3, %v7246_v1, 0  ;;  %5925 = vmatprep.subr.bf16.mxu0 %v6311_v30 }
 0x139   : > { %v1505_v18 = vsel %vm8461_vm3, %v7168_v56, 0  ;;  %4247 = vmatprep.mubr.bf16.mxu1 %v7292_v32  ;;  %v2249_v63 = vrot.slane %v2247_v48, 4  ;;  %v2252_v16 = vrot.slane %v2250_v47, 5  ;;  %v2474_v45 = vshrl.u32 %v2409_v51, 16  ;;  %5816 = vmatpush3.bf16.msra.mxu1 %v6304_v50  ;;  %v6315_v48 = vld [vmem:[%s8425_s3 + $0x1f8] sm:$0xff]  }
 0x13a   : > { %v7359_v29 = vpack.c.bf16 %v585_v26, %v8557_v2  ;;  %v608_v24 = vpack.c.bf16 %v583_v20, %v582_v6  ;;  %vm8467_vm1 = vcmp.ne.s16.totalorder %v6918_v42, 0  ;;  %v1569_v37 = vsel %vm1516_vm4, %v1559_v34, %v7355_v39  ;;  %5817 = vmatprep.subr.bf16.mxu1 %v6307_v38  ;;  %v6314_v6 = vld [vmem:[%s8425_s3 + $0x1b0] sm:$0xff]   ;;  %v7384_v34 = vld [vmem:[%s8425_s3 + $0x200] sm:$0xff]  }
 0x13b   : > { %v2477_v3 = vshll.u32 %v2409_v51, 16  ;;  %v1571_v46 = vshrl.u32 %v1505_v18, 16  ;;  %v2253_v30 = vor.u32 %v2252_v16, %v2249_v63  ;;  %v2476_v17 = vrot.slane %v2474_v45, 3  ;;  %5926 = vmatpush3.bf16.msra.mxu0 %v6312_v40 }
 0x13c   : > { %v652_v60 = vrot.slane %v7359_v29, 4  ;;  %v650_v32 = vrot.slane %v608_v24, 4  ;;  %v1574_v54 = vshll.u32 %v1505_v18, 16  ;;  %v1748_v26 = vrot.slane %v7246_v1, 4  ;;  %5927 = vmatprep.subr.bf16.mxu0 %v6313_v13 }
 0x13d   : > { %v2479_v36 = vrot.slane %v2477_v3, 4  ;;  %v1573_v58 = vrot.slane %v1571_v46, 3  ;;  %v2191_v50 = vsel %vm8462_vm13, %v7168_v56, 0  ;;  %4401 = vmatmul.mubr.bf16.gmra.mrb[28].mxu0 %v2245_v44  ;;  %v2254_v47 = vsel %vm1338_vm2, %v2244_v53, %v2253_v30  ;;  %5818 = vmatpush3.bf16.msra.mxu1 %v6308_v28  ;;  %v6316_v56 = vld [vmem:[%s8425_s3 + $0x1b8] sm:$0xff]  }
 0x13e   : > { %v8558_v20 = vrot.slane %v7038_v15, 4  ;;  %v7402_v40 = vsel %vm630_vm5, %v650_v32, %v652_v60  ;;  %v1576_v2 = vrot.slane %v1574_v54, 4  ;;  %vm8465_vm3 = vcmp.ne.s16.totalorder %v6922_v12, 0  ;;  %4408 = vmatprep.mubr.bf16.mxu0 %v2472_v27  ;;  %6123 = vmatprep.subr.bf16.mxu1 %v7384_v34 }
 0x13f   : > { %690 = vst [vmem:[#allocation2 + $0x60] sm:$0xff] %v7402_v40  ;;  %v2480_v44 = vor.u32 %v2479_v36, %v2476_v17  ;;  %v1749_v15 = vsel %vm630_vm5, %v1746_v43, %v1748_v26  ;;  %v2256_v53 = vshrl.u32 %v2191_v50, 16  ;;  %v2259_v51 = vshll.u32 %v2191_v50, 16  ;;  %5928 = vmatpush3.bf16.msra.mxu0 %v6314_v6 }
 0x140   : > { %v7397_v38 = vsel %vm630_vm5, %v8558_v20, %v650_v32  ;;  %v1577_v18 = vor.u32 %v1576_v2, %v1573_v58  ;;  %v2410_v13 = vsel %vm8464_vm15, %v7249_v35, 0  ;;  %v540_v27 = vadd.f32 %v7098_v0, %v6981_v22  ;;  %4248 = vmatmul.mubr.bf16.gmra.mrb[32].mxu1 %v1569_v37  ;;  %v8559_v0 = vld [vmem:[#allocation10_spill] sm:$0xff]  ;;  %5929 = vmatprep.subr.bf16.mxu0 %v6315_v48 }
 0x141   : > { %689 = vst [vmem:[#allocation2 + $0x58] sm:$0xff] %v7397_v38  ;;  %v1506_v63 = vsel %vm8464_vm15, %v7246_v1, 0  ;;  %v2481_v43 = vsel %vm1516_vm4, %v7331_v59, %v2480_v44  ;;  %v2258_v16 = vrot.slane %v2256_v53, 4  ;;  %v2261_v24 = vrot.slane %v2259_v51, 5  ;;  %4255 = vmatprep.mubr.bf16.mxu1 %v7342_v21 }
 0x142   : > { %v2483_v45 = vshrl.u32 %v2410_v13, 16  ;;  %vm8466_vm13 = vcmp.ne.s16.totalorder %v6929_v14, 0  ;;  %vm8468_vm11 = vcmp.ne.s16.totalorder %v8559_v0, 0  ;;  %v1578_v3 = vsel %vm1516_vm4, %v7355_v39, %v1577_v18 }
 0x143   : > { %v2486_v46 = vshll.u32 %v2410_v13, 16  ;;  %v588_v28 = vmax.f32 %v540_v27, 0.0  ;;  %v1580_v32 = vshrl.u32 %v1506_v63, 16  ;;  %v2262_v37 = vor.u32 %v2261_v24, %v2258_v16  ;;  %5930 = vmatpush3.bf16.msra.mxu0 %v6316_v56 }
 0x144   : > { %v2485_v17 = vrot.slane %v2483_v45, 3  ;;  %v1583_v54 = vshll.u32 %v1506_v63, 16  ;;  %v532_v59 = vadd.f32 %v6981_v22, %v7104_v23  ;;  %v1750_v58 = vrot.slane %v7249_v35, 4 }
 0x145   : > { %v2488_v6 = vrot.slane %v2486_v46, 4  ;;  %v1582_v36 = vrot.slane %v1580_v32, 3  ;;  %v543_v50 = vadd.f32 %v7122_v7, %v6981_v22  ;;  %v2263_v21 = vsel %vm1338_vm2, %v2253_v30, %v2262_v37  ;;  %4409 = vmatmul.mubr.bf16.gmra.mrb[32].mxu0 %v2254_v47 }
 0x146   : > { %v1585_v39 = vrot.slane %v1583_v54, 4  ;;  %v586_v48 = vmax.f32 %v532_v59, 0.0  ;;  %v2192_v20 = vsel %vm8467_vm1, %v7246_v1, 0  ;;  %v1751_v23 = vsel %vm630_vm5, %v1748_v26, %v1750_v58  ;;  %4416 = vmatprep.mubr.bf16.mxu0 %v2481_v43 }
 0x147   : > { %v2489_v2 = vor.u32 %v2488_v6, %v2485_v17  ;;  %v589_v53 = vmax.f32 %v543_v50, 0.0  ;;  %v2265_v51 = vshrl.u32 %v2192_v20, 16  ;;  %v2268_v27 = vshll.u32 %v2192_v20, 16 }
 0x148   : > { %v1586_v13 = vor.u32 %v1585_v39, %v1582_v36  ;;  %v535_v7 = vadd.f32 %v6981_v22, %v7131_v8  ;;  %v2411_v30 = vsel %vm8465_vm3, %v7256_v57, 0  ;;  %4256 = vmatmul.mubr.bf16.gmra.mrb[36].mxu1 %v1578_v3  ;;  %v1507_v46 = vsel %vm8465_vm3, %v7249_v35, 0 }
 0x149   : > { %v2490_v63 = vsel %vm1516_vm4, %v2480_v44, %v2489_v2  ;;  %v7445_v56 = vpack.c.bf16 %v589_v53, %v588_v28  ;;  %v2267_v1 = vrot.slane %v2265_v51, 4  ;;  %v2492_v47 = vshrl.u32 %v2411_v30, 16  ;;  %4263 = vmatprep.mubr.bf16.mxu1 %v1749_v15 }
 0x14a   : > { %v1587_v26 = vsel %vm1516_vm4, %v1577_v18, %v1586_v13  ;;  %v2270_v16 = vrot.slane %v2268_v27, 5  ;;  %v587_v43 = vmax.f32 %v535_v7, 0.0  ;;  %v2495_v24 = vshll.u32 %v2411_v30, 16 }
 0x14b   : > { %v656_v45 = vrot.slane %v7445_v56, 4  ;;  %v2494_v8 = vrot.slane %v2492_v47, 3  ;;  %v1752_v44 = vrot.slane %v7256_v57, 4  ;;  %vm8469_vm15 = vcmp.ne.s16.totalorder %v6976_v19, 0  ;;  %v8560_v47 = vld [vmem:[#allocation11_spill] sm:$0xff] }
 0x14c   : > { %v2271_v28 = vor.u32 %v2270_v16, %v2267_v1  ;;  %v610_v32 = vpack.c.bf16 %v587_v43, %v586_v48  ;;  %v2497_v3 = vrot.slane %v2495_v24, 4  ;;  %v1589_v17 = vshrl.u32 %v1507_v46, 16  ;;  %v8561_v16 = vld [vmem:[#allocation12_spill] sm:$0xff] }
 0x14d   : > { %v1592_v18 = vshll.u32 %v1507_v46, 16  ;;  %v7455_v54 = vsel %vm630_vm5, %v1750_v58, %v1752_v44  ;;  %v2193_v15 = vsel %vm8466_vm13, %v7249_v35, 0  ;;  %v2412_v59 = vsel %vm8468_vm11, %v7092_v4, 0  ;;  %4417 = vmatmul.mubr.bf16.gmra.mrb[36].mxu0 %v2263_v21 }
 0x14e   : > { %vm8470_vm3 = vcmp.ne.s16.totalorder %v6985_v55, 0  ;;  %v2272_v6 = vsel %vm1338_vm2, %v2262_v37, %v2271_v28  ;;  %v654_v36 = vrot.slane %v610_v32, 4  ;;  %v2498_v50 = vor.u32 %v2497_v3, %v2494_v8  ;;  %4424 = vmatprep.mubr.bf16.mxu0 %v2490_v63 }
 0x14f   : > { %v1591_v39 = vrot.slane %v1589_v17, 3  ;;  %v1594_v48 = vrot.slane %v1592_v18, 4  ;;  %v2274_v20 = vshrl.u32 %v2193_v15, 16  ;;  %v2277_v58 = vshll.u32 %v2193_v15, 16 }
 0x150   : > { %v2501_v53 = vshrl.u32 %v2412_v59, 16  ;;  %v7468_v35 = vsel %vm630_vm5, %v652_v60, %v654_v36  ;;  %v7473_v51 = vsel %vm630_vm5, %v654_v36, %v656_v45  ;;  %v2499_v37 = vsel %vm1516_vm4, %v2489_v2, %v2498_v50  ;;  %4264 = vmatmul.mubr.bf16.gmra.mrb[40].mxu1 %v1587_v26  ;;  %v8562_v36 = vld [vmem:[#allocation25_spill] sm:$0xff] }
 0x151   : > { %v2504_v27 = vshll.u32 %v2412_v59, 16  ;;  %691 = vst [vmem:[#allocation2 + $0x68] sm:$0xff] %v7468_v35  ;;  %692 = vst [vmem:[#allocation2 + $0x70] sm:$0xff] %v7473_v51  ;;  %v1595_v21 = vor.u32 %v1594_v48, %v1591_v39  ;;  %v2276_v7 = vrot.slane %v2274_v20, 4  ;;  %v2279_v30 = vrot.slane %v2277_v58, 5  ;;  %4271 = vmatprep.mubr.bf16.mxu1 %v1751_v23 }
 0x152   : > { %v2503_v63 = vrot.slane %v2501_v53, 3  ;;  %v556_v60 = vadd.f32 %v7146_v61, %v6981_v22  ;;  %v1508_v1 = vsel %vm8468_vm11, %v7256_v57, 0  ;;  %v548_v2 = vadd.f32 %v6981_v22, %v7152_v52  ;;  %v8563_v53 = vld [vmem:[#allocation13_spill] sm:$0xff] }
 0x153   : > { %v2506_v29 = vrot.slane %v2504_v27, 4  ;;  %vm8471_vm13 = vcmp.ne.s16.totalorder %v8560_v47, 0  ;;  %vm8472_vm1 = vcmp.ne.s16.totalorder %v8561_v16, 0  ;;  %v1596_v43 = vsel %vm1516_vm4, %v1586_v13, %v1595_v21 }
 0x154   : > { %v2280_v24 = vor.u32 %v2279_v30, %v2276_v7  ;;  %v1598_v26 = vshrl.u32 %v1508_v1, 16  ;;  %v1601_v8 = vshll.u32 %v1508_v1, 16  ;;  %v592_v32 = vmax.f32 %v556_v60, 0.0  ;;  %v8564_v30 = vld [vmem:[#allocation14_spill] sm:$0xff] }
 0x155   : > { %v2507_v46 = vor.u32 %v2506_v29, %v2503_v63  ;;  %v590_v61 = vmax.f32 %v548_v2, 0.0  ;;  %v1754_v3 = vrot.slane %v7092_v4, 4  ;;  %v559_v52 = vadd.f32 %v7158_v25, %v6981_v22  ;;  %4425 = vmatmul.mubr.bf16.gmra.mrb[40].mxu0 %v2272_v6 }
 0x156   : > { %v2281_v17 = vsel %vm1338_vm2, %v2271_v28, %v2280_v24  ;;  %v1600_v18 = vrot.slane %v1598_v26, 3  ;;  %v1603_v15 = vrot.slane %v1601_v8, 4  ;;  %v2194_v13 = vsel %vm8469_vm15, %v7256_v57, 0  ;;  %4432 = vmatprep.mubr.bf16.mxu0 %v2499_v37 }
 0x157   : > { %v2508_v59 = vsel %vm1516_vm4, %v2498_v50, %v2507_v46  ;;  %v7494_v23 = vsel %vm630_vm5, %v1752_v44, %v1754_v3  ;;  %v551_v39 = vadd.f32 %v6981_v22, %v8562_v36  ;;  %v593_v28 = vmax.f32 %v559_v52, 0.0  ;;  %v8565_v52 = vld [vmem:[#allocation16_spill] sm:$0xff] }
 0x158   : > { %v1604_v48 = vor.u32 %v1603_v15, %v1600_v18  ;;  %v2283_v20 = vshrl.u32 %v2194_v13, 16  ;;  %v2286_v58 = vshll.u32 %v2194_v13, 16  ;;  %vm8473_vm11 = vcmp.ne.s16.totalorder %v8563_v53, 0  ;;  %4272 = vmatmul.mubr.bf16.gmra.mrb[44].mxu1 %v1596_v43 }
 0x159   : > { %v591_v25 = vmax.f32 %v551_v39, 0.0  ;;  %v2413_v44 = vsel %vm8470_vm3, %v7397_v38, 0  ;;  %v1509_v57 = vsel %vm8470_vm3, %v7092_v4, 0  ;;  %v1756_v50 = vrot.slane %v7397_v38, 4  ;;  %4279 = vmatprep.mubr.bf16.mxu1 %v7455_v54 }
 0x15a   : > { %v1605_v22 = vsel %vm1516_vm4, %v1595_v21, %v1604_v48  ;;  %v613_v6 = vpack.c.bf16 %v593_v28, %v592_v32  ;;  %v2285_v27 = vrot.slane %v2283_v20, 4  ;;  %v2288_v7 = vrot.slane %v2286_v58, 5 }
 0x15b   : > { %vm8474_vm15 = vcmp.ne.s16.totalorder %v8564_v30, 0  ;;  %v612_v37 = vpack.c.bf16 %v591_v25, %v590_v61  ;;  %v2510_v63 = vshrl.u32 %v2413_v44, 16  ;;  %v2513_v29 = vshll.u32 %v2413_v44, 16  ;;  %v8566_v25 = vld [vmem:[#allocation17_spill] sm:$0xff] }
 0x15c   : > { %v1607_v60 = vshrl.u32 %v1509_v57, 16  ;;  %v660_v1 = vrot.slane %v613_v6, 4  ;;  %v2289_v2 = vor.u32 %v2288_v7, %v2285_v27  ;;  %v1610_v26 = vshll.u32 %v1509_v57, 16 }
 0x15d   : > { %v7513_v8 = vsel %vm630_vm5, %v1754_v3, %v1756_v50  ;;  %v658_v18 = vrot.slane %v612_v37, 4  ;;  %v2512_v21 = vrot.slane %v2510_v63, 3  ;;  %v2515_v32 = vrot.slane %v2513_v29, 4  ;;  %4433 = vmatmul.mubr.bf16.gmra.mrb[44].mxu0 %v2281_v17 }
 0x15e   : > { %v1609_v15 = vrot.slane %v1607_v60, 3  ;;  %vm2180_vm3 = vcmp.ne.s16.totalorder %v8565_v52, 0  ;;  %695 = vst [vmem:[#allocation2 + $0x88] sm:$0xf] %v660_v1  ;;  %v2290_v43 = vsel %vm1338_vm2, %v2280_v24, %v2289_v2  ;;  %v1612_v61 = vrot.slane %v1610_v26, 4  ;;  %4440 = vmatprep.mubr.bf16.mxu0 %v2508_v59 }
 0x15f   : > { %v2195_v54 = vsel %vm8471_vm13, %v7092_v4, 0  ;;  %v2414_v13 = vsel %vm8472_vm1, %v7402_v40, 0  ;;  %v7526_v3 = vsel %vm630_vm5, %v656_v45, %v658_v18  ;;  %v7529_v36 = vsel %vm630_vm5, %v658_v18, %v660_v1 }
 0x160   : > { %v2516_v39 = vor.u32 %v2515_v32, %v2512_v21  ;;  %v2292_v28 = vshrl.u32 %v2195_v54, 16  ;;  %693 = vst [vmem:[#allocation2 + $0x78] sm:$0xff] %v7526_v3  ;;  %694 = vst [vmem:[#allocation2 + $0x80] sm:$0xff] %v7529_v36  ;;  %v1613_v4 = vor.u32 %v1612_v61, %v1609_v15  ;;  %v2295_v24 = vshll.u32 %v2195_v54, 16  ;;  %4280 = vmatmul.mubr.bf16.gmra.mrb[48].mxu1 %v1605_v22  ;;  %v8568_v61 = vld [vmem:[#allocation20_spill] sm:$0xff] }
 0x161   : > { %v2519_v20 = vshrl.u32 %v2414_v13, 16  ;;  %v2522_v58 = vshll.u32 %v2414_v13, 16  ;;  %vm8478_vm13 = vcmp.ne.s16.totalorder %v8566_v25, 0  ;;  %v1510_v44 = vsel %vm8472_vm1, %v7397_v38, 0  ;;  %4287 = vmatprep.mubr.bf16.mxu1 %v7494_v23 }
 0x162   : > { %v2517_v56 = vsel %vm1516_vm4, %v2507_v46, %v2516_v39  ;;  %v2294_v45 = vrot.slane %v2292_v28, 4  ;;  %v1758_v17 = vrot.slane %v7402_v40, 4  ;;  %v1614_v57 = vsel %vm1516_vm4, %v1604_v48, %v1613_v4  ;;  %v8567_v48 = vld [vmem:[#allocation18_spill] sm:$0xff] }
 0x163   : > { %v2297_v6 = vrot.slane %v2295_v24, 5  ;;  %v2521_v27 = vrot.slane %v2519_v20, 3  ;;  %v2524_v7 = vrot.slane %v2522_v58, 4  ;;  %v1616_v37 = vshrl.u32 %v1510_v44, 16 }
 0x164   : > { %v1619_v63 = vshll.u32 %v1510_v44, 16  ;;  %v7541_v29 = vsel %vm630_vm5, %v1756_v50, %v1758_v17  ;;  %v2196_v46 = vsel %vm8473_vm11, %v7397_v38, 0  ;;  %vm2181_vm1 = vcmp.ne.s16.totalorder %v8567_v48, 0 }
 0x165   : > { %v2298_v59 = vor.u32 %v2297_v6, %v2294_v45  ;;  %v2525_v60 = vor.u32 %v2524_v7, %v2521_v27  ;;  %v2301_v1 = vshrl.u32 %v2196_v46, 16  ;;  %v2304_v26 = vshll.u32 %v2196_v46, 16  ;;  %4441 = vmatmul.mubr.bf16.gmra.mrb[48].mxu0 %v2290_v43  ;;  %v8569_v7 = vld [vmem:[#allocation21_spill] sm:$0xff] }
 0x166   : > { %v1618_v18 = vrot.slane %v1616_v37, 3  ;;  %v1621_v21 = vrot.slane %v1619_v63, 4  ;;  %v2415_v22 = vsel %vm8474_vm15, %v7468_v35, 0  ;;  %v1511_v50 = vsel %vm8474_vm15, %v7402_v40, 0  ;;  %4448 = vmatprep.mubr.bf16.mxu0 %v2517_v56 }
 0x167   : > { %v2299_v38 = vsel %vm1338_vm2, %v2289_v2, %v2298_v59  ;;  %v2526_v23 = vsel %vm1516_vm4, %v2516_v39, %v2525_v60  ;;  %v2303_v32 = vrot.slane %v2301_v1, 4  ;;  %v2306_v15 = vrot.slane %v2304_v26, 5 }
 0x168   : > { %vm8475_vm11 = vcmp.ne.s16.totalorder %v8568_v61, 0  ;;  %v1622_v54 = vor.u32 %v1621_v21, %v1618_v18  ;;  %v2528_v13 = vshrl.u32 %v2415_v22, 16  ;;  %v2531_v28 = vshll.u32 %v2415_v22, 16  ;;  %4288 = vmatmul.mubr.bf16.gmra.mrb[52].mxu1 %v1614_v57 }
 0x169   : > { %v1625_v24 = vshrl.u32 %v1511_v50, 16  ;;  %v2307_v20 = vor.u32 %v2306_v15, %v2303_v32  ;;  %v1628_v58 = vshll.u32 %v1511_v50, 16  ;;  %v1760_v45 = vrot.slane %v7468_v35, 4  ;;  %4295 = vmatprep.mubr.bf16.mxu1 %v7513_v8 }
 0x16a   : > { %v2197_v44 = vsel %vm2180_vm3, %v7402_v40, 0  ;;  %v1623_v2 = vsel %vm1516_vm4, %v1613_v4, %v1622_v54  ;;  %v2530_v39 = vrot.slane %v2528_v13, 3  ;;  %v2533_v6 = vrot.slane %v2531_v28, 4 }
 0x16b   : > { %v1627_v27 = vrot.slane %v1625_v24, 3  ;;  %vm2182_vm15 = vcmp.ne.s16.totalorder %v8569_v7, 0  ;;  %v2308_v37 = vsel %vm1338_vm2, %v2298_v59, %v2307_v20  ;;  %v1630_v63 = vrot.slane %v1628_v58, 4 }
 0x16c   : > { %v7565_v43 = vsel %vm630_vm5, %v1758_v17, %v1760_v45  ;;  %v2310_v46 = vshrl.u32 %v2197_v44, 16  ;;  %v2534_v1 = vor.u32 %v2533_v6, %v2530_v39  ;;  %v2313_v26 = vshll.u32 %v2197_v44, 16 }
 0x16d   : > { %v2416_v40 = vsel %vm8478_vm13, %v7473_v51, 0  ;;  %v1512_v4 = vsel %vm8478_vm13, %v7468_v35, 0  ;;  %v1631_v56 = vor.u32 %v1630_v63, %v1627_v27  ;;  %v1762_v28 = vrot.slane %v7473_v51, 4  ;;  %4449 = vmatmul.mubr.bf16.gmra.mrb[52].mxu0 %v2299_v38 }
 0x16e   : > { %v2312_v59 = vrot.slane %v2310_v46, 4  ;;  %v2537_v18 = vshrl.u32 %v2416_v40, 16  ;;  %v2540_v21 = vshll.u32 %v2416_v40, 16  ;;  %v2535_v17 = vsel %vm1516_vm4, %v2525_v60, %v2534_v1  ;;  %4456 = vmatprep.mubr.bf16.mxu0 %v2526_v23 }
 0x16f   : > { %v2315_v22 = vrot.slane %v2313_v26, 5  ;;  %v1634_v57 = vshrl.u32 %v1512_v4, 16  ;;  %v1637_v50 = vshll.u32 %v1512_v4, 16  ;;  %v1632_v32 = vsel %vm1516_vm4, %v1622_v54, %v1631_v56 }
 0x170   : > { %v2539_v15 = vrot.slane %v2537_v18, 3  ;;  %v2542_v13 = vrot.slane %v2540_v21, 4  ;;  %v2198_v8 = vsel %vm2181_vm1, %v7468_v35, 0  ;;  %v7581_v60 = vsel %vm630_vm5, %v1760_v45, %v1762_v28  ;;  %4296 = vmatmul.mubr.bf16.gmra.mrb[56].mxu1 %v1623_v2 }
 0x171   : > { %v2316_v24 = vor.u32 %v2315_v22, %v2312_v59  ;;  %v1636_v58 = vrot.slane %v1634_v57, 3  ;;  %v1639_v44 = vrot.slane %v1637_v50, 4  ;;  %v2319_v6 = vshrl.u32 %v2198_v8, 16  ;;  %4303 = vmatprep.mubr.bf16.mxu1 %v7541_v29  ;;  %v8570_v29 = vld [vmem:[#allocation22_spill] sm:$0xff] }
 0x172   : > { %v2543_v39 = vor.u32 %v2542_v13, %v2539_v15  ;;  %v2322_v27 = vshll.u32 %v2198_v8, 16  ;;  %v2417_v46 = vsel %vm8475_vm11, %v7526_v3, 0  ;;  %v1513_v26 = vsel %vm8475_vm11, %v7473_v51, 0 }
 0x173   : > { %v2317_v54 = vsel %vm1338_vm2, %v2307_v20, %v2316_v24  ;;  %v1640_v63 = vor.u32 %v1639_v44, %v1636_v58  ;;  %v2321_v38 = vrot.slane %v2319_v6, 4  ;;  %v2546_v45 = vshrl.u32 %v2417_v46, 16  ;;  %v8571_v44 = vld [vmem:[#allocation15_spill] sm:$0xff] }
 0x174   : > { %v2544_v35 = vsel %vm1516_vm4, %v2534_v1, %v2543_v39  ;;  %v2324_v40 = vrot.slane %v2322_v27, 5  ;;  %v2549_v23 = vshll.u32 %v2417_v46, 16  ;;  %v1643_v59 = vshrl.u32 %v1513_v26, 16 }
 0x175   : > { %v1641_v4 = vsel %vm1516_vm4, %v1631_v56, %v1640_v63  ;;  %v1646_v20 = vshll.u32 %v1513_v26, 16  ;;  %v2548_v21 = vrot.slane %v2546_v45, 3  ;;  %v1764_v22 = vrot.slane %v7526_v3, 4  ;;  %4457 = vmatmul.mubr.bf16.gmra.mrb[56].mxu0 %v2308_v37 }
 0x176   : > { %v2325_v18 = vor.u32 %v2324_v40, %v2321_v38  ;;  %v2199_v57 = vsel %vm2182_vm15, %v7473_v51, 0  ;;  %v2551_v1 = vrot.slane %v2549_v23, 4  ;;  %v1645_v50 = vrot.slane %v1643_v59, 3  ;;  %4464 = vmatprep.mubr.bf16.mxu0 %v2535_v17 }
 0x177   : > { %v1648_v15 = vrot.slane %v1646_v20, 4  ;;  %v2328_v13 = vshrl.u32 %v2199_v57, 16  ;;  %v1765_v56 = vsel %vm630_vm5, %v1762_v28, %v1764_v22  ;;  %v2331_v58 = vshll.u32 %v2199_v57, 16  ;;  %v8572_v57 = vld [vmem:[#allocation23_spill] sm:$0xff] }
 0x178   : > { %v2326_v2 = vsel %vm1338_vm2, %v2316_v24, %v2325_v18  ;;  %v7604_v8 = vsel %vm1338_vm2, %v8571_v44, %v8570_v29  ;;  %v2552_v6 = vor.u32 %v2551_v1, %v2548_v21  ;;  %4304 = vmatmul.mubr.bf16.gmra.mrb[60].mxu1 %v1632_v32  ;;  %v8573_v1 = vld [vmem:[#allocation24_spill] sm:$0xff] }
 0x179   : > { %v1649_v27 = vor.u32 %v1648_v15, %v1645_v50  ;;  %v2330_v46 = vrot.slane %v2328_v13, 4  ;;  %vm8476_vm11 = vcmp.ne.s16.totalorder %v7604_v8, 0  ;;  %v2333_v51 = vrot.slane %v2331_v58, 5  ;;  %4311 = vmatprep.mubr.bf16.mxu1 %v7565_v43 }
 0x17a   : > { %v2418_v24 = vsel %vm8476_vm11, %v7529_v36, 0  ;;  %v1514_v28 = vsel %vm8476_vm11, %v7526_v3, 0  ;;  %v2553_v26 = vsel %vm1516_vm4, %v2543_v39, %v2552_v6  ;;  %v7617_v36 = vor.u32 %v8573_v1, %v8572_v57  ;;  %v1816_v1 = vld [vmem:[#allocation2 + $0x80] sm:$0x1f] }
 0x17b   : > { %v1650_v38 = vsel %vm1516_vm4, %v1640_v63, %v1649_v27  ;;  %v2555_v40 = vshrl.u32 %v2418_v24, 16  ;;  %v2558_v45 = vshll.u32 %v2418_v24, 16  ;;  %v2334_v23 = vor.u32 %v2333_v51, %v2330_v46  ;;  %v8574_v63 = vld [vmem:[#allocation19_spill] sm:$0xff] }
 0x17c   : > { %v1652_v59 = vshrl.u32 %v1514_v28, 16  ;;  %v1655_v20 = vshll.u32 %v1514_v28, 16  ;;  %v7626_v13 = vsel %vm1516_vm4, %v8574_v63, %v7617_v36  ;;  %vm2184_vm13 = vcmp.ne.s16.totalorder %v7617_v36, 0 }
 0x17d   : > { %v2557_v37 = vrot.slane %v2555_v40, 3  ;;  %v2560_v21 = vrot.slane %v2558_v45, 4  ;;  %v2335_v17 = vsel %vm1338_vm2, %v2325_v18, %v2334_v23  ;;  %vm8477_vm11 = vcmp.ne.s16.totalorder %v7626_v13, 0  ;;  %4465 = vmatmul.mubr.bf16.gmra.mrb[60].mxu0 %v2317_v54  ;;  %v2402_v40 = vld [vmem:[#allocation2 + $0x88] sm:$0xf] }
 0x17e   : > { %v1654_v50 = vrot.slane %v1652_v59, 3  ;;  %v1657_v39 = vrot.slane %v1655_v20, 4  ;;  %v2200_v43 = vsel %vm8477_vm11, %v7526_v3, 0  ;;  %4472 = vmatprep.mubr.bf16.mxu0 %v2544_v35  ;;  %vm1498_vm11 = vcmp.ne.s16.totalorder %v8570_v29, 0  ;;  %v1129_v54 = vld [vmem:[#allocation2 + $0x80] sm:$0xf] }
 0x17f   : > { %v7621_v15 = vor.u32 %v2560_v21, %v2557_v37  ;;  %v2337_v44 = vshrl.u32 %v2200_v43, 16  ;;  %v2340_v46 = vshll.u32 %v2200_v43, 16  ;;  %v2703_v45 = vld [vmem:[#allocation2 + $0x8] sm:$0xf0]  ;;  %v2419_v35 = vsel %vm1498_vm11, %v2402_v40, 0 }
 0x180   : > { %v7628_v32 = vor.u32 %v1657_v39, %v1654_v50  ;;  %4312 = vmatmul.mubr.bf16.gmra.mrb[64].mxu1 %v1641_v4  ;;  %v1717_v4 = vld [vmem:[#allocation2 + $0x80] sm:$0xf]  ;;  %v2567_v21 = vshll.u32 %v2419_v35, 16  ;;  %v2921_v29 = vld [vmem:[#allocation2 + $0x10] sm:$0xf8] }
 0x181   : > { %v2562_v58 = vsel %vm1516_vm4, %v2552_v6, %v7621_v15  ;;  %v2339_v51 = vrot.slane %v2337_v44, 4  ;;  %v2342_v24 = vrot.slane %v2340_v46, 5  ;;  %4319 = vmatprep.mubr.bf16.mxu1 %v7581_v60  ;;  %v1515_v60 = vsel %vm1498_vm11, %v1129_v54, 0 }
 0x182   : > { %v1659_v18 = vsel %vm1516_vm4, %v1649_v27, %v7628_v32  ;;  %v7644_v27 = vld [vmem:[#allocation2 + $0x10] sm:$0xff]  ;;  %v1661_v57 = vshrl.u32 %v1515_v60, 16  ;;  %v1766_v50 = vrot.slane %v1717_v4, 4  ;;  %v2569_v46 = vrot.slane %v2567_v21, 4 }
 0x183   : > { %v7639_v28 = vor.u32 %v2342_v24, %v2339_v51  ;;  %v2721_v37 = vsel %vm2169_vm10, %v7644_v27, 0  ;;  %v2201_v51 = vsel %vm2184_vm13, %v1816_v1, 0  ;;  %v3140_v24 = vld [vmem:[#allocation2 + $0x18] sm:$0xff] }
 0x184   : > { %v2749_v43 = vshll.u32 %v2721_v37, 16  ;;  %v1767_v54 = vsel %vm630_vm5, %v1764_v22, %v1766_v50 }
 0x185   : > { %v2344_v6 = vsel %vm1338_vm2, %v2334_v23, %v7639_v28  ;;  %4473 = vmatmul.mubr.bf16.gmra.mrb[64].mxu0 %v2326_v2  ;;  %v2720_v23 = vsel %vm2168_vm8, %v2703_v45, 0  ;;  %v2564_v2 = vshrl.u32 %v2419_v35, 16 }
 0x186   : > { %4480 = vmatprep.mubr.bf16.mxu0 %v2553_v26  ;;  %v1664_v26 = vshll.u32 %v1515_v60, 16  ;;  %v2738_v39 = vshrl.u32 %v2720_v23, 16  ;;  %v2741_v63 = vshll.u32 %v2720_v23, 16  ;;  %v2751_v4 = vrot.slane %v2749_v43, 5 }
 0x187   : > { %v2566_v44 = vrot.slane %v2564_v2, 3  ;;  %v2346_v23 = vshrl.u32 %v2201_v51, 16  ;;  %v2722_v2 = vsel %vm8480_vm9, %v3140_v24, 0  ;;  %vm8591_vm9 = vcmp.ne.s16.totalorder %v6922_v12, 0 }
 0x188   : > { %4320 = vmatmul.mubr.bf16.gmra.mrb[68].mxu1 %v1650_v38  ;;  %v2746_v38 = vshrl.u32 %v2721_v37, 16  ;;  %v1666_v40 = vrot.slane %v1664_v26, 4  ;;  %v2740_v45 = vrot.slane %v2738_v39, 4  ;;  %v2743_v35 = vrot.slane %v2741_v63, 5  ;;  %v8577_v37 = vld [vmem:[#allocation9_spill] sm:$0xff] }
 0x189   : > { %4327 = vmatprep.mubr.bf16.mxu1 %v1765_v56  ;;  %v1663_v56 = vrot.slane %v1661_v57, 3  ;;  %v2570_v21 = vor.u32 %v2569_v46, %v2566_v44  ;;  %v2755_v57 = vshrl.u32 %v2722_v2, 16  ;;  %v2758_v26 = vshll.u32 %v2722_v2, 16  ;;  %v7671_v46 = vld [vmem:[#allocation2 + $0x20] sm:$0xff] }
 0x18a   : > { %v2748_v60 = vrot.slane %v2746_v38, 4  ;;  %v2348_v59 = vrot.slane %v2346_v23, 4  ;;  %v2939_v39 = vsel %vm1483_vm6, %v3140_v24, 0  ;;  %v3139_v38 = vld [vmem:[#allocation2 + $0x10] sm:$0xf0]  ;;  %v2938_v44 = vsel %vm1482_vm0, %v2921_v29, 0 }
 0x18b   : > { %v1667_v1 = vor.u32 %v1666_v40, %v1663_v56  ;;  %v2757_v56 = vrot.slane %v2755_v57, 4  ;;  %v2760_v40 = vrot.slane %v2758_v26, 5  ;;  %v3173_v29 = vrot.slane %v3139_v38, 4 }
 0x18c   : > { %v2752_v3 = vor.u32 %v2751_v4, %v2748_v60  ;;  %v2956_v60 = vshrl.u32 %v2938_v44, 16  ;;  %v2959_v4 = vshll.u32 %v2938_v44, 16  ;;  %v2940_v26 = vsel %vm1484_vm7, %v7671_v46, 0 }
 0x18d   : > { %4481 = vmatmul.mubr.bf16.gmra.mrb[68].mxu0 %v2335_v17  ;;  %v2349_v17 = vshll.u32 %v2201_v51, 16  ;;  %v1668_v63 = vsel %vm1516_vm4, %v7628_v32, %v1667_v1  ;;  %v2604_v51 = vld [vmem:[#allocation2 + $0x8] sm:$0xf0]  ;;  %v2723_v32 = vsel %vm2171_vm12, %v7671_v46, 0  ;;  %v2761_v2 = vor.u32 %v2760_v40, %v2757_v56 }
 0x18e   : > { %4488 = vmatprep.mubr.bf16.mxu0 %v2562_v58  ;;  %v2744_v58 = vor.u32 %v2743_v35, %v2740_v45  ;;  %v2967_v45 = vshll.u32 %v2939_v39, 16  ;;  %v2638_v23 = vrot.slane %v2604_v51, 4  ;;  %v2958_v50 = vrot.slane %v2956_v60, 3 }
 0x18f   : > { %v2351_v22 = vrot.slane %v2349_v17, 5  ;;  %v2639_v17 = vrot.slane %v7644_v27, 4  ;;  %v6318_v27 = vld [vmem:[%s8425_s3 + $0x208] sm:$0xff]   ;;  %v2973_v43 = vshrl.u32 %v2940_v26, 16  ;;  %v2976_v56 = vshll.u32 %v2940_v26, 16 }
 0x190   : > { %4328 = vmatmul.mubr.bf16.gmra.mrb[72].mxu1 %v1659_v18  ;;  %v2571_v18 = vsel %vm1516_vm4, %v7621_v15, %v2570_v21  ;;  %v3174_v15 = vrot.slane %v3140_v24, 4  ;;  %v2969_v1 = vrot.slane %v2967_v45, 4  ;;  %v3176_v45 = vrot.slane %v7671_v46, 4  ;;  %v7704_v46 = vld [vmem:[#allocation2 + $0x30] sm:$0xff] }
 0x191   : > { %4335 = vmatprep.mubr.bf16.mxu1 %v1767_v54  ;;  %v2964_v54 = vshrl.u32 %v2939_v39, 16  ;;  %v2352_v35 = vor.u32 %v2351_v22, %v2348_v59  ;;  %v2767_v59 = vshll.u32 %v2723_v32, 16  ;;  %v2961_v39 = vrot.slane %v2959_v4, 4 }
 0x192   : > { %v3175_v22 = vsel %vm630_vm5, %v3173_v29, %v3174_v15  ;;  %v2978_v29 = vrot.slane %v2976_v56, 4  ;;  %vm8581_vm0 = vcmp.ne.s16.totalorder %v6777_v62, 0  ;;  %vm8582_vm6 = vcmp.ne.s16.totalorder %v6892_v49, 0  ;;  %v6322_v56 = vld [vmem:[%s8425_s3 + $0x228] sm:$0xff]  }
 0x193   : > { %v2966_v21 = vrot.slane %v2964_v54, 3  ;;  %v2353_v57 = vsel %vm1338_vm2, %v7639_v28, %v2352_v35  ;;  %v2640_v28 = vsel %vm630_vm5, %v2638_v23, %v2639_v17  ;;  %v2769_v51 = vrot.slane %v2767_v59, 5 }
 0x194   : > { %v2962_v54 = vor.u32 %v2961_v39, %v2958_v50  ;;  %v3177_v23 = vsel %vm630_vm5, %v3174_v15, %v3176_v45  ;;  %vm8583_vm7 = vcmp.ne.s16.totalorder %v6822_v33, 0  ;;  %v3259_v31 = vsel %vm2172_vm14, %v7704_v46, 0 }
 0x195   : > { %4489 = vmatmul.mubr.bf16.gmra.mrb[72].mxu0 %v2344_v6  ;;  %v2753_v6 = vsel %vm1338_vm2, %v2744_v58, %v2752_v3  ;;  %v2764_v58 = vshrl.u32 %v2723_v32, 16  ;;  %v2970_v38 = vor.u32 %v2969_v1, %v2966_v21  ;;  %v2975_v32 = vrot.slane %v2973_v43, 3  ;;  %v6320_v1 = vld [vmem:[%s8425_s3 + $0x218] sm:$0xff]  }
 0x196   : > { %4496 = vmatprep.mubr.bf16.mxu0 %v2571_v18  ;;  %v7684_v18 = vld [vmem:[#allocation2 + $0x28] sm:$0xff]  ;;  %v2642_v21 = vsel %vm630_vm5, %v2639_v17, %v3174_v15  ;;  %v6321_v17 = vld [vmem:[%s8425_s3 + $0x220] sm:$0xff]  }
 0x197   : > { %v2766_v44 = vrot.slane %v2764_v58, 4  ;;  %v2724_v40 = vsel %vm2172_vm14, %v7684_v18, 0  ;;  %v2979_v26 = vor.u32 %v2978_v29, %v2975_v32  ;;  %v3178_v15 = vrot.slane %v7684_v18, 4 }
 0x198   : > { %4336 = vmatmul.mubr.bf16.gmra.mrb[76].mxu1 %v1668_v63  ;;  %v2762_v63 = vsel %vm1338_vm2, %v2752_v3, %v2761_v2  ;;  %v6319_v3 = vld [vmem:[%s8425_s3 + $0x210] sm:$0xff]   ;;  %v2773_v35 = vshrl.u32 %v2724_v40, 16  ;;  %v2776_v60 = vshll.u32 %v2724_v40, 16  ;;  %vm8597_vm14 = vcmp.ne.s16.totalorder %v6912_v9, 0 }
 0x199   : > { %4537 = vmatprep.mubr.bf16.mxu1 %v2753_v6  ;;  %v2971_v6 = vsel %vm1516_vm4, %v2962_v54, %v2970_v38  ;;  %v2770_v4 = vor.u32 %v2769_v51, %v2766_v44  ;;  %v3179_v43 = vsel %vm630_vm5, %v3176_v45, %v3178_v15  ;;  %v2942_v44 = vsel %vm8583_vm7, %v7704_v46, 0  ;;  %v7723_v51 = vld [vmem:[#allocation2 + $0x38] sm:$0xff] }
 0x19a   : > { %v2778_v58 = vrot.slane %v2776_v60, 5  ;;  %v2991_v45 = vshrl.u32 %v2942_v44, 16  ;;  %vm8586_vm7 = vcmp.ne.s16.totalorder %v6918_v42, 0 }
 0x19b   : > { %v2771_v62 = vsel %vm1338_vm2, %v2761_v2, %v2770_v4  ;;  %v2980_v2 = vsel %vm1516_vm4, %v2970_v38, %v2979_v26 }
 0x19d   : > { %4497 = vmatmul.mubr.bf16.gmra.mrb[76].mxu0 %v2353_v57  ;;  %v2775_v57 = vrot.slane %v2773_v35, 4  ;;  %v3180_v35 = vrot.slane %v7704_v46, 4 }
 0x19e   : > { %4698 = vmatprep.mubr.bf16.mxu0 %v3175_v22  ;;  %v2725_v22 = vsel %vm8582_vm6, %v7704_v46, 0  ;;  %vm8585_vm6 = vcmp.ne.s16.totalorder %v6861_v10, 0 }
 0x19f   : > { %v2779_v50 = vor.u32 %v2778_v58, %v2775_v57  ;;  %v2943_v60 = vsel %vm8585_vm6, %v7723_v51, 0  ;;  %v7740_v57 = vld [vmem:[#allocation2 + $0x40] sm:$0xff]  ;;  %v3181_v58 = vsel %vm630_vm5, %v3178_v15, %v3180_v35  ;;  %vm8588_vm6 = vcmp.ne.s16.totalorder %v6929_v14, 0 }
 0x1a0   : > { %4538 = vmatmul.mubr.bf16.vlgmr.msra.gmra.mrb[80].mxu1 %v2640_v28  ;;  %v2782_v28 = vshrl.u32 %v2725_v22, 16  ;;  %v3003_v10 = vshll.u32 %v2943_v60, 16 }
 0x1a1   : > { %6124 = vmatpush3.bf16.msra.mxu1 %v7384_v34  ;;  %4545 = vmatprep.mubr.bf16.mxu1 %v2762_v63  ;;  %v2941_v34 = vsel %vm8581_vm0, %v7684_v18, 0  ;;  %v2785_v63 = vshll.u32 %v2725_v22, 16  ;;  %v2780_v40 = vsel %vm1338_vm2, %v2770_v4, %v2779_v50  ;;  %vm8584_vm0 = vcmp.ne.s16.totalorder %v6912_v9, 0  ;;  %v6323_v4 = vld [vmem:[%s8425_s3 + $0x230] sm:$0xff]  }
 0x1a2   : > { %6125 = vmatprep.subr.bf16.mxu1 %v6318_v27  ;;  %v2982_v59 = vshrl.u32 %v2941_v34, 16  ;;  %v2985_v24 = vshll.u32 %v2941_v34, 16  ;;  %v2784_v54 = vrot.slane %v2782_v28, 4  ;;  %v2726_v33 = vsel %vm8584_vm0, %v7723_v51, 0  ;;  %v7755_v28 = vld [vmem:[#allocation2 + $0x50] sm:$0xff] }
 0x1a3   : > { %v2791_v32 = vshrl.u32 %v2726_v33, 16  ;;  %v2794_v29 = vshll.u32 %v2726_v33, 16  ;;  %vm8587_vm0 = vcmp.ne.s16.totalorder %v6901_v5, 0 }
 0x1a4   : > { %v2984_v39 = vrot.slane %v2982_v59, 3  ;;  %v3000_v59 = vshrl.u32 %v2943_v60, 16 }
 0x1a5   : > { %4699 = vmatmul.mubr.bf16.vlgmr.msra.gmra.mrb[80].mxu0 %v2971_v6  ;;  %6126 = vmatpush3.bf16.msra.mxu1 %v6318_v27  ;;  %v2987_v27 = vrot.slane %v2985_v24, 4  ;;  %v2994_v6 = vshll.u32 %v2942_v44, 16  ;;  %v7743_v24 = vld [vmem:[#allocation2 + $0x48] sm:$0xff]  ;;  %v2796_v22 = vrot.slane %v2794_v29, 5  ;;  %v3005_v44 = vrot.slane %v3003_v10, 4 }
 0x1a6   : > { %4706 = vmatprep.mubr.bf16.mxu0 %v3177_v23  ;;  %6127 = vmatprep.subr.bf16.mxu1 %v6319_v3 }
 0x1a7   : > { %v2988_v38 = vor.u32 %v2987_v27, %v2984_v39  ;;  %v2944_v27 = vsel %vm8587_vm0, %v7740_v57, 0  ;;  %vm8590_vm0 = vcmp.ne.s16.totalorder %v6976_v19, 0 }
 0x1a8   : > { %4546 = vmatmul.mubr.bf16.gmra.mrb[84].mxu1 %v2642_v21  ;;  %v2993_v21 = vrot.slane %v2991_v45, 3  ;;  %v2946_v45 = vsel %vm8591_vm9, %v7755_v28, 0  ;;  %v3012_v33 = vshll.u32 %v2944_v27, 16  ;;  %vm8592_vm9 = vcmp.ne.s16.totalorder %v8560_v47, 0 }
 0x1a9   : > { %4553 = vmatprep.mubr.bf16.mxu1 %v2771_v62  ;;  %6128 = vmatpush3.bf16.msra.mxu1 %v6319_v3  ;;  %v2787_v3 = vrot.slane %v2785_v63, 5  ;;  %v2989_v34 = vsel %vm1516_vm4, %v2979_v26, %v2988_v38  ;;  %v6324_v62 = vld [vmem:[%s8425_s3 + $0x238] sm:$0xff]   ;;  %v2793_v26 = vrot.slane %v2791_v32, 4  ;;  %v3002_v63 = vrot.slane %v3000_v59, 3 }
 0x1aa   : > { %6129 = vmatprep.subr.bf16.mxu1 %v6320_v1  ;;  %v3027_v10 = vshrl.u32 %v2946_v45, 16  ;;  %v3030_v12 = vshll.u32 %v2946_v45, 16 }
 0x1ab   : > { %v2797_v5 = vor.u32 %v2796_v22, %v2793_v26  ;;  %v3006_v32 = vor.u32 %v3005_v44, %v3002_v63  ;;  %v3186_v44 = vrot.slane %v7743_v24, 4 }
 0x1ad   : > { %4707 = vmatmul.mubr.bf16.gmra.mrb[84].mxu0 %v2980_v2  ;;  %6130 = vmatpush3.bf16.msra.mxu1 %v6320_v1  ;;  %v2996_v1 = vrot.slane %v2994_v6, 4  ;;  %v3182_v2 = vrot.slane %v7723_v51, 4 }
 0x1ae   : > { %4714 = vmatprep.mubr.bf16.mxu0 %v3179_v43  ;;  %6131 = vmatprep.subr.bf16.mxu1 %v6321_v17 }
 0x1af   : > { %v2997_v39 = vor.u32 %v2996_v1, %v2993_v21  ;;  %v7772_v21 = vld [vmem:[#allocation2 + $0x58] sm:$0xff] }
 0x1b0   : > { %4554 = vmatmul.mubr.bf16.gmra.mrb[88].mxu1 %v3177_v23  ;;  %v2788_v23 = vor.u32 %v2787_v3, %v2784_v54  ;;  %v3009_v54 = vshrl.u32 %v2944_v27, 16  ;;  %v2729_v3 = vsel %vm8590_vm0, %v7755_v28, 0  ;;  %v2730_v63 = vsel %vm8592_vm9, %v7772_v21, 0 }
 0x1b1   : > { %4561 = vmatprep.mubr.bf16.mxu1 %v2780_v40  ;;  %6132 = vmatpush3.bf16.msra.mxu1 %v6321_v17  ;;  %v2727_v17 = vsel %vm8586_vm7, %v7740_v57, 0  ;;  %vm8589_vm7 = vcmp.ne.s16.totalorder %v6915_v11, 0  ;;  %v2998_v6 = vsel %vm1516_vm4, %v2988_v38, %v2997_v39  ;;  %v3183_v11 = vsel %vm630_vm5, %v3180_v35, %v3182_v2 }
 0x1b2   : > { %6133 = vmatprep.subr.bf16.mxu1 %v6322_v56  ;;  %v2789_v15 = vsel %vm1338_vm2, %v2779_v50, %v2788_v23  ;;  %v2803_v40 = vshll.u32 %v2727_v17, 16  ;;  %v2945_v50 = vsel %vm8589_vm7, %v7743_v24, 0  ;;  %v2818_v1 = vshrl.u32 %v2729_v3, 16 }
 0x1b3   : > { %v3018_v29 = vshrl.u32 %v2945_v50, 16  ;;  %v2821_v59 = vshll.u32 %v2729_v3, 16  ;;  %v2798_v26 = vsel %vm1338_vm2, %v2788_v23, %v2797_v5  ;;  %v2830_v45 = vshll.u32 %v2730_v63, 16 }
 0x1b4   : > { %v2805_v22 = vrot.slane %v2803_v40, 5  ;;  %v2820_v3 = vrot.slane %v2818_v1, 4  ;;  %v3032_v40 = vrot.slane %v3030_v12, 4  ;;  %v3190_v1 = vrot.slane %v7772_v21, 4 }
 0x1b5   : > { %4715 = vmatmul.mubr.bf16.gmra.mrb[88].mxu0 %v2989_v34  ;;  %6134 = vmatpush3.bf16.msra.mxu1 %v6322_v56  ;;  %v2728_v56 = vsel %vm8588_vm6, %v7743_v24, 0  ;;  %v3021_v34 = vshll.u32 %v2945_v50, 16  ;;  %v2823_v23 = vrot.slane %v2821_v59, 5  ;;  %vm8593_vm6 = vcmp.ne.s16.totalorder %v8559_v0, 0 }
 0x1b6   : > { %4722 = vmatprep.mubr.bf16.mxu0 %v3181_v58  ;;  %6135 = vmatprep.subr.bf16.mxu1 %v6323_v4  ;;  %v2809_v60 = vshrl.u32 %v2728_v56, 16  ;;  %vm8594_vm7 = vcmp.ne.s16.totalorder %v8563_v53, 0  ;;  %vm8595_vm0 = vcmp.ne.s16.totalorder %v6985_v55, 0  ;;  %vm8598_vm9 = vcmp.ne.s16.totalorder %v6918_v42, 0 }
 0x1b7   : > { %v3023_v50 = vrot.slane %v3021_v34, 4  ;;  %v2824_v59 = vor.u32 %v2823_v23, %v2820_v3 }
 0x1b8   : > { %4562 = vmatmul.mubr.bf16.gmra.mrb[92].mxu1 %v3179_v43  ;;  %v2800_v43 = vshrl.u32 %v2727_v17, 16  ;;  %v3011_v17 = vrot.slane %v3009_v54, 3  ;;  %v2811_v27 = vrot.slane %v2809_v60, 4 }
 0x1b9   : > { %4569 = vmatprep.mubr.bf16.mxu1 %v2789_v15  ;;  %6136 = vmatpush3.bf16.msra.mxu1 %v6323_v4  ;;  %v2812_v4 = vshll.u32 %v2728_v56, 16  ;;  %v3014_v15 = vrot.slane %v3012_v33, 4  ;;  %v3020_v56 = vrot.slane %v3018_v29, 3  ;;  %v3007_v33 = vsel %vm1516_vm4, %v2997_v39, %v3006_v32 }
 0x1ba   : > { %6137 = vmatprep.subr.bf16.mxu1 %v6324_v62  ;;  %v2802_v38 = vrot.slane %v2800_v43, 4  ;;  %v3029_v43 = vrot.slane %v3027_v10, 3 }
 0x1bb   : > { %v2814_v35 = vrot.slane %v2812_v4, 5  ;;  %v3015_v60 = vor.u32 %v3014_v15, %v3011_v17  ;;  %v3024_v34 = vor.u32 %v3023_v50, %v3020_v56  ;;  %v2832_v17 = vrot.slane %v2830_v45, 5 }
 0x1bc   : > { %v2806_v54 = vor.u32 %v2805_v22, %v2802_v38  ;;  %v7787_v10 = vor.u32 %v3032_v40, %v3029_v43  ;;  %v7789_v38 = vld [vmem:[#allocation2 + $0x60] sm:$0xff] }
 0x1bd   : > { %4723 = vmatmul.mubr.bf16.gmra.mrb[92].mxu0 %v2998_v6  ;;  %6138 = vmatpush3.bf16.msra.mxu1 %v6324_v62  ;;  %v3184_v62 = vrot.slane %v7740_v57, 4  ;;  %v2947_v6 = vsel %vm8593_vm6, %v7772_v21, 0  ;;  %v2815_v4 = vor.u32 %v2814_v35, %v2811_v27  ;;  %v7828_v23 = vsel %vm8595_vm0, %v7789_v38, 0 }
 0x1be   : > { %4730 = vmatprep.mubr.bf16.mxu0 %v3183_v11  ;;  %v3036_v12 = vshrl.u32 %v2947_v6, 16  ;;  %v2807_v0 = vsel %vm1338_vm2, %v2797_v5, %v2806_v54  ;;  %v3039_v35 = vshll.u32 %v2947_v6, 16  ;;  %v3045_v41 = vshrl.u32 %v7828_v23, 16 }
 0x1bf   : > { %v3185_v29 = vsel %vm630_vm5, %v3182_v2, %v3184_v62  ;;  %v7793_v39 = vsel %vm630_vm5, %v3184_v62, %v3186_v44  ;;  %v3016_v2 = vsel %vm1516_vm4, %v3006_v32, %v3015_v60  ;;  %v2816_v15 = vsel %vm1338_vm2, %v2806_v54, %v2815_v4 }
 0x1c0   : > { %4570 = vmatmul.mubr.bf16.gmra.mrb[96].mxu1 %v3181_v58  ;;  %v2827_v58 = vshrl.u32 %v2730_v63, 16  ;;  %v3025_v63 = vsel %vm1516_vm4, %v3015_v60, %v3024_v34  ;;  %v3258_v32 = vsel %vm2171_vm12, %v7684_v18, 0  ;;  %v7815_v62 = vsel %vm1338_vm2, %v2815_v4, %v2824_v59 }
 0x1c1   : > { %4577 = vmatprep.mubr.bf16.mxu1 %v2798_v26  ;;  %v3188_v26 = vrot.slane %v7755_v28, 4  ;;  %v7821_v56 = vrot.slane %v3036_v12, 3  ;;  %v3299_v50 = vshrl.u32 %v3258_v32, 16  ;;  %v3302_v43 = vshll.u32 %v3258_v32, 16 }
 0x1c2   : > { %v2829_v22 = vrot.slane %v2827_v58, 4  ;;  %v7833_v18 = vrot.slane %v3039_v35, 4  ;;  %v3308_v58 = vshrl.u32 %v3259_v31, 16  ;;  %vm8596_vm12 = vcmp.ne.s16.totalorder %v6892_v49, 0 }
 0x1c3   : > { %v7798_v27 = vsel %vm630_vm5, %v3186_v44, %v3188_v26  ;;  %v7804_v5 = vsel %vm630_vm5, %v3188_v26, %v3190_v1  ;;  %v7819_v44 = vsel %vm1516_vm4, %v3024_v34, %v7787_v10  ;;  %v3301_v54 = vrot.slane %v3299_v50, 4 }
 0x1c4   : > { %v7823_v3 = vor.u32 %v2832_v17, %v2829_v22  ;;  %v3304_v6 = vrot.slane %v3302_v43, 5  ;;  %v3260_v55 = vsel %vm8596_vm12, %v7723_v51, 0  ;;  %v3310_v46 = vrot.slane %v3308_v58, 4 }
 0x1c5   : > { %4731 = vmatmul.mubr.bf16.gmra.mrb[96].mxu0 %v3007_v33  ;;  %v3311_v33 = vshll.u32 %v3259_v31, 16  ;;  %v3317_v60 = vshrl.u32 %v3260_v55, 16  ;;  %v3320_v4 = vshll.u32 %v3260_v55, 16  ;;  %v3048_v26 = vshll.u32 %v7828_v23, 16  ;;  %v7858_v31 = vld [vmem:[#allocation2 + $0x68] sm:$0xff] }
 0x1c6   : > { %4738 = vmatprep.mubr.bf16.mxu0 %v3185_v29  ;;  %v7843_v34 = vor.u32 %v3304_v6, %v3301_v54  ;;  %v3262_v32 = vsel %vm8598_vm9, %v7743_v24, 0  ;;  %vm8599_vm6 = vcmp.ne.s16.totalorder %v6929_v14, 0  ;;  %vm8601_vm0 = vcmp.ne.s16.totalorder %v8560_v47, 0 }
 0x1c7   : > { %v3313_v12 = vrot.slane %v3311_v33, 5  ;;  %v3319_v22 = vrot.slane %v3317_v60, 4  ;;  %v3322_v49 = vrot.slane %v3320_v4, 5  ;;  %v3263_v9 = vsel %vm8599_vm6, %v7755_v28, 0  ;;  %v7871_v60 = vld [vmem:[#allocation2 + $0x70] sm:$0xff] }
 0x1c8   : > { %4578 = vmatmul.mubr.bf16.gmra.mrb[100].mxu1 %v3183_v11  ;;  %v7809_v11 = vsel %vm8594_vm7, %v7789_v38, 0  ;;  %v3335_v43 = vshrl.u32 %v3262_v32, 16  ;;  %v3344_v54 = vshrl.u32 %v3263_v9, 16  ;;  %v3347_v58 = vshll.u32 %v3263_v9, 16 }
 0x1c9   : > { %4585 = vmatprep.mubr.bf16.mxu1 %v2807_v0  ;;  %v2836_v40 = vshrl.u32 %v7809_v11, 16  ;;  %v2839_v45 = vshll.u32 %v7809_v11, 16  ;;  %v3261_v0 = vsel %vm8597_vm14, %v7740_v57, 0  ;;  %v3314_v35 = vor.u32 %v3313_v12, %v3310_v46 }
 0x1ca   : > { %v3326_v51 = vshrl.u32 %v3261_v0, 16  ;;  %v3329_v17 = vshll.u32 %v3261_v0, 16  ;;  %v3323_v57 = vor.u32 %v3322_v49, %v3319_v22  ;;  %v3337_v6 = vrot.slane %v3335_v43, 4 }
 0x1cb   : > { %vm8600_vm7 = vcmp.ne.s16.totalorder %v6976_v19, 0  ;;  %v3346_v33 = vrot.slane %v3344_v54, 4  ;;  %v3349_v55 = vrot.slane %v3347_v58, 5  ;;  %v3265_v0 = vsel %vm8601_vm0, %v7789_v38, 0 }
 0x1cc   : > { %v3331_v50 = vrot.slane %v3329_v17, 5  ;;  %v7865_v42 = vsel %vm1338_vm2, %v3314_v35, %v3323_v57  ;;  %v3264_v14 = vsel %vm8600_vm7, %v7772_v21, 0  ;;  %vm8602_vm12 = vcmp.ne.s16.totalorder %v8563_v53, 0  ;;  %v7883_v17 = vld [vmem:[#allocation2 + $0x78] sm:$0xff] }
 0x1cd   : > { %4739 = vmatmul.mubr.bf16.gmra.mrb[100].mxu0 %v3016_v2  ;;  %v7850_v2 = vsel %vm1338_vm2, %v2824_v59, %v7823_v3  ;;  %v3338_v59 = vshll.u32 %v3262_v32, 16  ;;  %v3353_v46 = vshrl.u32 %v3264_v14, 16  ;;  %v3356_v12 = vshll.u32 %v3264_v14, 16 }
 0x1ce   : > { %4746 = vmatprep.mubr.bf16.mxu0 %v7793_v39  ;;  %v3266_v19 = vsel %vm8602_vm12, %v7858_v31, 0  ;;  %v3350_v22 = vor.u32 %v3349_v55, %v3346_v33  ;;  %v3365_v9 = vshll.u32 %v3265_v0, 16  ;;  %v3050_v11 = vrot.slane %v3048_v26, 4 }
 0x1cf   : > { %v3340_v28 = vrot.slane %v3338_v59, 5  ;;  %v3355_v49 = vrot.slane %v3353_v46, 4  ;;  %v3358_v32 = vrot.slane %v3356_v12, 5  ;;  %v2733_v21 = vsel %vm2181_vm1, %v7871_v60, 0 }
 0x1d0   : > { %4586 = vmatmul.mubr.bf16.gmra.mrb[104].mxu1 %v3185_v29  ;;  %v3328_v29 = vrot.slane %v3326_v51, 4  ;;  %v3362_v51 = vshrl.u32 %v3265_v0, 16  ;;  %v3367_v59 = vrot.slane %v3365_v9, 5  ;;  %v3042_v9 = vor.u32 %v7833_v18, %v7821_v56 }
 0x1d1   : > { %4593 = vmatprep.mubr.bf16.mxu1 %v2816_v15  ;;  %v7862_v15 = vsel %vm1338_vm2, %v7843_v34, %v3314_v35  ;;  %v7885_v35 = vld [vmem:[#allocation2 + $0x80] sm:$0xff]  ;;  %v3359_v43 = vor.u32 %v3358_v32, %v3355_v49  ;;  %v3192_v56 = vrot.slane %v7789_v38, 4  ;;  %vm8604_vm14 = vcmp.ne.s16.totalorder %v8564_v30, 0 }
 0x1d2   : > { %v3332_v24 = vor.u32 %v3331_v50, %v3328_v29  ;;  %v3374_v29 = vshll.u32 %v3266_v19, 16  ;;  %v3364_v50 = vrot.slane %v3362_v51, 4  ;;  %v3043_v38 = vsel %vm1516_vm4, %v7787_v10, %v3042_v9 }
 0x1d3   : > { %v3193_v23 = vsel %vm630_vm5, %v3190_v1, %v3192_v56  ;;  %v2734_v48 = vsel %vm2182_vm15, %v7883_v17, 0  ;;  %vm8607_vm9 = vcmp.ne.s16.totalorder %v8568_v61, 0  ;;  %vm8608_vm6 = vcmp.ne.s16.totalorder %v7604_v8, 0 }
 0x1d4   : > { %v7874_v4 = vsel %vm1338_vm2, %v3323_v57, %v3332_v24  ;;  %v3371_v57 = vshrl.u32 %v3266_v19, 16  ;;  %v3376_v58 = vrot.slane %v3374_v29, 5  ;;  %v3368_v33 = vor.u32 %v3367_v59, %v3364_v50 }
 0x1d5   : > { %4747 = vmatmul.mubr.bf16.gmra.mrb[104].mxu0 %v3025_v63  ;;  %v3341_v63 = vor.u32 %v3340_v28, %v3337_v6  ;;  %v7904_v28 = vsel %vm1338_vm2, %v3350_v22, %v3359_v43  ;;  %v2838_v50 = vrot.slane %v2836_v40, 4 }
 0x1d6   : > { %4754 = vmatprep.mubr.bf16.mxu0 %v7798_v27  ;;  %v3373_v54 = vrot.slane %v3371_v57, 4  ;;  %v7909_v49 = vsel %vm1338_vm2, %v3359_v43, %v3368_v33  ;;  %v2732_v43 = vsel %vm2180_vm3, %v7858_v31, 0 }
 0x1d7   : > { %v7889_v47 = vsel %vm1338_vm2, %v3332_v24, %v3341_v63  ;;  %v7892_v53 = vsel %vm1338_vm2, %v3341_v63, %v3350_v22  ;;  %v3269_v24 = vsel %vm2182_vm15, %v7885_v35, 0  ;;  %v2848_v52 = vshll.u32 %v2732_v43, 16 }
 0x1d8   : > { %4594 = vmatmul.mubr.bf16.gmra.mrb[108].mxu1 %v7793_v39  ;;  %v3267_v39 = vsel %vm2180_vm3, %v7871_v60, 0  ;;  %v3377_v55 = vor.u32 %v3376_v58, %v3373_v54  ;;  %v3398_v63 = vshrl.u32 %v3269_v24, 16  ;;  %v3401_v22 = vshll.u32 %v3269_v24, 16 }
 0x1d9   : > { %4601 = vmatprep.mubr.bf16.mxu1 %v7815_v62  ;;  %v3380_v6 = vshrl.u32 %v3267_v39, 16  ;;  %v3383_v14 = vshll.u32 %v3267_v39, 16  ;;  %v3268_v62 = vsel %vm2181_vm1, %v7883_v17, 0  ;;  %v2841_v39 = vrot.slane %v2839_v45, 5 }
 0x1da   : > { %v3389_v46 = vshrl.u32 %v3268_v62, 16  ;;  %v3392_v19 = vshll.u32 %v3268_v62, 16  ;;  %v7912_v51 = vsel %vm1338_vm2, %v3368_v33, %v3377_v55  ;;  %v3403_v59 = vrot.slane %v3401_v22, 5 }
 0x1db   : > { %v3382_v12 = vrot.slane %v3380_v6, 4  ;;  %v3385_v0 = vrot.slane %v3383_v14, 5  ;;  %v2845_v45 = vshrl.u32 %v2732_v43, 16  ;;  %vm8603_vm3 = vcmp.ne.s16.totalorder %v8561_v16, 0 }
 0x1dc   : > { %v3391_v32 = vrot.slane %v3389_v46, 4  ;;  %v3394_v29 = vrot.slane %v3392_v19, 5  ;;  %v2949_v6 = vsel %vm8603_vm3, %v7858_v31, 0  ;;  %v2850_v14 = vrot.slane %v2848_v52, 5 }
 0x1dd   : > { %4755 = vmatmul.mubr.bf16.gmra.mrb[108].mxu0 %v7819_v44  ;;  %v3386_v57 = vor.u32 %v3385_v0, %v3382_v12  ;;  %v3400_v44 = vrot.slane %v3398_v63, 4  ;;  %v2847_v26 = vrot.slane %v2845_v45, 4  ;;  %v3054_v62 = vshrl.u32 %v2949_v6, 16 }
 0x1de   : > { %4762 = vmatprep.mubr.bf16.mxu0 %v7804_v5  ;;  %v3395_v54 = vor.u32 %v3394_v29, %v3391_v32  ;;  %v3057_v24 = vshll.u32 %v2949_v6, 16  ;;  %v3194_v33 = vrot.slane %v7858_v31, 4  ;;  %v2854_v0 = vshrl.u32 %v2733_v21, 16 }
 0x1df   : > { %v7927_v18 = vsel %vm1338_vm2, %v3377_v55, %v3386_v57  ;;  %v7931_v40 = vor.u32 %v3403_v59, %v3400_v44  ;;  %v2851_v55 = vor.u32 %v2850_v14, %v2847_v26  ;;  %v3056_v1 = vrot.slane %v3054_v62, 3 }
 0x1e0   : > { %4602 = vmatmul.mubr.bf16.gmra.mrb[112].mxu1 %v7798_v27  ;;  %v3047_v27 = vrot.slane %v3045_v41, 3  ;;  %v7936_v58 = vsel %vm1338_vm2, %v3386_v57, %v3395_v54  ;;  %v3059_v46 = vrot.slane %v3057_v24, 4  ;;  %v2857_v19 = vshll.u32 %v2733_v21, 16 }
 0x1e1   : > { %4609 = vmatprep.mubr.bf16.mxu1 %v7850_v2  ;;  %v2842_v2 = vor.u32 %v2841_v39, %v2838_v50  ;;  %v7945_v41 = vsel %vm1338_vm2, %v3395_v54, %v7931_v40  ;;  %v2856_v32 = vrot.slane %v2854_v0, 4  ;;  %v3196_v29 = vrot.slane %v7871_v60, 4 }
 0x1e2   : > { %v3051_v10 = vor.u32 %v3050_v11, %v3047_v27  ;;  %v3060_v63 = vor.u32 %v3059_v46, %v3056_v1  ;;  %v2859_v22 = vrot.slane %v2857_v19, 5  ;;  %vm8605_vm1 = vcmp.ne.s16.totalorder %v8566_v25, 0 }
 0x1e3   : > { %v2843_v16 = vsel %vm1338_vm2, %v7823_v3, %v2842_v2  ;;  %v2950_v3 = vsel %vm8604_vm14, %v7871_v60, 0  ;;  %v2852_v31 = vsel %vm1338_vm2, %v2842_v2, %v2851_v55  ;;  %v2951_v30 = vsel %vm8605_vm1, %v7883_v17, 0  ;;  %v7975_v60 = vld [vmem:[%s8426_s4] ss:$0 sm:$0xff] }
 0x1e4   : > { %v3052_v12 = vsel %vm1516_vm4, %v3042_v9, %v3051_v10  ;;  %v3063_v9 = vshrl.u32 %v2950_v3, 16  ;;  %v3066_v57 = vshll.u32 %v2950_v3, 16  ;;  %v2863_v50 = vshrl.u32 %v2734_v48, 16 }
 0x1e5   : > { %4763 = vmatmul.mubr.bf16.gmra.mrb[112].mxu0 %v3043_v38  ;;  %v2866_v39 = vshll.u32 %v2734_v48, 16  ;;  %v3061_v43 = vsel %vm1516_vm4, %v3051_v10, %v3060_v63  ;;  %v2860_v7 = vor.u32 %v2859_v22, %v2856_v32  ;;  %v3197_v27 = vsel %vm630_vm5, %v3194_v33, %v3196_v29 }
 0x1e6   : > { %4770 = vmatprep.mubr.bf16.mxu0 %v3193_v23  ;;  %v3068_v54 = vrot.slane %v3066_v57, 4  ;;  %v3072_v45 = vshrl.u32 %v2951_v30, 16  ;;  %v3075_v38 = vshll.u32 %v2951_v30, 16  ;;  %v2865_v6 = vrot.slane %v2863_v50, 4 }
 0x1e7   : > { %vm8606_vm15 = vcmp.ne.s16.totalorder %v7626_v13, 0  ;;  %v2861_v24 = vsel %vm1338_vm2, %v2851_v55, %v2860_v7 }
 0x1e8   : > { %4610 = vmatmul.mubr.bf16.gmra.mrb[116].mxu1 %v7804_v5  ;;  %v3195_v5 = vsel %vm630_vm5, %v3192_v56, %v3194_v33  ;;  %v3065_v56 = vrot.slane %v3063_v9, 3  ;;  %v2735_v26 = vsel %vm8606_vm15, %v7885_v35, 0  ;;  %v3198_v33 = vrot.slane %v7883_v17, 4 }
 0x1e9   : > { %4617 = vmatprep.mubr.bf16.mxu1 %v2843_v16  ;;  %v3074_v21 = vrot.slane %v3072_v45, 3  ;;  %v3077_v0 = vrot.slane %v3075_v38, 4  ;;  %v2872_v19 = vshrl.u32 %v2735_v26, 16  ;;  %v2875_v32 = vshll.u32 %v2735_v26, 16  ;;  %v6325_v38 = vld [vmem:[%s8427_s5] sm:$0xff]  }
 0x1ea   : > { %v3069_v16 = vor.u32 %v3068_v54, %v3065_v56  ;;  %v2952_v17 = vsel %vm8607_vm9, %v7885_v35, 0  ;;  %v3199_v57 = vsel %vm630_vm5, %v3196_v29, %v3198_v33  ;;  %v2719_v56 = vld [vmem:[#allocation2 + $0x88] sm:$0x1f]  ;;  %6171 = vmatprep.subr.bf16.mxu0 %v6325_v38 }
 0x1eb   : > { %6172 = vmatpush3.bf16.msra.mxu0 %v6325_v38 }
 0x1ec   : > { %v3070_v55 = vsel %vm1516_vm4, %v3060_v63, %v3069_v16  ;;  %v2877_v63 = vrot.slane %v2875_v32, 5 }
 0x1ed   : > { %4771 = vmatmul.mubr.bf16.gmra.mrb[116].mxu0 %v3052_v12 }
 0x1ee   : > { %4778 = vmatprep.mubr.bf16.mxu0 %v3195_v5 }
 0x1f0   : > { %4618 = vmatmul.mubr.bf16.gmra.mrb[120].mxu1 %v3193_v23  ;;  %v2868_v23 = vrot.slane %v2866_v39, 5 }
 0x1f1   : > { %4625 = vmatprep.mubr.bf16.mxu1 %v2852_v31 }
 0x1f2   : > { %v2869_v48 = vor.u32 %v2868_v23, %v2865_v6  ;;  %v8003_v6 = vrot.slane %v7885_v35, 4  ;;  %v2736_v23 = vsel %vm2184_vm13, %v2719_v56, 0 }
 0x1f3   : > { %v5595_v44 = vpop.f32.mrb[16].mxu1 }
 0x1f4   : > { %v5596_v59 = vpop.f32.mrb[17].mxu1  ;;  %v2870_v29 = vsel %vm1338_vm2, %v2860_v7, %v2869_v48 }
 0x1f5   : > { %4779 = vmatmul.mubr.bf16.gmra.mrb[120].mxu0 %v3061_v43  ;;  %v5597_v11 = vadd.f32 %v5596_v59, %v5595_v44  ;;  %v5598_v25 = vpop.f32.mrb[18].mxu1  ;;  %v7993_v43 = vor.u32 %v3077_v0, %v3074_v21  ;;  %v2874_v59 = vrot.slane %v2872_v19, 4  ;;  %v2881_v19 = vshrl.u32 %v2736_v23, 16 }
 0x1f6   : > { %4786 = vmatprep.mubr.bf16.mxu0 %v3197_v27  ;;  %v5599_v52 = vpop.f32.mrb[19].mxu1 }
 0x1f7   : > { %v5600_v2 = vadd.f32 %v5599_v52, %v5598_v25  ;;  %v4218_v14 = vadd.f32 %v5597_v11, %v7975_v60  ;;  %v3081_v11 = vshrl.u32 %v2952_v17, 16  ;;  %v3084_v25 = vshll.u32 %v2952_v17, 16  ;;  %v7997_v52 = vld [vmem:[#allocation2 + $0x88] sm:$0xff] }
 0x1f8   : > { %v5707_v62 = vpop.f32.mrb[16].mxu0  ;;  %4626 = vmatmul.mubr.bf16.gmra.mrb[124].mxu1 %v3195_v5  ;;  %v3079_v7 = vsel %vm1516_vm4, %v3069_v16, %v7993_v43  ;;  %v2953_v35 = vsel %vm8608_vm6, %v7997_v52, 0  ;;  %v3201_v16 = vsel %vm630_vm5, %v3198_v33, %v8003_v6  ;;  %v2883_v33 = vrot.slane %v2881_v19, 4 }
 0x1f9   : > { %v5708_v10 = vpop.f32.mrb[17].mxu0  ;;  %4633 = vmatprep.mubr.bf16.mxu1 %v2861_v24  ;;  %v4221_v1 = vadd.f32 %v5600_v2, %v7975_v60  ;;  %v3083_v21 = vrot.slane %v3081_v11, 3  ;;  %v3090_v8 = vshrl.u32 %v2953_v35, 16  ;;  %v3093_v17 = vshll.u32 %v2953_v35, 16 }
 0x1fa   : > { %v5709_v46 = vadd.f32 %v5708_v10, %v5707_v62  ;;  %v5710_v12 = vpop.f32.mrb[18].mxu0  ;;  %v8010_v10 = vor.u32 %v2877_v63, %v2874_v59  ;;  %v3238_v63 = vld [vmem:[#allocation2 + $0x10] sm:$0xf0] }
 0x1fb   : > { %v5711_v3 = vpop.f32.mrb[19].mxu0  ;;  %v5601_v31 = vpop.f32.mrb[20].mxu1  ;;  %v3092_v38 = vrot.slane %v3090_v8, 3 }
 0x1fc   : > { %v7984_v22 = vadd.f32 %v5709_v46, %v4218_v14  ;;  %v5712_v5 = vadd.f32 %v5711_v3, %v5710_v12  ;;  %v5602_v9 = vpop.f32.mrb[21].mxu1  ;;  %v2884_v3 = vshll.u32 %v2736_v23, 16  ;;  %v2937_v23 = vld [vmem:[#allocation2 + $0x90] sm:$0xf] }
 0x1fd   : > { %4787 = vmatmul.mubr.bf16.gmra.mrb[124].mxu0 %v3070_v55  ;;  %v5603_v30 = vadd.f32 %v5602_v9, %v5601_v31  ;;  %v5604_v44 = vpop.f32.mrb[22].mxu1 }
 0x1fe   : > { %v7991_v50 = vadd.f32 %v5712_v5, %v4221_v1  ;;  %4794 = vmatprep.mubr.bf16.mxu0 %v3199_v57  ;;  %v5605_v39 = vpop.f32.mrb[23].mxu1  ;;  %v3086_v1 = vrot.slane %v3084_v25, 4  ;;  %v3239_v5 = vld [vmem:[#allocation2 + $0x18] sm:$0xff] }
 0x1ff   : > { %v5606_v54 = vadd.f32 %v5605_v39, %v5604_v44  ;;  %v4226_v61 = vadd.f32 %v5603_v30, %v7975_v60  ;;  %v2879_v44 = vsel %vm1338_vm2, %v2869_v48, %v8010_v10  ;;  %v3256_v11 = vsel %vm2169_vm10, %v3239_v5, 0 }
 0x200   : > { %v5713_v45 = vpop.f32.mrb[20].mxu0  ;;  %4634 = vmatmul.mubr.bf16.gmra.mrb[128].mxu1 %v3197_v27  ;;  %v8023_v39 = vor.u32 %v3086_v1, %v3083_v21  ;;  %v2954_v5 = vsel %vm1498_vm11, %v2937_v23, 0 }
 0x201   : > { %v5714_v2 = vpop.f32.mrb[21].mxu0  ;;  %4641 = vmatprep.mubr.bf16.mxu1 %v2870_v29  ;;  %v4229_v26 = vadd.f32 %v5606_v54, %v7975_v60  ;;  %v2886_v54 = vrot.slane %v2884_v3, 5 }
 0x202   : > { %v5715_v14 = vadd.f32 %v5714_v2, %v5713_v45  ;;  %v5716_v27 = vpop.f32.mrb[22].mxu0  ;;  %v3095_v2 = vrot.slane %v3093_v17, 4  ;;  %v3088_v21 = vsel %vm1516_vm4, %v7993_v43, %v8023_v39  ;;  %v2620_v17 = vld [vmem:[#allocation2 + $0x88] sm:$0xf] }
 0x203   : > { %v5717_v62 = vpop.f32.mrb[23].mxu0  ;;  %v5607_v24 = vpop.f32.mrb[24].mxu1  ;;  %v2887_v35 = vor.u32 %v2886_v54, %v2883_v33  ;;  %v2669_v23 = vrot.slane %v2620_v17, 4 }
 0x204   : > { %v8015_v46 = vadd.f32 %v5715_v14, %v4226_v61  ;;  %v5718_v12 = vadd.f32 %v5717_v62, %v5716_v27  ;;  %v5608_v0 = vpop.f32.mrb[25].mxu1  ;;  %v3202_v61 = vrot.slane %v7997_v52, 4  ;;  %v3255_v27 = vsel %vm2168_vm8, %v3238_v63, 0 }
 0x205   : > { %4795 = vmatmul.mubr.bf16.gmra.mrb[128].mxu0 %v3079_v7  ;;  %v5609_v31 = vadd.f32 %v5608_v0, %v5607_v24  ;;  %v5610_v32 = vpop.f32.mrb[26].mxu1  ;;  %v3281_v7 = vshrl.u32 %v3256_v11, 16  ;;  %v3284_v62 = vshll.u32 %v3256_v11, 16  ;;  %v8045_v43 = vor.u32 %v3095_v2, %v3092_v38 }
 0x206   : > { %v8019_v55 = vadd.f32 %v5718_v12, %v4229_v26  ;;  %4802 = vmatprep.mubr.bf16.mxu0 %v3201_v16  ;;  %v5611_v9 = vpop.f32.mrb[27].mxu1  ;;  %v3240_v12 = vld [vmem:[#allocation2 + $0x20] sm:$0xff]  ;;  %v3203_v0 = vsel %vm630_vm5, %v8003_v6, %v3202_v61  ;;  %vm8611_vm8 = vcmp.ne.s16.totalorder %v8577_v37, 0 }
 0x207   : > { %v5612_v30 = vadd.f32 %v5611_v9, %v5610_v32  ;;  %v4234_v59 = vadd.f32 %v5609_v31, %v7975_v60  ;;  %v3155_v31 = vld [vmem:[#allocation2 + $0x90] sm:$0xf]  ;;  %v3286_v33 = vrot.slane %v3284_v62, 5  ;;  %v3257_v54 = vsel %vm8611_vm8, %v3240_v12, 0 }
 0x208   : > { %v5719_v56 = vpop.f32.mrb[24].mxu0  ;;  %4642 = vmatmul.mubr.bf16.gmra.mrb[132].mxu1 %v3199_v57  ;;  %v3204_v2 = vrot.slane %v3155_v31, 4 }
 0x209   : > { %v5720_v25 = vpop.f32.mrb[25].mxu0  ;;  %4649 = vmatprep.mubr.bf16.mxu1 %v2879_v44  ;;  %v4237_v45 = vadd.f32 %v5612_v30, %v7975_v60  ;;  %v3273_v30 = vshrl.u32 %v3255_v27, 16  ;;  %v3276_v44 = vshll.u32 %v3255_v27, 16 }
 0x20a   : > { %v5721_v29 = vadd.f32 %v5720_v25, %v5719_v56  ;;  %v5722_v48 = vpop.f32.mrb[26].mxu0  ;;  %v3283_v56 = vrot.slane %v3281_v7, 4  ;;  %v2888_v25 = vsel %vm1338_vm2, %v8010_v10, %v2887_v35  ;;  %v3097_v10 = vsel %vm1516_vm4, %v8023_v39, %v8045_v43 }
 0x20b   : > { %v5723_v26 = vpop.f32.mrb[27].mxu0  ;;  %v5613_v14 = vpop.f32.mrb[28].mxu1  ;;  %v3275_v57 = vrot.slane %v3273_v30, 4  ;;  %v3278_v27 = vrot.slane %v3276_v44, 5  ;;  %v2670_v30 = vsel %vm630_vm5, %v8003_v6, %v2669_v23 }
 0x20c   : > { %v8032_v20 = vadd.f32 %v5721_v29, %v4234_v59  ;;  %v5724_v24 = vadd.f32 %v5723_v26, %v5722_v48  ;;  %v5614_v1 = vpop.f32.mrb[29].mxu1  ;;  %v3102_v29 = vshll.u32 %v2954_v5, 16  ;;  %v6326_v48 = vld [vmem:[%s8427_s5 + $0x8] sm:$0xff]   ;;  %v3287_v62 = vor.u32 %v3286_v33, %v3283_v56 }
 0x20d   : > { %4803 = vmatmul.mubr.bf16.gmra.mrb[132].mxu0 %v3088_v21  ;;  %v5615_v19 = vadd.f32 %v5614_v1, %v5613_v14  ;;  %v5616_v3 = vpop.f32.mrb[30].mxu1  ;;  %6173 = vmatprep.subr.bf16.mxu0 %v6326_v48  ;;  %v3293_v21 = vshll.u32 %v3257_v54, 16 }
 0x20e   : > { %v8043_v9 = vadd.f32 %v5724_v24, %v4237_v45  ;;  %4810 = vmatprep.mubr.bf16.mxu0 %v3203_v0  ;;  %v5617_v8 = vpop.f32.mrb[31].mxu1  ;;  %v3099_v45 = vshrl.u32 %v2954_v5, 16  ;;  %v3290_v24 = vshrl.u32 %v3257_v54, 16  ;;  %6174 = vmatpush3.bf16.msra.mxu0 %v6326_v48 }
 0x20f   : > { %v5618_v59 = vadd.f32 %v5617_v8, %v5616_v3  ;;  %v4242_v63 = vadd.f32 %v5615_v19, %v7975_v60  ;;  %v3104_v19 = vrot.slane %v3102_v29, 4  ;;  %v3205_v3 = vsel %vm630_vm5, %v3202_v61, %v3204_v2 }
 0x210   : > { %v5725_v11 = vpop.f32.mrb[28].mxu0  ;;  %4650 = vmatmul.mubr.bf16.gmra.mrb[136].mxu1 %v3201_v16  ;;  %v3101_v0 = vrot.slane %v3099_v45, 3  ;;  %v3279_v8 = vor.u32 %v3278_v27, %v3275_v57  ;;  %v3292_v44 = vrot.slane %v3290_v24, 4 }
 0x211   : > { %v5726_v38 = vpop.f32.mrb[29].mxu0  ;;  %4657 = vmatprep.mubr.bf16.mxu1 %v2888_v25  ;;  %v4245_v37 = vadd.f32 %v5618_v59, %v7975_v60  ;;  %v3295_v59 = vrot.slane %v3293_v21, 5 }
 0x212   : > { %v5727_v26 = vadd.f32 %v5726_v38, %v5725_v11  ;;  %v5728_v14 = vpop.f32.mrb[30].mxu0  ;;  %v3288_v54 = vsel %vm1338_vm2, %v3279_v8, %v3287_v62  ;;  %v3105_v61 = vor.u32 %v3104_v19, %v3101_v0 }
 0x213   : > { %v5729_v16 = vpop.f32.mrb[31].mxu0  ;;  %v5619_v7 = vpop.f32.mrb[32].mxu1  ;;  %v3296_v38 = vor.u32 %v3295_v59, %v3292_v44 }
 0x214   : > { %v8059_v1 = vadd.f32 %v5727_v26, %v4242_v63  ;;  %v5730_v35 = vadd.f32 %v5729_v16, %v5728_v14  ;;  %v5620_v12 = vpop.f32.mrb[33].mxu1  ;;  %v3106_v23 = vsel %vm1516_vm4, %v8045_v43, %v3105_v61  ;;  %v6327_v43 = vld [vmem:[%s8427_s5 + $0x10] sm:$0xff]   ;;  %vm8612_vm4 = vmmov %vm8606_vm15 }
 0x215   : > { %4811 = vmatmul.mubr.bf16.gmra.mrb[136].mxu0 %v3097_v10  ;;  %v5621_v31 = vadd.f32 %v5620_v12, %v5619_v7  ;;  %v5622_v32 = vpop.f32.mrb[34].mxu1  ;;  %v3297_v10 = vsel %vm1338_vm2, %v3287_v62, %v3296_v38  ;;  %v3306_v21 = vsel %vm1338_vm2, %v3296_v38, %v7843_v34  ;;  %6175 = vmatprep.subr.bf16.mxu0 %v6327_v43 }
 0x216   : > { %v8064_v5 = vadd.f32 %v5730_v35, %v4245_v37  ;;  %4818 = vmatprep.mubr.bf16.mxu0 %v3205_v3  ;;  %v5623_v39 = vpop.f32.mrb[35].mxu1  ;;  %6176 = vmatpush3.bf16.msra.mxu0 %v6327_v43 }
 0x217   : > { %v5624_v17 = vadd.f32 %v5623_v39, %v5622_v32  ;;  %v4250_v56 = vadd.f32 %v5621_v31, %v7975_v60 }
 0x218   : > { %v5731_v33 = vpop.f32.mrb[32].mxu0  ;;  %4658 = vmatmul.mubr.bf16.gmra.mrb[140].mxu1 %v2670_v30 }
 0x219   : > { %v5732_v63 = vpop.f32.mrb[33].mxu0  ;;  %6139 = vmatprep.mubr.bf16.mxu1 %v3288_v54  ;;  %v4253_v11 = vadd.f32 %v5624_v17, %v7975_v60 }
 0x21a   : > { %v5733_v25 = vadd.f32 %v5732_v63, %v5731_v33  ;;  %v5734_v45 = vpop.f32.mrb[34].mxu0 }
 0x21b   : > { %v5735_v29 = vpop.f32.mrb[35].mxu0  ;;  %v5625_v48 = vpop.f32.mrb[36].mxu1 }
 0x21c   : > { %v8071_v2 = vadd.f32 %v5733_v25, %v4250_v56  ;;  %v5736_v6 = vadd.f32 %v5735_v29, %v5734_v45  ;;  %v5626_v37 = vpop.f32.mrb[37].mxu1 }
 0x21d   : > { %4819 = vmatmul.mubr.bf16.gmra.mrb[140].mxu0 %v3106_v23  ;;  %v5627_v26 = vadd.f32 %v5626_v37, %v5625_v48  ;;  %v5628_v14 = vpop.f32.mrb[38].mxu1 }
 0x21e   : > { %v8075_v57 = vadd.f32 %v5736_v6, %v4253_v11  ;;  %v5629_v27 = vpop.f32.mrb[39].mxu1 }
 0x21f   : > { %v5630_v16 = vadd.f32 %v5629_v27, %v5628_v14  ;;  %v4258_v7 = vadd.f32 %v5627_v26, %v7975_v60 }
 0x220   : > { %v5737_v24 = vpop.f32.mrb[36].mxu0  ;;  %6140 = vmatmul.mubr.bf16.vlgmr.msra.gmra.mrb[144].mxu1 %v3297_v10 }
 0x221   : > { %v5738_v35 = vpop.f32.mrb[37].mxu0  ;;  %6143 = vmatprep.mubr.bf16.mxu1 %v3306_v21  ;;  %v4261_v12 = vadd.f32 %v5630_v16, %v7975_v60 }
 0x222   : > { %v5739_v0 = vadd.f32 %v5738_v35, %v5737_v24  ;;  %v5740_v19 = vpop.f32.mrb[38].mxu0 }
 0x223   : > { %v5741_v3 = vpop.f32.mrb[39].mxu0  ;;  %v5631_v62 = vpop.f32.mrb[40].mxu1 }
 0x224   : > { %v8085_v31 = vadd.f32 %v5739_v0, %v4258_v7  ;;  %v5742_v32 = vadd.f32 %v5741_v3, %v5740_v19  ;;  %v5632_v39 = vpop.f32.mrb[41].mxu1 }
 0x225   : > { %v5633_v8 = vadd.f32 %v5632_v39, %v5631_v62  ;;  %v5634_v34 = vpop.f32.mrb[42].mxu1 }
 0x226   : > { %v8087_v17 = vadd.f32 %v5742_v32, %v4261_v12  ;;  %v5635_v30 = vpop.f32.mrb[43].mxu1 }
 0x227   : > { %v5636_v44 = vadd.f32 %v5635_v30, %v5634_v34  ;;  %v4266_v59 = vadd.f32 %v5633_v8, %v7975_v60 }
 0x228   : > { %v5743_v56 = vpop.f32.mrb[40].mxu0  ;;  %6144 = vmatmul.mubr.bf16.gmra.mrb[148].mxu1 %v7862_v15 }
 0x229   : > { %v5744_v33 = vpop.f32.mrb[41].mxu0  ;;  %6147 = vmatprep.mubr.bf16.mxu1 %v7865_v42  ;;  %v4269_v54 = vadd.f32 %v5636_v44, %v7975_v60  ;;  %v6328_v42 = vld [vmem:[%s8427_s5 + $0x18] sm:$0xff]  }
 0x22a   : > { %v5745_v61 = vadd.f32 %v5744_v33, %v5743_v56  ;;  %v5746_v63 = vpop.f32.mrb[42].mxu0  ;;  %6177 = vmatprep.subr.bf16.mxu0 %v6328_v42 }
 0x22b   : > { %v5747_v11 = vpop.f32.mrb[43].mxu0  ;;  %v5637_v25 = vpop.f32.mrb[44].mxu1  ;;  %6178 = vmatpush3.bf16.msra.mxu0 %v6328_v42 }
 0x22c   : > { %v8093_v45 = vadd.f32 %v5745_v61, %v4266_v59  ;;  %v5748_v29 = vadd.f32 %v5747_v11, %v5746_v63  ;;  %v5638_v48 = vpop.f32.mrb[45].mxu1 }
 0x22d   : > { %v5639_v38 = vadd.f32 %v5638_v48, %v5637_v25  ;;  %v5640_v6 = vpop.f32.mrb[46].mxu1 }
 0x22e   : > { %v8095_v23 = vadd.f32 %v5748_v29, %v4269_v54  ;;  %v5641_v37 = vpop.f32.mrb[47].mxu1 }
 0x22f   : > { %v5642_v26 = vadd.f32 %v5641_v37, %v5640_v6  ;;  %v4274_v15 = vadd.f32 %v5639_v38, %v7975_v60  ;;  %v3270_v6 = vsel %vm8612_vm4, %v7997_v52, 0 }
 0x230   : > { %v5749_v14 = vpop.f32.mrb[44].mxu0  ;;  %6148 = vmatmul.mubr.bf16.gmra.mrb[152].mxu1 %v7874_v4 }
 0x231   : > { %v5750_v27 = vpop.f32.mrb[45].mxu0  ;;  %6151 = vmatprep.mubr.bf16.mxu1 %v7889_v47  ;;  %v4277_v16 = vadd.f32 %v5642_v26, %v7975_v60 }
 0x232   : > { %v5751_v10 = vadd.f32 %v5750_v27, %v5749_v14  ;;  %v5752_v7 = vpop.f32.mrb[46].mxu0 }
 0x233   : > { %v5753_v24 = vpop.f32.mrb[47].mxu0  ;;  %v5643_v21 = vpop.f32.mrb[48].mxu1 }
 0x234   : > { %v8104_v43 = vadd.f32 %v5751_v10, %v4274_v15  ;;  %v5754_v35 = vadd.f32 %v5753_v24, %v5752_v7  ;;  %v5644_v12 = vpop.f32.mrb[49].mxu1  ;;  %v3407_v10 = vshrl.u32 %v3270_v6, 16  ;;  %v3410_v7 = vshll.u32 %v3270_v6, 16 }
 0x235   : > { %v5645_v4 = vadd.f32 %v5644_v12, %v5643_v21  ;;  %v5646_v0 = vpop.f32.mrb[50].mxu1  ;;  %v3254_v21 = vld [vmem:[#allocation2 + $0x90] sm:$0x1f] }
 0x236   : > { %v8106_v19 = vadd.f32 %v5754_v35, %v4277_v16  ;;  %v5647_v3 = vpop.f32.mrb[51].mxu1 }
 0x237   : > { %v5648_v62 = vadd.f32 %v5647_v3, %v5646_v0  ;;  %v4282_v47 = vadd.f32 %v5645_v4, %v7975_v60  ;;  %v3409_v0 = vrot.slane %v3407_v10, 4  ;;  %v3412_v3 = vrot.slane %v3410_v7, 5 }
 0x238   : > { %v5755_v32 = vpop.f32.mrb[48].mxu0  ;;  %6152 = vmatmul.mubr.bf16.gmra.mrb[156].mxu1 %v7892_v53 }
 0x239   : > { %v5756_v39 = vpop.f32.mrb[49].mxu0  ;;  %6155 = vmatprep.mubr.bf16.mxu1 %v7904_v28  ;;  %v4285_v8 = vadd.f32 %v5648_v62, %v7975_v60  ;;  %v6329_v28 = vld [vmem:[%s8427_s5 + $0x20] sm:$0xff]   ;;  %v3271_v62 = vsel %vm2184_vm13, %v3254_v21, 0 }
 0x23a   : > { %v5757_v34 = vadd.f32 %v5756_v39, %v5755_v32  ;;  %v5758_v30 = vpop.f32.mrb[50].mxu0  ;;  %6179 = vmatprep.subr.bf16.mxu0 %v6329_v28 }
 0x23b   : > { %v5759_v44 = vpop.f32.mrb[51].mxu0  ;;  %v5649_v59 = vpop.f32.mrb[52].mxu1  ;;  %6180 = vmatpush3.bf16.msra.mxu0 %v6329_v28 }
 0x23c   : > { %v8112_v56 = vadd.f32 %v5757_v34, %v4282_v47  ;;  %v5760_v33 = vadd.f32 %v5759_v44, %v5758_v30  ;;  %v5650_v54 = vpop.f32.mrb[53].mxu1  ;;  %v3416_v44 = vshrl.u32 %v3271_v62, 16 }
 0x23d   : > { %v5651_v61 = vadd.f32 %v5650_v54, %v5649_v59  ;;  %v5652_v63 = vpop.f32.mrb[54].mxu1  ;;  %v3419_v59 = vshll.u32 %v3271_v62, 16 }
 0x23e   : > { %v8114_v11 = vadd.f32 %v5760_v33, %v4285_v8  ;;  %v5653_v25 = vpop.f32.mrb[55].mxu1 }
 0x23f   : > { %v5654_v29 = vadd.f32 %v5653_v25, %v5652_v63  ;;  %v4290_v53 = vadd.f32 %v5651_v61, %v7975_v60  ;;  %v3413_v61 = vor.u32 %v3412_v3, %v3409_v0 }
 0x240   : > { %v5761_v48 = vpop.f32.mrb[52].mxu0  ;;  %6156 = vmatmul.mubr.bf16.gmra.mrb[160].mxu1 %v7909_v49 }
 0x241   : > { %v5762_v38 = vpop.f32.mrb[53].mxu0  ;;  %6159 = vmatprep.mubr.bf16.mxu1 %v7912_v51  ;;  %v4293_v37 = vadd.f32 %v5654_v29, %v7975_v60  ;;  %v3414_v6 = vsel %vm1338_vm2, %v7931_v40, %v3413_v61 }
 0x242   : > { %v5763_v26 = vadd.f32 %v5762_v38, %v5761_v48  ;;  %v5764_v15 = vpop.f32.mrb[54].mxu0  ;;  %v3421_v48 = vrot.slane %v3419_v59, 5 }
 0x243   : > { %v5765_v14 = vpop.f32.mrb[55].mxu0  ;;  %v5655_v42 = vpop.f32.mrb[56].mxu1 }
 0x244   : > { %v8126_v49 = vadd.f32 %v5763_v26, %v4290_v53  ;;  %v5766_v27 = vadd.f32 %v5765_v14, %v5764_v15  ;;  %v5656_v16 = vpop.f32.mrb[57].mxu1 }
 0x245   : > { %v5657_v24 = vadd.f32 %v5656_v16, %v5655_v42  ;;  %v5658_v51 = vpop.f32.mrb[58].mxu1 }
 0x246   : > { %v8128_v35 = vadd.f32 %v5766_v27, %v4293_v37  ;;  %v5659_v13 = vpop.f32.mrb[59].mxu1  ;;  %v6330_v37 = vld [vmem:[%s8427_s5 + $0x28] sm:$0xff]  }
 0x247   : > { %v5660_v52 = vadd.f32 %v5659_v13, %v5658_v51  ;;  %v4298_v12 = vadd.f32 %v5657_v24, %v7975_v60  ;;  %6181 = vmatprep.subr.bf16.mxu0 %v6330_v37 }
 0x248   : > { %v5767_v4 = vpop.f32.mrb[56].mxu0  ;;  %6160 = vmatmul.mubr.bf16.gmra.mrb[164].mxu1 %v7927_v18  ;;  %6182 = vmatpush3.bf16.msra.mxu0 %v6330_v37 }
 0x249   : > { %v5768_v47 = vpop.f32.mrb[57].mxu0  ;;  %6163 = vmatprep.mubr.bf16.mxu1 %v7936_v58  ;;  %v4301_v32 = vadd.f32 %v5660_v52, %v7975_v60  ;;  %v3418_v58 = vrot.slane %v3416_v44, 4 }
 0x24a   : > { %v5769_v39 = vadd.f32 %v5768_v47, %v5767_v4  ;;  %v5770_v8 = vpop.f32.mrb[58].mxu0 }
 0x24b   : > { %v5771_v34 = vpop.f32.mrb[59].mxu0  ;;  %v5661_v30 = vpop.f32.mrb[60].mxu1  ;;  %v3422_v10 = vor.u32 %v3421_v48, %v3418_v58 }
 0x24c   : > { %v8136_v33 = vadd.f32 %v5769_v39, %v4298_v12  ;;  %v5772_v54 = vadd.f32 %v5771_v34, %v5770_v8  ;;  %v5662_v18 = vpop.f32.mrb[61].mxu1 }
 0x24d   : > { %v5663_v63 = vadd.f32 %v5662_v18, %v5661_v30  ;;  %v5664_v25 = vpop.f32.mrb[62].mxu1  ;;  %v3423_v12 = vsel %vm1338_vm2, %v3413_v61, %v3422_v10 }
 0x24e   : > { %v8138_v36 = vadd.f32 %v5772_v54, %v4301_v32  ;;  %v5665_v29 = vpop.f32.mrb[63].mxu1 }
 0x24f   : > { %v5666_v53 = vadd.f32 %v5665_v29, %v5664_v25  ;;  %v4306_v28 = vadd.f32 %v5663_v63, %v7975_v60 }
 0x250   : > { %v5773_v38 = vpop.f32.mrb[60].mxu0  ;;  %6164 = vmatmul.mubr.bf16.gmra.mrb[168].mxu1 %v7945_v41 }
 0x251   : > { %v5774_v26 = vpop.f32.mrb[61].mxu0  ;;  %6167 = vmatprep.mubr.bf16.mxu1 %v3414_v6  ;;  %v4309_v15 = vadd.f32 %v5666_v53, %v7975_v60  ;;  %v6331_v53 = vld [vmem:[%s8427_s5 + $0x30] sm:$0xff]  }
 0x252   : > { %v5775_v14 = vadd.f32 %v5774_v26, %v5773_v38  ;;  %v5776_v42 = vpop.f32.mrb[62].mxu0  ;;  %6183 = vmatprep.subr.bf16.mxu0 %v6331_v53 }
 0x253   : > { %v5777_v27 = vpop.f32.mrb[63].mxu0  ;;  %v5667_v16 = vpop.f32.mrb[64].mxu1  ;;  %6184 = vmatpush3.bf16.msra.mxu0 %v6331_v53 }
 0x254   : > { %v8148_v7 = vadd.f32 %v5775_v14, %v4306_v28  ;;  %v5778_v41 = vadd.f32 %v5777_v27, %v5776_v42  ;;  %v5668_v24 = vpop.f32.mrb[65].mxu1 }
 0x255   : > { %v5669_v40 = vadd.f32 %v5668_v24, %v5667_v16  ;;  %v5670_v51 = vpop.f32.mrb[66].mxu1 }
 0x256   : > { %v8150_v21 = vadd.f32 %v5778_v41, %v4309_v15  ;;  %v5671_v13 = vpop.f32.mrb[67].mxu1 }
 0x257   : > { %v5672_v52 = vadd.f32 %v5671_v13, %v5670_v51  ;;  %v4314_v4 = vadd.f32 %v5669_v40, %v7975_v60 }
 0x258   : > { %v5779_v0 = vpop.f32.mrb[64].mxu0  ;;  %6168 = vmatmul.mubr.bf16.gmra.mrb[172].mxu1 %v3423_v12 }
 0x259   : > { %v5780_v3 = vpop.f32.mrb[65].mxu0  ;;  %v4317_v62 = vadd.f32 %v5672_v52, %v7975_v60 }
 0x25a   : > { %v5781_v47 = vadd.f32 %v5780_v3, %v5779_v0  ;;  %v5782_v32 = vpop.f32.mrb[66].mxu0 }
 0x25b   : > { %v5783_v39 = vpop.f32.mrb[67].mxu0  ;;  %v5673_v8 = vpop.f32.mrb[68].mxu1 }
 0x25c   : > { %v8155_v34 = vadd.f32 %v5781_v47, %v4314_v4  ;;  %v5784_v30 = vadd.f32 %v5783_v39, %v5782_v32  ;;  %v5674_v44 = vpop.f32.mrb[69].mxu1 }
 0x25d   : > { %v5675_v59 = vadd.f32 %v5674_v44, %v5673_v8  ;;  %v5676_v54 = vpop.f32.mrb[70].mxu1 }
 0x25e   : > { %v8157_v18 = vadd.f32 %v5784_v30, %v4317_v62  ;;  %v5677_v61 = vpop.f32.mrb[71].mxu1 }
 0x25f   : > { %v5678_v63 = vadd.f32 %v5677_v61, %v5676_v54  ;;  %v4322_v25 = vadd.f32 %v5675_v59, %v7975_v60  ;;  %v6332_v61 = vld [vmem:[%s8427_s5 + $0x38] sm:$0xff]  }
 0x260   : > { %v5785_v29 = vpop.f32.mrb[68].mxu0  ;;  %6185 = vmatprep.subr.bf16.mxu0 %v6332_v61 }
 0x261   : > { %v5786_v58 = vpop.f32.mrb[69].mxu0  ;;  %v4325_v48 = vadd.f32 %v5678_v63, %v7975_v60  ;;  %6186 = vmatpush3.bf16.msra.mxu0 %v6332_v61 }
 0x262   : > { %v5787_v28 = vadd.f32 %v5786_v58, %v5785_v29  ;;  %v5788_v38 = vpop.f32.mrb[70].mxu0 }
 0x263   : > { %v5789_v6 = vpop.f32.mrb[71].mxu0  ;;  %v5679_v37 = vpop.f32.mrb[72].mxu1 }
 0x264   : > { %v8164_v26 = vadd.f32 %v5787_v28, %v4322_v25  ;;  %v5790_v15 = vadd.f32 %v5789_v6, %v5788_v38  ;;  %v5680_v14 = vpop.f32.mrb[73].mxu1 }
 0x265   : > { %v5681_v42 = vadd.f32 %v5680_v14, %v5679_v37  ;;  %v5682_v27 = vpop.f32.mrb[74].mxu1 }
 0x266   : > { %v8166_v16 = vadd.f32 %v5790_v15, %v4325_v48  ;;  %v5683_v10 = vpop.f32.mrb[75].mxu1 }
 0x267   : > { %v5684_v41 = vadd.f32 %v5683_v10, %v5682_v27  ;;  %v4330_v24 = vadd.f32 %v5681_v42, %v7975_v60 }
 0x268   : > { %v5791_v40 = vpop.f32.mrb[72].mxu0 }
 0x269   : > { %v5792_v51 = vpop.f32.mrb[73].mxu0  ;;  %v4333_v13 = vadd.f32 %v5684_v41, %v7975_v60 }
 0x26a   : > { %v5793_v52 = vadd.f32 %v5792_v51, %v5791_v40  ;;  %v5794_v12 = vpop.f32.mrb[74].mxu0 }
 0x26b   : > { %v5795_v4 = vpop.f32.mrb[75].mxu0  ;;  %v5685_v0 = vpop.f32.mrb[76].mxu1 }
 0x26c   : > { %v8170_v3 = vadd.f32 %v5793_v52, %v4330_v24  ;;  %v5796_v62 = vadd.f32 %v5795_v4, %v5794_v12  ;;  %v5686_v47 = vpop.f32.mrb[77].mxu1 }
 0x26d   : > { %v5687_v32 = vadd.f32 %v5686_v47, %v5685_v0  ;;  %v5688_v39 = vpop.f32.mrb[78].mxu1 }
 0x26e   : > { %v8172_v8 = vadd.f32 %v5796_v62, %v4333_v13  ;;  %v5689_v30 = vpop.f32.mrb[79].mxu1 }
 0x26f   : > { %v5690_v44 = vadd.f32 %v5689_v30, %v5688_v39  ;;  %v4338_v59 = vadd.f32 %v5687_v32, %v7975_v60 }
 0x270   : > { %v5797_v54 = vpop.f32.mrb[76].mxu0 }
 0x271   : > { %v5798_v63 = vpop.f32.mrb[77].mxu0  ;;  %v4341_v25 = vadd.f32 %v5690_v44, %v7975_v60 }
 0x272   : > { %v5799_v29 = vadd.f32 %v5798_v63, %v5797_v54  ;;  %v5800_v53 = vpop.f32.mrb[78].mxu0 }
 0x273   : > { %v5801_v58 = vpop.f32.mrb[79].mxu0  ;;  %v5819_v48 = vpop.f32.mrb[80].mxu1 }
 0x274   : > { %v8179_v28 = vadd.f32 %v5799_v29, %v4338_v59  ;;  %v5802_v38 = vadd.f32 %v5801_v58, %v5800_v53  ;;  %v5820_v6 = vpop.f32.mrb[81].mxu1 }
 0x275   : > { %v5821_v37 = vadd.f32 %v5820_v6, %v5819_v48  ;;  %v5822_v15 = vpop.f32.mrb[82].mxu1 }
 0x276   : > { %v8181_v14 = vadd.f32 %v5802_v38, %v4341_v25  ;;  %v5823_v42 = vpop.f32.mrb[83].mxu1 }
 0x277   : > { %v4540_v27 = vadd.f32 %v5821_v37, %v7984_v22  ;;  %v5824_v10 = vadd.f32 %v5823_v42, %v5822_v15 }
 0x278   : > { %v5931_v41 = vpop.f32.mrb[80].mxu0 }
 0x279   : > { %v4543_v60 = vadd.f32 %v5824_v10, %v7991_v50  ;;  %v5932_v24 = vpop.f32.mrb[81].mxu0 }
 0x27a   : > { %v5933_v40 = vadd.f32 %v5932_v24, %v5931_v41  ;;  %v5934_v51 = vpop.f32.mrb[82].mxu0 }
 0x27b   : > { %v5935_v13 = vpop.f32.mrb[83].mxu0  ;;  %v5825_v52 = vpop.f32.mrb[84].mxu1 }
 0x27c   : > { %v5936_v12 = vadd.f32 %v5935_v13, %v5934_v51  ;;  %v5826_v4 = vpop.f32.mrb[85].mxu1  ;;  %v8185_v0 = vadd.f32 %v5933_v40, %v4540_v27 }
 0x27d   : > { %v5827_v62 = vadd.f32 %v5826_v4, %v5825_v52  ;;  %v5828_v47 = vpop.f32.mrb[86].mxu1 }
 0x27e   : > { %v5829_v32 = vpop.f32.mrb[87].mxu1  ;;  %v8187_v39 = vadd.f32 %v5936_v12, %v4543_v60 }
 0x27f   : > { %v4548_v22 = vadd.f32 %v5827_v62, %v8015_v46  ;;  %v5830_v30 = vadd.f32 %v5829_v32, %v5828_v47 }
 0x280   : > { %v5937_v44 = vpop.f32.mrb[84].mxu0 }
 0x281   : > { %v4551_v50 = vadd.f32 %v5830_v30, %v8019_v55  ;;  %v5938_v59 = vpop.f32.mrb[85].mxu0 }
 0x282   : > { %v5939_v54 = vadd.f32 %v5938_v59, %v5937_v44  ;;  %v5940_v61 = vpop.f32.mrb[86].mxu0 }
 0x283   : > { %v5941_v63 = vpop.f32.mrb[87].mxu0  ;;  %v5831_v25 = vpop.f32.mrb[88].mxu1 }
 0x284   : > { %v5942_v29 = vadd.f32 %v5941_v63, %v5940_v61  ;;  %v5832_v53 = vpop.f32.mrb[89].mxu1  ;;  %v8191_v58 = vadd.f32 %v5939_v54, %v4548_v22 }
 0x285   : > { %v5833_v48 = vadd.f32 %v5832_v53, %v5831_v25  ;;  %v5834_v38 = vpop.f32.mrb[90].mxu1 }
 0x286   : > { %v5835_v6 = vpop.f32.mrb[91].mxu1  ;;  %v8193_v37 = vadd.f32 %v5942_v29, %v4551_v50 }
 0x287   : > { %v4556_v46 = vadd.f32 %v5833_v48, %v8032_v20  ;;  %v5836_v15 = vadd.f32 %v5835_v6, %v5834_v38 }
 0x288   : > { %v5943_v42 = vpop.f32.mrb[88].mxu0 }
 0x289   : > { %v4559_v55 = vadd.f32 %v5836_v15, %v8043_v9  ;;  %v5944_v27 = vpop.f32.mrb[89].mxu0 }
 0x28a   : > { %v5945_v10 = vadd.f32 %v5944_v27, %v5943_v42  ;;  %v5946_v41 = vpop.f32.mrb[90].mxu0 }
 0x28b   : > { %v5947_v60 = vpop.f32.mrb[91].mxu0  ;;  %v5837_v24 = vpop.f32.mrb[92].mxu1 }
 0x28c   : > { %v5948_v40 = vadd.f32 %v5947_v60, %v5946_v41  ;;  %v5838_v51 = vpop.f32.mrb[93].mxu1  ;;  %v8197_v13 = vadd.f32 %v5945_v10, %v4556_v46 }
 0x28d   : > { %v5839_v52 = vadd.f32 %v5838_v51, %v5837_v24  ;;  %v5840_v12 = vpop.f32.mrb[94].mxu1 }
 0x28e   : > { %v5841_v4 = vpop.f32.mrb[95].mxu1  ;;  %v8199_v62 = vadd.f32 %v5948_v40, %v4559_v55 }
 0x28f   : > { %v4564_v20 = vadd.f32 %v5839_v52, %v8059_v1  ;;  %v5842_v47 = vadd.f32 %v5841_v4, %v5840_v12 }
 0x290   : > { %v5949_v32 = vpop.f32.mrb[92].mxu0 }
 0x291   : > { %v4567_v9 = vadd.f32 %v5842_v47, %v8064_v5  ;;  %v5950_v22 = vpop.f32.mrb[93].mxu0 }
 0x292   : > { %v5951_v30 = vadd.f32 %v5950_v22, %v5949_v32  ;;  %v5952_v44 = vpop.f32.mrb[94].mxu0 }
 0x293   : > { %v5953_v50 = vpop.f32.mrb[95].mxu0  ;;  %v5843_v59 = vpop.f32.mrb[96].mxu1 }
 0x294   : > { %v5954_v54 = vadd.f32 %v5953_v50, %v5952_v44  ;;  %v5844_v61 = vpop.f32.mrb[97].mxu1  ;;  %v8203_v63 = vadd.f32 %v5951_v30, %v4564_v20 }
 0x295   : > { %v5845_v25 = vadd.f32 %v5844_v61, %v5843_v59  ;;  %v5846_v29 = vpop.f32.mrb[98].mxu1 }
 0x296   : > { %v5847_v53 = vpop.f32.mrb[99].mxu1  ;;  %v8205_v48 = vadd.f32 %v5954_v54, %v4567_v9 }
 0x297   : > { %v4572_v1 = vadd.f32 %v5845_v25, %v8071_v2  ;;  %v5848_v38 = vadd.f32 %v5847_v53, %v5846_v29 }
 0x298   : > { %v5955_v6 = vpop.f32.mrb[96].mxu0 }
 0x299   : > { %v4575_v5 = vadd.f32 %v5848_v38, %v8075_v57  ;;  %v5956_v46 = vpop.f32.mrb[97].mxu0 }
 0x29a   : > { %v5957_v15 = vadd.f32 %v5956_v46, %v5955_v6  ;;  %v5958_v42 = vpop.f32.mrb[98].mxu0 }
 0x29b   : > { %v5959_v55 = vpop.f32.mrb[99].mxu0  ;;  %v5849_v27 = vpop.f32.mrb[100].mxu1 }
 0x29c   : > { %v5960_v10 = vadd.f32 %v5959_v55, %v5958_v42  ;;  %v5850_v41 = vpop.f32.mrb[101].mxu1  ;;  %v8209_v60 = vadd.f32 %v5957_v15, %v4572_v1 }
 0x29d   : > { %v5851_v24 = vadd.f32 %v5850_v41, %v5849_v27  ;;  %v5852_v40 = vpop.f32.mrb[102].mxu1 }
 0x29e   : > { %v5853_v51 = vpop.f32.mrb[103].mxu1  ;;  %v8211_v52 = vadd.f32 %v5960_v10, %v4575_v5 }
 0x29f   : > { %v4580_v2 = vadd.f32 %v5851_v24, %v8085_v31  ;;  %v5854_v12 = vadd.f32 %v5853_v51, %v5852_v40 }
 0x2a0   : > { %v5961_v4 = vpop.f32.mrb[100].mxu0 }
 0x2a1   : > { %v4583_v57 = vadd.f32 %v5854_v12, %v8087_v17  ;;  %v5962_v20 = vpop.f32.mrb[101].mxu0 }
 0x2a2   : > { %v5963_v47 = vadd.f32 %v5962_v20, %v5961_v4  ;;  %v5964_v32 = vpop.f32.mrb[102].mxu0 }
 0x2a3   : > { %v5965_v9 = vpop.f32.mrb[103].mxu0  ;;  %v5855_v22 = vpop.f32.mrb[104].mxu1 }
 0x2a4   : > { %v5966_v30 = vadd.f32 %v5965_v9, %v5964_v32  ;;  %v5856_v44 = vpop.f32.mrb[105].mxu1  ;;  %v8215_v50 = vadd.f32 %v5963_v47, %v4580_v2 }
 0x2a5   : > { %v5857_v59 = vadd.f32 %v5856_v44, %v5855_v22  ;;  %v5858_v54 = vpop.f32.mrb[106].mxu1 }
 0x2a6   : > { %v5859_v61 = vpop.f32.mrb[107].mxu1  ;;  %v8217_v25 = vadd.f32 %v5966_v30, %v4583_v57 }
 0x2a7   : > { %v4588_v31 = vadd.f32 %v5857_v59, %v8093_v45  ;;  %v5860_v29 = vadd.f32 %v5859_v61, %v5858_v54 }
 0x2a8   : > { %v5967_v53 = vpop.f32.mrb[104].mxu0 }
 0x2a9   : > { %v4591_v17 = vadd.f32 %v5860_v29, %v8095_v23  ;;  %v5968_v1 = vpop.f32.mrb[105].mxu0 }
 0x2aa   : > { %v5969_v38 = vadd.f32 %v5968_v1, %v5967_v53  ;;  %v5970_v6 = vpop.f32.mrb[106].mxu0 }
 0x2ab   : > { %v5971_v5 = vpop.f32.mrb[107].mxu0  ;;  %v5861_v46 = vpop.f32.mrb[108].mxu1 }
 0x2ac   : > { %v5972_v15 = vadd.f32 %v5971_v5, %v5970_v6  ;;  %v5862_v42 = vpop.f32.mrb[109].mxu1  ;;  %v8221_v55 = vadd.f32 %v5969_v38, %v4588_v31 }
 0x2ad   : > { %v5863_v27 = vadd.f32 %v5862_v42, %v5861_v46  ;;  %v5864_v10 = vpop.f32.mrb[110].mxu1 }
 0x2ae   : > { %v5865_v41 = vpop.f32.mrb[111].mxu1  ;;  %v8223_v24 = vadd.f32 %v5972_v15, %v4591_v17 }
 0x2af   : > { %v4596_v45 = vadd.f32 %v5863_v27, %v8104_v43  ;;  %v5866_v40 = vadd.f32 %v5865_v41, %v5864_v10 }
 0x2b0   : > { %v5973_v51 = vpop.f32.mrb[108].mxu0 }
 0x2b1   : > { %v4599_v23 = vadd.f32 %v5866_v40, %v8106_v19  ;;  %v5974_v2 = vpop.f32.mrb[109].mxu0 }
 0x2b2   : > { %v5975_v12 = vadd.f32 %v5974_v2, %v5973_v51  ;;  %v5976_v4 = vpop.f32.mrb[110].mxu0 }
 0x2b3   : > { %v5977_v57 = vpop.f32.mrb[111].mxu0  ;;  %v5867_v20 = vpop.f32.mrb[112].mxu1 }
 0x2b4   : > { %v5978_v47 = vadd.f32 %v5977_v57, %v5976_v4  ;;  %v5868_v32 = vpop.f32.mrb[113].mxu1  ;;  %v8227_v9 = vadd.f32 %v5975_v12, %v4596_v45 }
 0x2b5   : > { %v5869_v22 = vadd.f32 %v5868_v32, %v5867_v20  ;;  %v5870_v30 = vpop.f32.mrb[114].mxu1 }
 0x2b6   : > { %v5871_v44 = vpop.f32.mrb[115].mxu1  ;;  %v8229_v59 = vadd.f32 %v5978_v47, %v4599_v23 }
 0x2b7   : > { %v4604_v43 = vadd.f32 %v5869_v22, %v8112_v56  ;;  %v5872_v54 = vadd.f32 %v5871_v44, %v5870_v30 }
 0x2b8   : > { %v5979_v61 = vpop.f32.mrb[112].mxu0 }
 0x2b9   : > { %v4607_v19 = vadd.f32 %v5872_v54, %v8114_v11  ;;  %v5980_v31 = vpop.f32.mrb[113].mxu0 }
 0x2ba   : > { %v5981_v29 = vadd.f32 %v5980_v31, %v5979_v61  ;;  %v5982_v53 = vpop.f32.mrb[114].mxu0 }
 0x2bb   : > { %v5983_v17 = vpop.f32.mrb[115].mxu0  ;;  %v5873_v1 = vpop.f32.mrb[116].mxu1 }
 0x2bc   : > { %v5984_v38 = vadd.f32 %v5983_v17, %v5982_v53  ;;  %v5874_v6 = vpop.f32.mrb[117].mxu1  ;;  %v8233_v5 = vadd.f32 %v5981_v29, %v4604_v43 }
 0x2bd   : > { %v5875_v46 = vadd.f32 %v5874_v6, %v5873_v1  ;;  %v5876_v15 = vpop.f32.mrb[118].mxu1 }
 0x2be   : > { %v5877_v42 = vpop.f32.mrb[119].mxu1  ;;  %v8235_v27 = vadd.f32 %v5984_v38, %v4607_v19 }
 0x2bf   : > { %v4612_v56 = vadd.f32 %v5875_v46, %v8126_v49  ;;  %v5878_v10 = vadd.f32 %v5877_v42, %v5876_v15 }
 0x2c0   : > { %v5985_v41 = vpop.f32.mrb[116].mxu0 }
 0x2c1   : > { %v4615_v11 = vadd.f32 %v5878_v10, %v8128_v35  ;;  %v5986_v45 = vpop.f32.mrb[117].mxu0 }
 0x2c2   : > { %v5987_v40 = vadd.f32 %v5986_v45, %v5985_v41  ;;  %v5988_v51 = vpop.f32.mrb[118].mxu0 }
 0x2c3   : > { %v5989_v23 = vpop.f32.mrb[119].mxu0  ;;  %v5879_v2 = vpop.f32.mrb[120].mxu1 }
 0x2c4   : > { %v5990_v12 = vadd.f32 %v5989_v23, %v5988_v51  ;;  %v5880_v4 = vpop.f32.mrb[121].mxu1  ;;  %v8239_v57 = vadd.f32 %v5987_v40, %v4612_v56 }
 0x2c5   : > { %v5881_v20 = vadd.f32 %v5880_v4, %v5879_v2  ;;  %v5882_v47 = vpop.f32.mrb[122].mxu1 }
 0x2c6   : > { %v5883_v32 = vpop.f32.mrb[123].mxu1  ;;  %v8241_v22 = vadd.f32 %v5990_v12, %v4615_v11 }
 0x2c7   : > { %v4620_v49 = vadd.f32 %v5881_v20, %v8136_v33  ;;  %v5884_v30 = vadd.f32 %v5883_v32, %v5882_v47 }
 0x2c8   : > { %v5991_v44 = vpop.f32.mrb[120].mxu0 }
 0x2c9   : > { %v4623_v35 = vadd.f32 %v5884_v30, %v8138_v36  ;;  %v5992_v43 = vpop.f32.mrb[121].mxu0 }
 0x2ca   : > { %v5993_v54 = vadd.f32 %v5992_v43, %v5991_v44  ;;  %v5994_v61 = vpop.f32.mrb[122].mxu0 }
 0x2cb   : > { %v5995_v19 = vpop.f32.mrb[123].mxu0  ;;  %v5885_v31 = vpop.f32.mrb[124].mxu1 }
 0x2cc   : > { %v5996_v29 = vadd.f32 %v5995_v19, %v5994_v61  ;;  %v5886_v53 = vpop.f32.mrb[125].mxu1  ;;  %v8245_v17 = vadd.f32 %v5993_v54, %v4620_v49 }
 0x2cd   : > { %v5887_v1 = vadd.f32 %v5886_v53, %v5885_v31  ;;  %v5888_v38 = vpop.f32.mrb[126].mxu1 }
 0x2ce   : > { %v5889_v6 = vpop.f32.mrb[127].mxu1  ;;  %v8247_v46 = vadd.f32 %v5996_v29, %v4623_v35 }
 0x2cf   : > { %v4628_v33 = vadd.f32 %v5887_v1, %v8148_v7  ;;  %v5890_v15 = vadd.f32 %v5889_v6, %v5888_v38 }
 0x2d0   : > { %v5997_v42 = vpop.f32.mrb[124].mxu0 }
 0x2d1   : > { %v4631_v36 = vadd.f32 %v5890_v15, %v8150_v21  ;;  %v5998_v56 = vpop.f32.mrb[125].mxu0 }
 0x2d2   : > { %v5999_v10 = vadd.f32 %v5998_v56, %v5997_v42  ;;  %v6000_v41 = vpop.f32.mrb[126].mxu0 }
 0x2d3   : > { %v6001_v11 = vpop.f32.mrb[127].mxu0  ;;  %v5891_v45 = vpop.f32.mrb[128].mxu1 }
 0x2d4   : > { %v6002_v40 = vadd.f32 %v6001_v11, %v6000_v41  ;;  %v5892_v51 = vpop.f32.mrb[129].mxu1  ;;  %v8251_v23 = vadd.f32 %v5999_v10, %v4628_v33 }
 0x2d5   : > { %v5893_v2 = vadd.f32 %v5892_v51, %v5891_v45  ;;  %v5894_v12 = vpop.f32.mrb[130].mxu1 }
 0x2d6   : > { %v5895_v4 = vpop.f32.mrb[131].mxu1  ;;  %v8253_v20 = vadd.f32 %v6002_v40, %v4631_v36 }
 0x2d7   : > { %v4636_v7 = vadd.f32 %v5893_v2, %v8155_v34  ;;  %v5896_v47 = vadd.f32 %v5895_v4, %v5894_v12 }
 0x2d8   : > { %v6003_v32 = vpop.f32.mrb[128].mxu0 }
 0x2d9   : > { %v4639_v21 = vadd.f32 %v5896_v47, %v8157_v18  ;;  %v6004_v49 = vpop.f32.mrb[129].mxu0 }
 0x2da   : > { %v6005_v30 = vadd.f32 %v6004_v49, %v6003_v32  ;;  %v6006_v44 = vpop.f32.mrb[130].mxu0 }
 0x2db   : > { %v6007_v35 = vpop.f32.mrb[131].mxu0  ;;  %v5897_v43 = vpop.f32.mrb[132].mxu1 }
 0x2dc   : > { %v6008_v54 = vadd.f32 %v6007_v35, %v6006_v44  ;;  %v5898_v61 = vpop.f32.mrb[133].mxu1  ;;  %v8257_v19 = vadd.f32 %v6005_v30, %v4636_v7 }
 0x2dd   : > { %v5899_v31 = vadd.f32 %v5898_v61, %v5897_v43  ;;  %v5900_v29 = vpop.f32.mrb[134].mxu1 }
 0x2de   : > { %v5901_v53 = vpop.f32.mrb[135].mxu1  ;;  %v8259_v1 = vadd.f32 %v6008_v54, %v4639_v21 }
 0x2df   : > { %v4644_v34 = vadd.f32 %v5899_v31, %v8164_v26  ;;  %v5902_v38 = vadd.f32 %v5901_v53, %v5900_v29 }
 0x2e0   : > { %v6009_v6 = vpop.f32.mrb[132].mxu0 }
 0x2e1   : > { %v4647_v18 = vadd.f32 %v5902_v38, %v8166_v16  ;;  %v6010_v33 = vpop.f32.mrb[133].mxu0 }
 0x2e2   : > { %v6011_v15 = vadd.f32 %v6010_v33, %v6009_v6  ;;  %v6012_v42 = vpop.f32.mrb[134].mxu0 }
 0x2e3   : > { %v6013_v36 = vpop.f32.mrb[135].mxu0  ;;  %v5903_v56 = vpop.f32.mrb[136].mxu1 }
 0x2e4   : > { %v6014_v10 = vadd.f32 %v6013_v36, %v6012_v42  ;;  %v5904_v41 = vpop.f32.mrb[137].mxu1  ;;  %v8263_v11 = vadd.f32 %v6011_v15, %v4644_v34 }
 0x2e5   : > { %v5905_v45 = vadd.f32 %v5904_v41, %v5903_v56  ;;  %v5906_v40 = vpop.f32.mrb[138].mxu1 }
 0x2e6   : > { %v5907_v51 = vpop.f32.mrb[139].mxu1  ;;  %v8265_v2 = vadd.f32 %v6014_v10, %v4647_v18 }
 0x2e7   : > { %v4652_v26 = vadd.f32 %v5905_v45, %v8170_v3  ;;  %v5908_v12 = vadd.f32 %v5907_v51, %v5906_v40 }
 0x2e8   : > { %v6015_v4 = vpop.f32.mrb[136].mxu0 }
 0x2e9   : > { %v4655_v16 = vadd.f32 %v5908_v12, %v8172_v8  ;;  %v6016_v7 = vpop.f32.mrb[137].mxu0 }
 0x2ea   : > { %v6017_v47 = vadd.f32 %v6016_v7, %v6015_v4  ;;  %v6018_v32 = vpop.f32.mrb[138].mxu0 }
 0x2eb   : > { %v6019_v21 = vpop.f32.mrb[139].mxu0  ;;  %v5909_v49 = vpop.f32.mrb[140].mxu1 }
 0x2ec   : > { %v6020_v30 = vadd.f32 %v6019_v21, %v6018_v32  ;;  %v5910_v44 = vpop.f32.mrb[141].mxu1  ;;  %v8269_v35 = vadd.f32 %v6017_v47, %v4652_v26 }
 0x2ed   : > { %v5911_v43 = vadd.f32 %v5910_v44, %v5909_v49  ;;  %v5912_v54 = vpop.f32.mrb[142].mxu1 }
 0x2ee   : > { %v5913_v61 = vpop.f32.mrb[143].mxu1  ;;  %v8271_v31 = vadd.f32 %v6020_v30, %v4655_v16 }
 0x2ef   : > { %v4660_v3 = vadd.f32 %v5911_v43, %v8179_v28  ;;  %v5914_v29 = vadd.f32 %v5913_v61, %v5912_v54 }
 0x2f0   : > { %v6021_v53 = vpop.f32.mrb[140].mxu0 }
 0x2f1   : > { %v4663_v8 = vadd.f32 %v5914_v29, %v8181_v14  ;;  %v6022_v34 = vpop.f32.mrb[141].mxu0 }
 0x2f2   : > { %v6023_v38 = vadd.f32 %v6022_v34, %v6021_v53  ;;  %v6024_v6 = vpop.f32.mrb[142].mxu0 }
 0x2f3   : > { %v6025_v18 = vpop.f32.mrb[143].mxu0  ;;  %v6141_v33 = vpop.f32.mrb[144].mxu1 }
 0x2f4   : > { %v6026_v15 = vadd.f32 %v6025_v18, %v6024_v6  ;;  %v4870_v42 = vadd.f32 %v6141_v33, %v8191_v58  ;;  %v4861_v36 = vpop.f32.mrb[145].mxu1  ;;  %v8276_v56 = vadd.f32 %v6023_v38, %v4660_v3 }
 0x2f5   : > { %v4862_v10 = vadd.f32 %v4861_v36, %v8185_v0  ;;  %v6142_v41 = vpop.f32.mrb[146].mxu1 }
 0x2f6   : > { %v4873_v28 = vadd.f32 %v6142_v41, %v8193_v37  ;;  %v4864_v45 = vpop.f32.mrb[147].mxu1  ;;  %v8280_v40 = vadd.f32 %v6026_v15, %v4663_v8  ;;  %v4990_v51 = vmax.f32 %v4870_v42, 0.0 }
 0x2f7   : > { %v4865_v14 = vadd.f32 %v4864_v45, %v8187_v39  ;;  %v4988_v12 = vmax.f32 %v4862_v10, 0.0 }
 0x2f8   : > { %v4991_v26 = vmax.f32 %v4873_v28, 0.0 }
 0x2f9   : > { %v4989_v4 = vmax.f32 %v4865_v14, 0.0 }
 0x2fa   : > { %v5021_v16 = vpack.c.bf16 %v4991_v26, %v4990_v51 }
 0x2fb   : > { %v5020_v7 = vpack.c.bf16 %v4989_v4, %v4988_v12  ;;  %v6145_v58 = vpop.f32.mrb[148].mxu1 }
 0x2fc   : > { %v4886_v47 = vadd.f32 %v6145_v58, %v8203_v63  ;;  %v4877_v32 = vpop.f32.mrb[149].mxu1 }
 0x2fd   : > { %v4878_v0 = vadd.f32 %v4877_v32, %v8197_v13  ;;  %v6146_v21 = vpop.f32.mrb[150].mxu1  ;;  %6187 = vmatprep.mubr.bf16.mxu0 %v5020_v7 }
 0x2fe   : > { %v4889_v37 = vadd.f32 %v6146_v21, %v8205_v48  ;;  %v4880_v49 = vpop.f32.mrb[151].mxu1  ;;  %6188 = vmatmul.mubr.bf16.vlgmr.msra.gmra.mrb[144].mxu0 %v5021_v16  ;;  %v4994_v30 = vmax.f32 %v4886_v47, 0.0 }
 0x2ff   : > { %v4881_v39 = vadd.f32 %v4880_v49, %v8199_v62  ;;  %v4992_v43 = vmax.f32 %v4878_v0, 0.0 }
 0x300   : > { %v4995_v44 = vmax.f32 %v4889_v37, 0.0 }
 0x301   : > { %v4993_v54 = vmax.f32 %v4881_v39, 0.0 }
 0x302   : > { %v5023_v61 = vpack.c.bf16 %v4995_v44, %v4994_v30 }
 0x303   : > { %v5022_v3 = vpack.c.bf16 %v4993_v54, %v4992_v43  ;;  %v6149_v29 = vpop.f32.mrb[152].mxu1 }
 0x304   : > { %v4902_v63 = vadd.f32 %v6149_v29, %v8215_v50  ;;  %v4893_v53 = vpop.f32.mrb[153].mxu1 }
 0x305   : > { %v4894_v13 = vadd.f32 %v4893_v53, %v8209_v60  ;;  %v6150_v8 = vpop.f32.mrb[154].mxu1  ;;  %6191 = vmatprep.mubr.bf16.mxu0 %v5022_v3 }
 0x306   : > { %v4905_v48 = vadd.f32 %v6150_v8, %v8217_v25  ;;  %v4896_v34 = vpop.f32.mrb[155].mxu1  ;;  %6192 = vmatmul.mubr.bf16.gmra.mrb[148].mxu0 %v5023_v61  ;;  %v4998_v38 = vmax.f32 %v4902_v63, 0.0 }
 0x307   : > { %v4897_v62 = vadd.f32 %v4896_v34, %v8211_v52  ;;  %v4996_v18 = vmax.f32 %v4894_v13, 0.0 }
 0x308   : > { %v4999_v6 = vmax.f32 %v4905_v48, 0.0 }
 0x309   : > { %v4997_v33 = vmax.f32 %v4897_v62, 0.0 }
 0x30a   : > { %v5025_v15 = vpack.c.bf16 %v4999_v6, %v4998_v38 }
 0x30b   : > { %v5024_v42 = vpack.c.bf16 %v4997_v33, %v4996_v18  ;;  %v6153_v36 = vpop.f32.mrb[156].mxu1 }
 0x30c   : > { %v4918_v50 = vadd.f32 %v6153_v36, %v8227_v9  ;;  %v4909_v10 = vpop.f32.mrb[157].mxu1 }
 0x30d   : > { %v4910_v60 = vadd.f32 %v4909_v10, %v8221_v55  ;;  %v6154_v41 = vpop.f32.mrb[158].mxu1  ;;  %6195 = vmatprep.mubr.bf16.mxu0 %v5024_v42 }
 0x30e   : > { %v4921_v25 = vadd.f32 %v6154_v41, %v8229_v59  ;;  %v4912_v28 = vpop.f32.mrb[159].mxu1  ;;  %6196 = vmatmul.mubr.bf16.gmra.mrb[152].mxu0 %v5025_v15  ;;  %v5002_v45 = vmax.f32 %v4918_v50, 0.0 }
 0x30f   : > { %v4913_v52 = vadd.f32 %v4912_v28, %v8223_v24  ;;  %v5000_v51 = vmax.f32 %v4910_v60, 0.0 }
 0x310   : > { %v5003_v14 = vmax.f32 %v4921_v25, 0.0 }
 0x311   : > { %v5001_v26 = vmax.f32 %v4913_v52, 0.0 }
 0x312   : > { %v5027_v12 = vpack.c.bf16 %v5003_v14, %v5002_v45 }
 0x313   : > { %v5026_v4 = vpack.c.bf16 %v5001_v26, %v5000_v51  ;;  %v6157_v16 = vpop.f32.mrb[160].mxu1 }
 0x314   : > { %v4934_v9 = vadd.f32 %v6157_v16, %v8239_v57  ;;  %v4925_v7 = vpop.f32.mrb[161].mxu1 }
 0x315   : > { %v4926_v55 = vadd.f32 %v4925_v7, %v8233_v5  ;;  %v6158_v58 = vpop.f32.mrb[162].mxu1  ;;  %6199 = vmatprep.mubr.bf16.mxu0 %v5026_v4  ;;  %v6334_v7 = vld [vmem:[%s6440_s12] sm:$0xff] }
 0x316   : > { %v4937_v59 = vadd.f32 %v6158_v58, %v8241_v22  ;;  %v4928_v47 = vpop.f32.mrb[163].mxu1  ;;  %6200 = vmatmul.mubr.bf16.gmra.mrb[156].mxu0 %v5027_v12  ;;  %v5006_v32 = vmax.f32 %v4934_v9, 0.0  ;;  %v6333_v12 = vld [vmem:[%s6440_s12 + $0x10] sm:$0xff] }
 0x317   : > { %v4929_v24 = vadd.f32 %v4928_v47, %v8235_v27  ;;  %v5004_v21 = vmax.f32 %v4926_v55, 0.0  ;;  %v6335_v47 = vld [vmem:[%s6440_s12 + $0x18] sm:$0xff] }
 0x318   : > { %v5007_v0 = vmax.f32 %v4937_v59, 0.0 }
 0x319   : > { %v5005_v37 = vmax.f32 %v4929_v24, 0.0 }
 0x31a   : > { %v5029_v49 = vpack.c.bf16 %v5007_v0, %v5006_v32  ;;  %v6336_v0 = vld [vmem:[%s6440_s12 + $0x8] sm:$0xff] }
 0x31b   : > { %v5028_v39 = vpack.c.bf16 %v5005_v37, %v5004_v21  ;;  %v6161_v30 = vpop.f32.mrb[164].mxu1 }
 0x31c   : > { %v4950_v57 = vadd.f32 %v6161_v30, %v8251_v23  ;;  %v4941_v44 = vpop.f32.mrb[165].mxu1 }
 0x31d   : > { %v4942_v5 = vadd.f32 %v4941_v44, %v8245_v17  ;;  %v6162_v43 = vpop.f32.mrb[166].mxu1  ;;  %6203 = vmatprep.mubr.bf16.mxu0 %v5028_v39 }
 0x31e   : > { %v4953_v22 = vadd.f32 %v6162_v43, %v8253_v20  ;;  %v4944_v54 = vpop.f32.mrb[167].mxu1  ;;  %6204 = vmatmul.mubr.bf16.gmra.mrb[160].mxu0 %v5029_v49  ;;  %v5010_v61 = vmax.f32 %v4950_v57, 0.0  ;;  %v6337_v43 = vld [vmem:[%s6440_s12 + $0x30] sm:$0xff] }
 0x31f   : > { %v4945_v27 = vadd.f32 %v4944_v54, %v8247_v46  ;;  %v5008_v29 = vmax.f32 %v4942_v5, 0.0 }
 0x320   : > { %v5011_v3 = vmax.f32 %v4953_v22, 0.0 }
 0x321   : > { %v5009_v63 = vmax.f32 %v4945_v27, 0.0 }
 0x322   : > { %v5031_v53 = vpack.c.bf16 %v5011_v3, %v5010_v61  ;;  %v6338_v61 = vld [vmem:[%s6440_s12 + $0x20] sm:$0xff] }
 0x323   : > { %v5030_v13 = vpack.c.bf16 %v5009_v63, %v5008_v29  ;;  %v6165_v8 = vpop.f32.mrb[168].mxu1 }
 0x324   : > { %v4966_v23 = vadd.f32 %v6165_v8, %v8263_v11  ;;  %v4957_v48 = vpop.f32.mrb[169].mxu1 }
 0x325   : > { %v4958_v17 = vadd.f32 %v4957_v48, %v8257_v19  ;;  %v6166_v34 = vpop.f32.mrb[170].mxu1  ;;  %6207 = vmatprep.mubr.bf16.mxu0 %v5030_v13 }
 0x326   : > { %v4969_v20 = vadd.f32 %v6166_v34, %v8265_v2  ;;  %v4960_v62 = vpop.f32.mrb[171].mxu1  ;;  %6208 = vmatmul.mubr.bf16.gmra.mrb[164].mxu0 %v5031_v53  ;;  %v5014_v38 = vmax.f32 %v4966_v23, 0.0  ;;  %v6339_v53 = vld [vmem:[%s6440_s12 + $0x38] sm:$0xff]  ;;  %v6340_v23 = vld [vmem:[%s6440_s12 + $0x28] sm:$0xff] }
 0x327   : > { %v4961_v46 = vadd.f32 %v4960_v62, %v8259_v1  ;;  %v5012_v18 = vmax.f32 %v4958_v17, 0.0 }
 0x328   : > { %v5015_v6 = vmax.f32 %v4969_v20, 0.0 }
 0x329   : > { %v5013_v33 = vmax.f32 %v4961_v46, 0.0 }
 0x32a   : > { %v5033_v15 = vpack.c.bf16 %v5015_v6, %v5014_v38 }
 0x32b   : > { %v5032_v42 = vpack.c.bf16 %v5013_v33, %v5012_v18  ;;  %v6169_v36 = vpop.f32.mrb[172].mxu1  ;;  %v6341_v18 = vld [vmem:[%s6440_s12 + $0x50] sm:$0xff] }
 0x32c   : > { %v4982_v11 = vadd.f32 %v6169_v36, %v8276_v56  ;;  %v4973_v50 = vpop.f32.mrb[173].mxu1  ;;  %v6342_v36 = vld [vmem:[%s6440_s12 + $0x40] sm:$0xff] }
 0x32d   : > { %v4974_v19 = vadd.f32 %v4973_v50, %v8269_v35  ;;  %v6170_v10 = vpop.f32.mrb[174].mxu1  ;;  %6211 = vmatprep.mubr.bf16.mxu0 %v5032_v42  ;;  %v8314_v35 = vld [vmem:[%s8428_s6] ss:$0 sm:$0xff] }
 0x32e   : > { %v4985_v2 = vadd.f32 %v6170_v10, %v8280_v40  ;;  %v4976_v60 = vpop.f32.mrb[175].mxu1  ;;  %6212 = vmatmul.mubr.bf16.gmra.mrb[168].mxu0 %v5033_v15  ;;  %v5018_v41 = vmax.f32 %v4982_v11, 0.0  ;;  %v6343_v10 = vld [vmem:[%s6440_s12 + $0x58] sm:$0xff] }
 0x32f   : > { %v4977_v1 = vadd.f32 %v4976_v60, %v8271_v31  ;;  %v5016_v28 = vmax.f32 %v4974_v19, 0.0 }
 0x330   : > { %v5019_v25 = vmax.f32 %v4985_v2, 0.0 }
 0x331   : > { %v5017_v52 = vmax.f32 %v4977_v1, 0.0  ;;  %v6344_v1 = vld [vmem:[%s6440_s12 + $0x48] sm:$0xff] }
 0x332   : > { %v5035_v45 = vpack.c.bf16 %v5019_v25, %v5018_v41 }
 0x333   : > { %v5034_v56 = vpack.c.bf16 %v5017_v52, %v5016_v28 }
 0x335   : > { %6215 = vmatprep.mubr.bf16.mxu0 %v5034_v56 }
 0x336   : > { %6216 = vmatmul.mubr.bf16.gmra.mrb[172].mxu0 %v5035_v45 }
 0x3d1   : > { %v6189_v40 = vpop.f32.mrb[144].mxu0 }
 0x3d2   : > { %v5150_v14 = vadd.f32 %v6189_v40, %v8314_v35  ;;  %v5141_v31 = vpop.f32.mrb[145].mxu0 }
 0x3d3   : > { %v5142_v51 = vadd.f32 %v8314_v35, %v5141_v31  ;;  %v6190_v26 = vpop.f32.mrb[146].mxu0  ;;  %v6345_v31 = vld [vmem:[%s6440_s12 + $0x70] sm:$0xff] }
 0x3d4   : > { %v5270_v4 = vadd.f32 %v6333_v12, %v5150_v14  ;;  %v5153_v16 = vadd.f32 %v6190_v26, %v8314_v35  ;;  %v5144_v9 = vpop.f32.mrb[147].mxu0 }
 0x3d5   : > { %v5268_v55 = vadd.f32 %v6334_v7, %v5142_v51  ;;  %v5145_v58 = vadd.f32 %v8314_v35, %v5144_v9 }
 0x3d6   : > { %v5302_v59 = vmax.f32 %v5270_v4, 0.0  ;;  %v5271_v24 = vadd.f32 %v6335_v47, %v5153_v16  ;;  %v6346_v4 = vld [vmem:[%s6440_s12 + $0x60] sm:$0xff]  ;;  %v6348_v47 = vld [vmem:[%s6440_s12 + $0x68] sm:$0xff] }
 0x3d7   : > { %v5300_v32 = vmax.f32 %v5268_v55, 0.0  ;;  %v5269_v21 = vadd.f32 %v6336_v0, %v5145_v58  ;;  %v6347_v55 = vld [vmem:[%s6440_s12 + $0x78] sm:$0xff] }
 0x3d8   : > { %5334 = vst [vmem:[%s8325_s20 + $0x10] sm:$0xff] %v5302_v59  ;;  %v5303_v37 = vmax.f32 %v5271_v24, 0.0 }
 0x3d9   : > { %5332 = vst [vmem:[%s8325_s20] sm:$0xff] %v5300_v32  ;;  %v5301_v49 = vmax.f32 %v5269_v21, 0.0  ;;  %v6193_v39 = vpop.f32.mrb[148].mxu0 }
 0x3da   : > { %5335 = vst [vmem:[%s8325_s20 + $0x18] sm:$0xff] %v5303_v37  ;;  %v5166_v30 = vadd.f32 %v6193_v39, %v8314_v35  ;;  %v5157_v57 = vpop.f32.mrb[149].mxu0 }
 0x3db   : > { %5333 = vst [vmem:[%s8325_s20 + $0x8] sm:$0xff] %v5301_v49  ;;  %v5158_v44 = vadd.f32 %v8314_v35, %v5157_v57  ;;  %v6194_v5 = vpop.f32.mrb[150].mxu0  ;;  %v6349_v57 = vld [vmem:[%s6440_s12 + $0x90] sm:$0xff] }
 0x3dc   : > { %v5274_v22 = vadd.f32 %v6337_v43, %v5166_v30  ;;  %v5169_v54 = vadd.f32 %v6194_v5, %v8314_v35  ;;  %v5160_v27 = vpop.f32.mrb[151].mxu0 }
 0x3dd   : > { %v5272_v3 = vadd.f32 %v6338_v61, %v5158_v44  ;;  %v5161_v29 = vadd.f32 %v8314_v35, %v5160_v27 }
 0x3de   : > { %v5306_v63 = vmax.f32 %v5274_v22, 0.0  ;;  %v5275_v13 = vadd.f32 %v6339_v53, %v5169_v54  ;;  %v6350_v22 = vld [vmem:[%s6440_s12 + $0x80] sm:$0xff]  ;;  %v6352_v53 = vld [vmem:[%s6440_s12 + $0x88] sm:$0xff] }
 0x3df   : > { %v5304_v8 = vmax.f32 %v5272_v3, 0.0  ;;  %v5273_v48 = vadd.f32 %v6340_v23, %v5161_v29  ;;  %v6351_v3 = vld [vmem:[%s6440_s12 + $0x98] sm:$0xff] }
 0x3e0   : > { %5338 = vst [vmem:[%s8325_s20 + $0x30] sm:$0xff] %v5306_v63  ;;  %v5307_v17 = vmax.f32 %v5275_v13, 0.0 }
 0x3e1   : > { %5336 = vst [vmem:[%s8325_s20 + $0x20] sm:$0xff] %v5304_v8  ;;  %v5305_v34 = vmax.f32 %v5273_v48, 0.0  ;;  %v6197_v20 = vpop.f32.mrb[152].mxu0 }
 0x3e2   : > { %5339 = vst [vmem:[%s8325_s20 + $0x38] sm:$0xff] %v5307_v17  ;;  %v5182_v62 = vadd.f32 %v6197_v20, %v8314_v35  ;;  %v5173_v46 = vpop.f32.mrb[153].mxu0 }
 0x3e3   : > { %5337 = vst [vmem:[%s8325_s20 + $0x28] sm:$0xff] %v5305_v34  ;;  %v5174_v38 = vadd.f32 %v8314_v35, %v5173_v46  ;;  %v6198_v6 = vpop.f32.mrb[154].mxu0  ;;  %v6353_v46 = vld [vmem:[%s6440_s12 + $0xb0] sm:$0xff] }
 0x3e4   : > { %v5278_v33 = vadd.f32 %v6341_v18, %v5182_v62  ;;  %v5185_v15 = vadd.f32 %v6198_v6, %v8314_v35  ;;  %v5176_v42 = vpop.f32.mrb[155].mxu0 }
 0x3e5   : > { %v5276_v11 = vadd.f32 %v6342_v36, %v5174_v38  ;;  %v5177_v50 = vadd.f32 %v8314_v35, %v5176_v42 }
 0x3e6   : > { %v5310_v19 = vmax.f32 %v5278_v33, 0.0  ;;  %v5279_v2 = vadd.f32 %v6343_v10, %v5185_v15  ;;  %v6354_v33 = vld [vmem:[%s6440_s12 + $0xa0] sm:$0xff]  ;;  %v6356_v10 = vld [vmem:[%s6440_s12 + $0xa8] sm:$0xff] }
 0x3e7   : > { %v5308_v60 = vmax.f32 %v5276_v11, 0.0  ;;  %v5277_v41 = vadd.f32 %v6344_v1, %v5177_v50  ;;  %v6355_v11 = vld [vmem:[%s6440_s12 + $0xb8] sm:$0xff] }
 0x3e8   : > { %5342 = vst [vmem:[%s8325_s20 + $0x50] sm:$0xff] %v5310_v19  ;;  %v5311_v25 = vmax.f32 %v5279_v2, 0.0 }
 0x3e9   : > { %5340 = vst [vmem:[%s8325_s20 + $0x40] sm:$0xff] %v5308_v60  ;;  %v5309_v28 = vmax.f32 %v5277_v41, 0.0  ;;  %v6201_v52 = vpop.f32.mrb[156].mxu0 }
 0x3ea   : > { %5343 = vst [vmem:[%s8325_s20 + $0x58] sm:$0xff] %v5311_v25  ;;  %v5198_v45 = vadd.f32 %v6201_v52, %v8314_v35  ;;  %v5189_v56 = vpop.f32.mrb[157].mxu0 }
 0x3eb   : > { %5341 = vst [vmem:[%s8325_s20 + $0x48] sm:$0xff] %v5309_v28  ;;  %v5190_v40 = vadd.f32 %v8314_v35, %v5189_v56  ;;  %v6202_v14 = vpop.f32.mrb[158].mxu0  ;;  %v6357_v56 = vld [vmem:[%s6440_s12 + $0xd0] sm:$0xff] }
 0x3ec   : > { %v5282_v51 = vadd.f32 %v6345_v31, %v5198_v45  ;;  %v5201_v26 = vadd.f32 %v6202_v14, %v8314_v35  ;;  %v5192_v12 = vpop.f32.mrb[159].mxu0 }
 0x3ed   : > { %v5280_v16 = vadd.f32 %v6346_v4, %v5190_v40  ;;  %v5193_v9 = vadd.f32 %v8314_v35, %v5192_v12 }
 0x3ee   : > { %v5314_v7 = vmax.f32 %v5282_v51, 0.0  ;;  %v5283_v58 = vadd.f32 %v6347_v55, %v5201_v26  ;;  %v6358_v51 = vld [vmem:[%s6440_s12 + $0xc0] sm:$0xff]  ;;  %v6360_v55 = vld [vmem:[%s6440_s12 + $0xc8] sm:$0xff] }
 0x3ef   : > { %v5312_v59 = vmax.f32 %v5280_v16, 0.0  ;;  %v5281_v24 = vadd.f32 %v6348_v47, %v5193_v9  ;;  %v6359_v16 = vld [vmem:[%s6440_s12 + $0xd8] sm:$0xff] }
 0x3f0   : > { %5346 = vst [vmem:[%s8325_s20 + $0x70] sm:$0xff] %v5314_v7  ;;  %v5315_v32 = vmax.f32 %v5283_v58, 0.0 }
 0x3f1   : > { %5344 = vst [vmem:[%s8325_s20 + $0x60] sm:$0xff] %v5312_v59  ;;  %v5313_v0 = vmax.f32 %v5281_v24, 0.0  ;;  %v6205_v21 = vpop.f32.mrb[160].mxu0 }
 0x3f2   : > { %5347 = vst [vmem:[%s8325_s20 + $0x78] sm:$0xff] %v5315_v32  ;;  %v5214_v37 = vadd.f32 %v6205_v21, %v8314_v35  ;;  %v5205_v49 = vpop.f32.mrb[161].mxu0 }
 0x3f3   : > { %5345 = vst [vmem:[%s8325_s20 + $0x68] sm:$0xff] %v5313_v0  ;;  %v5206_v39 = vadd.f32 %v8314_v35, %v5205_v49  ;;  %v6206_v30 = vpop.f32.mrb[162].mxu0  ;;  %v6361_v49 = vld [vmem:[%s6440_s12 + $0xf0] sm:$0xff] }
 0x3f4   : > { %v5286_v44 = vadd.f32 %v6349_v57, %v5214_v37  ;;  %v5217_v5 = vadd.f32 %v6206_v30, %v8314_v35  ;;  %v5208_v43 = vpop.f32.mrb[163].mxu0 }
 0x3f5   : > { %v5284_v54 = vadd.f32 %v6350_v22, %v5206_v39  ;;  %v5209_v27 = vadd.f32 %v8314_v35, %v5208_v43 }
 0x3f6   : > { %v5318_v61 = vmax.f32 %v5286_v44, 0.0  ;;  %v5287_v29 = vadd.f32 %v6351_v3, %v5217_v5  ;;  %v6362_v44 = vld [vmem:[%s6440_s12 + $0xe0] sm:$0xff]  ;;  %v6364_v3 = vld [vmem:[%s6440_s12 + $0xe8] sm:$0xff] }
 0x3f7   : > { %v5316_v63 = vmax.f32 %v5284_v54, 0.0  ;;  %v5285_v13 = vadd.f32 %v6352_v53, %v5209_v27  ;;  %v6363_v54 = vld [vmem:[%s6440_s12 + $0xf8] sm:$0xff] }
 0x3f8   : > { %5350 = vst [vmem:[%s8325_s20 + $0x90] sm:$0xff] %v5318_v61  ;;  %v5319_v8 = vmax.f32 %v5287_v29, 0.0 }
 0x3f9   : > { %5348 = vst [vmem:[%s8325_s20 + $0x80] sm:$0xff] %v5316_v63  ;;  %v5317_v23 = vmax.f32 %v5285_v13, 0.0  ;;  %v6209_v48 = vpop.f32.mrb[164].mxu0 }
 0x3fa   : > { %5351 = vst [vmem:[%s8325_s20 + $0x98] sm:$0xff] %v5319_v8  ;;  %v5230_v17 = vadd.f32 %v6209_v48, %v8314_v35  ;;  %v5221_v34 = vpop.f32.mrb[165].mxu0 }
 0x3fb   : > { %5349 = vst [vmem:[%s8325_s20 + $0x88] sm:$0xff] %v5317_v23  ;;  %v5222_v20 = vadd.f32 %v8314_v35, %v5221_v34  ;;  %v6210_v62 = vpop.f32.mrb[166].mxu0 }
 0x3fc   : > { %v5290_v38 = vadd.f32 %v6353_v46, %v5230_v17  ;;  %v5233_v6 = vadd.f32 %v6210_v62, %v8314_v35  ;;  %v5224_v18 = vpop.f32.mrb[167].mxu0 }
 0x3fd   : > { %v5288_v15 = vadd.f32 %v6354_v33, %v5222_v20  ;;  %v5225_v42 = vadd.f32 %v8314_v35, %v5224_v18 }
 0x3fe   : > { %v5322_v36 = vmax.f32 %v5290_v38, 0.0  ;;  %v5291_v50 = vadd.f32 %v6355_v11, %v5233_v6 }
 0x3ff   : > { %v5320_v19 = vmax.f32 %v5288_v15, 0.0  ;;  %v5289_v2 = vadd.f32 %v6356_v10, %v5225_v42 }
 0x400   : > { %5354 = vst [vmem:[%s8325_s20 + $0xb0] sm:$0xff] %v5322_v36  ;;  %v5323_v60 = vmax.f32 %v5291_v50, 0.0 }
 0x401   : > { %5352 = vst [vmem:[%s8325_s20 + $0xa0] sm:$0xff] %v5320_v19  ;;  %v5321_v1 = vmax.f32 %v5289_v2, 0.0  ;;  %v6213_v41 = vpop.f32.mrb[168].mxu0 }
 0x402   : > { %5355 = vst [vmem:[%s8325_s20 + $0xb8] sm:$0xff] %v5323_v60  ;;  %v5246_v25 = vadd.f32 %v6213_v41, %v8314_v35  ;;  %v5237_v28 = vpop.f32.mrb[169].mxu0 }
 0x403   : > { %5353 = vst [vmem:[%s8325_s20 + $0xa8] sm:$0xff] %v5321_v1  ;;  %v5238_v52 = vadd.f32 %v8314_v35, %v5237_v28  ;;  %v6214_v45 = vpop.f32.mrb[170].mxu0 }
 0x404   : > { %v5294_v40 = vadd.f32 %v6357_v56, %v5246_v25  ;;  %v5249_v14 = vadd.f32 %v6214_v45, %v8314_v35  ;;  %v5240_v31 = vpop.f32.mrb[171].mxu0 }
 0x405   : > { %v5292_v26 = vadd.f32 %v6358_v51, %v5238_v52  ;;  %v5241_v12 = vadd.f32 %v8314_v35, %v5240_v31 }
 0x406   : > { %v5326_v4 = vmax.f32 %v5294_v40, 0.0  ;;  %v5295_v9 = vadd.f32 %v6359_v16, %v5249_v14 }
 0x407   : > { %v5324_v7 = vmax.f32 %v5292_v26, 0.0  ;;  %v5293_v58 = vadd.f32 %v6360_v55, %v5241_v12 }
 0x408   : > { %5358 = vst [vmem:[%s8325_s20 + $0xd0] sm:$0xff] %v5326_v4  ;;  %v5327_v59 = vmax.f32 %v5295_v9, 0.0 }
 0x409   : > { %5356 = vst [vmem:[%s8325_s20 + $0xc0] sm:$0xff] %v5324_v7  ;;  %v5325_v47 = vmax.f32 %v5293_v58, 0.0  ;;  %v6217_v24 = vpop.f32.mrb[172].mxu0 }
 0x40a   : > { %5359 = vst [vmem:[%s8325_s20 + $0xd8] sm:$0xff] %v5327_v59  ;;  %v5262_v32 = vadd.f32 %v6217_v24, %v8314_v35  ;;  %v5253_v0 = vpop.f32.mrb[173].mxu0 }
 0x40b   : > { %5357 = vst [vmem:[%s8325_s20 + $0xc8] sm:$0xff] %v5325_v47  ;;  %v5254_v21 = vadd.f32 %v8314_v35, %v5253_v0  ;;  %v6218_v37 = vpop.f32.mrb[174].mxu0 }
 0x40c   : > { %v5298_v39 = vadd.f32 %v6361_v49, %v5262_v32  ;;  %v5265_v30 = vadd.f32 %v6218_v37, %v8314_v35  ;;  %v5256_v57 = vpop.f32.mrb[175].mxu0 }
 0x40d   : > { %v5296_v5 = vadd.f32 %v6362_v44, %v5254_v21  ;;  %v5257_v43 = vadd.f32 %v8314_v35, %v5256_v57 }
 0x40e   : > { %v5330_v22 = vmax.f32 %v5298_v39, 0.0  ;;  %v5299_v27 = vadd.f32 %v6363_v54, %v5265_v30 }
 0x40f   : > { %v5328_v61 = vmax.f32 %v5296_v5, 0.0  ;;  %v5297_v29 = vadd.f32 %v6364_v3, %v5257_v43 }
 0x410   : > { %5362 = vst [vmem:[%s8325_s20 + $0xf0] sm:$0xff] %v5330_v22  ;;  %v5331_v63 = vmax.f32 %v5299_v27, 0.0 }
 0x411   : > { %5360 = vst [vmem:[%s8325_s20 + $0xe0] sm:$0xff] %v5328_v61  ;;  %v5329_v53 = vmax.f32 %v5297_v29, 0.0 }
 0x412   : > { %5363 = vst [vmem:[%s8325_s20 + $0xf8] sm:$0xff] %v5331_v63 }
 0x413   : > { %5361 = vst [vmem:[%s8325_s20 + $0xe8] sm:$0xff] %v5329_v53 }
 0x414 PF: > { %s17_s24 = sadd.s32 1, %s6371_s24  }
 0x415   : > { %p14_p4 = scmp.ge.s32.totalorder %s17_s24, 4  }
 0x417   :  { %16 = sbr.rel (!%p14_p4) target bundleno = 1 (0x1), region = 78 }

</bundles_post_ra>
